<compile_context>
chip_gen: v7x
topology: tpu7x:2x2x1
jax: 0.10.0
libtpu: 0.0.40
codegen_flags: <defaults>
</compile_context>

<pallas_src>
import numpy as np
import jax
import jax.numpy as jnp
from jax.experimental import pallas as pl
from jax.experimental.pallas import tpu as pltpu


def _left_pad(k):
    # PyTorch padding='same' (stride 1): left = (k-1)//2, right = k-1-left.
    return (k - 1) // 2


def _round_up(a, m):
    return -(-a // m) * m


# ------------------------------ Pallas kernel ------------------------------

def _eegnet_mlp_kernel(x_ref, w1_ref, b1_ref, w2_ref, b2_ref, w3_ref, b3_ref,
                       o_ref):
    def elu(a):
        # clamp the exp argument so the dead branch cannot overflow
        return jnp.where(a > 0, a, jnp.exp(jnp.minimum(a, 0.0)) - 1.0)

    # batch on the sublane/M axis, features on the lane/N axis (lane dense)
    a1 = jnp.dot(x_ref[...], w1_ref[...],
                 preferred_element_type=jnp.float32) + b1_ref[...]
    a1 = elu(a1).astype(jnp.bfloat16)
    a2 = jnp.dot(a1, w2_ref[...],
                 preferred_element_type=jnp.float32) + b2_ref[...]
    a2 = elu(a2).astype(jnp.bfloat16)
    o_ref[...] = jnp.dot(a2, w3_ref[...],
                         preferred_element_type=jnp.float32) + b3_ref[...]


def _pick_batch_block(B, tb_max=512):
    """Batch block on the sublane (M) axis: 8-row granularity.

    Large blocks amortize the ~0.35us per-grid-step overhead; once the batch
    is big enough we force >= 2 grid steps so the "parallel" axis can be
    sharded across both v7x TensorCores."""
    if B <= 8:
        return B, B                                   # one block, no padding
    n_steps = max(2, -(-B // tb_max)) if B >= 256 else 1
    tb = _round_up(-(-B // n_steps), 8)
    bp = _round_up(B, tb)
    return tb, bp


def eegnet1d_forward(x, folded, cfg, *, tb_max=512):
    """x: (B, Cin, T) float. Returns logits (B, n_out) float32."""
    B, Cin, T = x.shape
    n_out = cfg["n_out"]
    kin = Cin * T

    # Minor-dim merge (no HBM transpose); bf16 cast halves x DMA into VMEM.
    x2 = x.reshape(B, kin).astype(jnp.bfloat16)

    tb, bp = _pick_batch_block(B, tb_max)
    if bp != B:
        x2 = jnp.pad(x2, ((0, bp - B), (0, 0)))       # zero-pad batch tail

    weights = [folded["W1"], folded["B1"], folded["W2"], folded["B2"],
               folded["W3"], folded["B3"]]
    n1 = folded["W1"].shape[1]
    n2 = folded["W2"].shape[1]

    flops = 2 * bp * (kin * n1 + n1 * n2 + n2 * n_out)
    transcendentals = bp * (n1 + n2)                   # one exp per ELU lane
    bytes_accessed = (x2.size * x2.dtype.itemsize
                      + sum(w.size * w.dtype.itemsize for w in weights)
                      + bp * n_out * 4)

    def run(single_buffer_weights):
        def wspec(a):
            kw = {}
            if single_buffer_weights:
                # constant block index across the grid -> one VMEM buffer
                kw["pipeline_mode"] = pl.Buffered(1)
            nd = a.ndim
            return pl.BlockSpec(a.shape, lambda b, _nd=nd: (0,) * _nd, **kw)

        return pl.pallas_call(
            _eegnet_mlp_kernel,
            out_shape=jax.ShapeDtypeStruct((bp, n_out), jnp.float32),
            grid_spec=pltpu.PrefetchScalarGridSpec(
                num_scalar_prefetch=0,
                grid=(bp // tb,),
                in_specs=[pl.BlockSpec((tb, kin), lambda b: (b, 0))]
                         + [wspec(w) for w in weights],
                out_specs=pl.BlockSpec((tb, n_out), lambda b: (b, 0)),
            ),
            compiler_params=pltpu.CompilerParams(
                dimension_semantics=("parallel",)),
            cost_estimate=pl.CostEstimate(
                flops=flops, transcendentals=transcendentals,
                bytes_accessed=bytes_accessed),
        )(x2, *weights)

    try:
        out = run(single_buffer_weights=True)
    except Exception:
        # TODO(synk): pipeline_mode=pl.Buffered(1) on pallas_call BlockSpecs is
        # not accepted by every Pallas version; default double-buffered specs
        # are still only ~3 MiB of bf16 weights, well under all VMEM limits.
        out = run(single_buffer_weights=False)

    return out[:B]


# --------------------------- host-side parameters ---------------------------

def init_raw_params(key, cfg):
    """Raw (un-folded) parameters in PyTorch layouts, as float64 numpy."""
    Cin, T, K1, f1, d, f2, K3, n_out = (cfg["Cin"], cfg["T"], cfg["K1"],
                                        cfg["f1"], cfg["d"], cfg["f2"],
                                        cfg["K3"], cfg["n_out"])
    dF1 = d * f1
    L2 = T // 4 // 8
    ks = jax.random.split(key, 13)

    def normal(k, shape, scale):
        return np.asarray(scale * jax.random.normal(k, shape), np.float64)

    def bn_stats(k, c):
        k1, k2, k3, k4 = jax.random.split(k, 4)
        gamma = np.asarray(1.0 + 0.1 * jax.random.normal(k1, (c,)), np.float64)
        beta = np.asarray(0.1 * jax.random.normal(k2, (c,)), np.float64)
        mean = np.asarray(0.1 * jax.random.normal(k3, (c,)), np.float64)
        var = np.asarray(1.0 + 0.1 * jax.random.uniform(k4, (c,)), np.float64)
        return gamma, beta, mean, var

    return dict(
        w1=normal(ks[0], (f1, Cin, K1), 0.1), b1=normal(ks[1], (f1,), 0.1),
        bn1=bn_stats(ks[2], f1),
        w2=normal(ks[3], (dF1,), 0.3), b2=normal(ks[4], (dF1,), 0.1),
        bn2=bn_stats(ks[5], dF1),
        w3=normal(ks[6], (f2, K3), 0.1), b3=normal(ks[7], (f2,), 0.1),
        w4=normal(ks[8], (f2, f2), 0.15), b4=normal(ks[9], (f2,), 0.1),
        bn3=bn_stats(ks[10], f2),
        wl=normal(ks[11], (n_out, f2 * L2), 0.2),
        bl=normal(ks[12], (n_out,), 0.1),
    )


def _bn_affine(bn, eps=1e-5):
    gamma, beta, mean, var = bn
    s = gamma / np.sqrt(var + eps)
    return s, beta - mean * s


def fold_params(raw, cfg):
    """One-time f64 fold of all linear stages into three matrices + biases.

    Weights are returned PRE-TRANSPOSED (K, N) in bf16 so the kernel computes
    `act @ W` with the batch on the MXU-M axis; biases are (1, N) f32 rows."""
    Cin, T, K1, f1, d, f2, K3, n_out = (cfg["Cin"], cfg["T"], cfg["K1"],
                                        cfg["f1"], cfg["d"], cfg["f2"],
                                        cfg["K3"], cfg["n_out"])
    dF1 = d * f1
    # The fold assumes the pooling windows tile T exactly (true for the module
    # defaults); PyTorch AvgPool1d would floor otherwise.
    assert T % 4 == 0 and (T // 4) % 8 == 0, "T must be divisible by 32"
    # Depthwise conv3 fold assumes one output channel per group.
    assert f2 == dF1, "fold assumes f2 == d*f1"
    T4 = T // 4
    L2 = T4 // 8
    pL1, pL3 = _left_pad(K1), _left_pad(K3)

    s1, h1 = _bn_affine(raw["bn1"])
    s2, h2 = _bn_affine(raw["bn2"])
    s3, h3 = _bn_affine(raw["bn3"])
    w1, b1 = raw["w1"], raw["b1"]
    w2s, b2 = raw["w2"], raw["b2"]
    w3, b3 = raw["w3"], raw["b3"]
    w4, b4 = raw["w4"], raw["b4"]
    wl, bl = raw["wl"], raw["bl"]

    # ---- stage 1: conv1 + bn1 + conv2 (grouped 1x1) + bn2 -------------------
    j = np.arange(dF1)
    c0 = j // d                                   # source f1-channel per dF1-channel
    A = s2 * w2s * s1[c0]
    C = s2 * (w2s * (s1[c0] * b1[c0] + h1[c0]) + b2) + h2
    w1eff = A[:, None, None] * w1[c0]             # (dF1, Cin, K1)

    W1 = np.zeros((dF1 * T, Cin * T))
    rows = np.arange(dF1)[:, None] * T
    cols = np.arange(Cin)[None, :] * T
    for t in range(T):
        for k in range(K1):
            u = t + k - pL1                       # cross-correlation, 'same' pad
            if 0 <= u < T:
                W1[rows + t, cols + u] = w1eff[:, :, k]
    B1 = np.repeat(C, T)

    # ---- pool1 (AvgPool1d(4)) as a block-diagonal matrix --------------------
    Pm1 = np.zeros((T4, T))
    Pm1[np.arange(T4)[:, None],
        (np.arange(T4) * 4)[:, None] + np.arange(4)[None, :]] = 0.25
    P1 = np.kron(np.eye(dF1), Pm1)                # (dF1*T4, dF1*T)

    # ---- stage 2: conv3 (depthwise) + conv4 (1x1) + bn3, pool1 folded in ----
    sw4 = s3[:, None] * w4                        # (f2, dF1)
    W34 = np.zeros((f2 * T4, dF1 * T4))
    rows2 = np.arange(f2)[:, None] * T4
    cols2 = np.arange(dF1)[None, :] * T4
    for p in range(T4):
        for k in range(K3):
            q = p + k - pL3
            if 0 <= q < T4:
                W34[rows2 + p, cols2 + q] = sw4 * w3[:, k][None, :]
    B2 = np.repeat(s3 * (w4 @ b3 + b4) + h3, T4)
    W2 = W34 @ P1                                 # (f2*T4, dF1*T); dropout = identity

    # ---- stage 3: pool2 (AvgPool1d(8)) + flatten + linear --------------------
    W3 = np.zeros((n_out, f2 * T4))
    for i in range(f2):
        for p in range(T4):
            W3[:, i * T4 + p] = wl[:, i * L2 + p // 8] / 8.0
    B3 = bl

    def row(v):
        return jnp.asarray(v.reshape(1, -1), jnp.float32)

    return dict(W1=jnp.asarray(W1.T, jnp.bfloat16), B1=row(B1),
                W2=jnp.asarray(W2.T, jnp.bfloat16), B2=row(B2),
                W3=jnp.asarray(W3.T, jnp.bfloat16), B3=row(B3))


# ------------------------------ numpy reference ------------------------------

def reference_forward(x_np, raw, cfg):
    """Layer-by-layer f64 reference matching the PyTorch module (eval mode)."""
    Cin, T, K1, f1, d, f2, K3, n_out = (cfg["Cin"], cfg["T"], cfg["K1"],
                                        cfg["f1"], cfg["d"], cfg["f2"],
                                        cfg["K3"], cfg["n_out"])
    dF1 = d * f1
    T4 = T // 4
    L2 = T4 // 8
    pL1, pR1 = _left_pad(K1), K1 - 1 - _left_pad(K1)
    pL3, pR3 = _left_pad(K3), K3 - 1 - _left_pad(K3)
    s1, h1 = _bn_affine(raw["bn1"])
    s2, h2 = _bn_affine(raw["bn2"])
    s3, h3 = _bn_affine(raw["bn3"])
    w1, b1 = raw["w1"], raw["b1"]
    w2s, b2 = raw["w2"], raw["b2"]
    w3, b3 = raw["w3"], raw["b3"]
    w4, b4 = raw["w4"], raw["b4"]
    wl, bl = raw["wl"], raw["bl"]

    outs = []
    for b in range(x_np.shape[0]):
        xb = np.asarray(x_np[b], np.float64)
        xp = np.pad(xb, ((0, 0), (pL1, pR1)))                  # conv1 'same'
        y = np.zeros((f1, T))
        for k in range(K1):
            y += w1[:, :, k] @ xp[:, k:k + T]
        y = (y + b1[:, None]) * s1[:, None] + h1[:, None]      # bn1
        z = w2s[:, None] * y[np.arange(dF1) // d] + b2[:, None]  # conv2 grouped 1x1
        z = z * s2[:, None] + h2[:, None]                      # bn2
        z = np.where(z > 0, z, np.exp(z) - 1.0)                # elu1
        z = z.reshape(dF1, T4, 4).mean(axis=2)                 # pool1 (do1 = id)
        zp = np.pad(z, ((0, 0), (pL3, pR3)))                   # conv3 'same'
        y3 = np.zeros((f2, T4))
        for k in range(K3):
            y3 += w3[:, k:k + 1] * zp[:, k:k + T4]
        y3 += b3[:, None]
        y4 = w4 @ y3 + b4[:, None]                             # conv4
        y4 = y4 * s3[:, None] + h3[:, None]                    # bn3
        y4 = np.where(y4 > 0, y4, np.exp(y4) - 1.0)            # elu2
        p2 = y4.reshape(f2, L2, 8).mean(axis=2)                # pool2 (do2 = id)
        outs.append(wl @ p2.reshape(-1) + bl)                  # flatten + linear
    return np.stack(outs).astype(np.float32)


if __name__ == "__main__":
    # EEGNet1D(n_samples=64, n_classes=4, n_channels=8, f1=8, d=2, f2=16, kernel_length=8)
    n_samples, n_classes, n_channels = 64, 4, 8
    f1, d, f2, kernel_length = 8, 2, 16, 8
    n_out = n_classes if n_classes > 2 else 1
    cfg = dict(Cin=n_channels, T=n_samples, K1=kernel_length, f1=f1, d=d,
               f2=f2, K3=16, n_out=n_out)

    key = jax.random.PRNGKey(0)
    kx, kp = jax.random.split(key)
    B = 2
    x = jax.random.normal(kx, (B, cfg["Cin"], cfg["T"]), dtype=jnp.float32)

    raw = init_raw_params(kp, cfg)
    folded = fold_params(raw, cfg)

    out = eegnet1d_forward(x, folded, cfg)
    out = jax.block_until_ready(out)
    assert out.shape == (B, cfg["n_out"])

    ref = reference_forward(np.asarray(x), raw, cfg)
    np.testing.assert_allclose(np.asarray(out), ref, rtol=5e-2, atol=5e-2)
    print("KERNEL_OK")
</pallas_src>

<mosaic_0001>
module attributes {stable_mosaic.version = 11 : i64} {
  func.func @_eegnet_mlp_kernel(%arg0: i32, %arg1: memref<2x512xbf16, #tpu.memory_space<vmem>>, %arg2: memref<512x1024xbf16, #tpu.memory_space<vmem>>, %arg3: memref<1x1024xf32, #tpu.memory_space<vmem>>, %arg4: memref<1024x256xbf16, #tpu.memory_space<vmem>>, %arg5: memref<1x256xf32, #tpu.memory_space<vmem>>, %arg6: memref<256x4xbf16, #tpu.memory_space<vmem>>, %arg7: memref<1x4xf32, #tpu.memory_space<vmem>>, %arg8: memref<2x4xf32, #tpu.memory_space<vmem>>) attributes {dimension_semantics = [#tpu.dimension_semantics<parallel>], iteration_bounds = array<i64: 1>, scalar_prefetch = 0 : i64, scratch_operands = 0 : i64, tpu.core_type = #tpu.core_type<tc>, window_params = [{transform_indices = @transform_0, window_bounds = array<i64: 2, 512>}, {pipeline_mode = #tpu.pipeline_mode<synchronous>, transform_indices = @transform_1, window_bounds = array<i64: 512, 1024>}, {pipeline_mode = #tpu.pipeline_mode<synchronous>, transform_indices = @transform_2, window_bounds = array<i64: 1, 1024>}, {pipeline_mode = #tpu.pipeline_mode<synchronous>, transform_indices = @transform_3, window_bounds = array<i64: 1024, 256>}, {pipeline_mode = #tpu.pipeline_mode<synchronous>, transform_indices = @transform_4, window_bounds = array<i64: 1, 256>}, {pipeline_mode = #tpu.pipeline_mode<synchronous>, transform_indices = @transform_5, window_bounds = array<i64: 256, 4>}, {pipeline_mode = #tpu.pipeline_mode<synchronous>, transform_indices = @transform_6, window_bounds = array<i64: 1, 4>}, {transform_indices = @transform_7, window_bounds = array<i64: 2, 4>}]} {
    %c0 = arith.constant 0 : index
    %c0_0 = arith.constant 0 : index
    %0 = vector.load %arg1[%c0, %c0_0] : memref<2x512xbf16, #tpu.memory_space<vmem>>, vector<2x512xbf16>
    %c0_1 = arith.constant 0 : index
    %c0_2 = arith.constant 0 : index
    %1 = vector.load %arg2[%c0_1, %c0_2] : memref<512x1024xbf16, #tpu.memory_space<vmem>>, vector<512x1024xbf16>
    %cst = arith.constant dense<0.000000e+00> : vector<2x1024xf32>
    %2 = tpu.matmul %0, %1, %cst {dimension_numbers = #tpu.dot_dimension_numbers<[1], [0], [0], [1], [0, 0, 1, 1], [], []>} : vector<2x512xbf16>, vector<512x1024xbf16>, vector<2x1024xf32> -> vector<2x1024xf32>
    %c0_3 = arith.constant 0 : index
    %c0_4 = arith.constant 0 : index
    %3 = vector.load %arg3[%c0_3, %c0_4] : memref<1x1024xf32, #tpu.memory_space<vmem>>, vector<1x1024xf32>
    %4 = vector.broadcast %3 : vector<1x1024xf32> to vector<2x1024xf32>
    %5 = arith.addf %2, %4 : vector<2x1024xf32>
    %cst_5 = arith.constant 0.000000e+00 : f32
    %6 = vector.broadcast %cst_5 : f32 to vector<2x1024xf32>
    %7 = arith.cmpf ogt, %5, %6 : vector<2x1024xf32>
    %cst_6 = arith.constant 0.000000e+00 : f32
    %8 = vector.broadcast %cst_6 : f32 to vector<2x1024xf32>
    %9 = arith.minimumf %5, %8 : vector<2x1024xf32>
    %10 = math.exp %9 : vector<2x1024xf32>
    %cst_7 = arith.constant 1.000000e+00 : f32
    %11 = vector.broadcast %cst_7 : f32 to vector<2x1024xf32>
    %12 = arith.subf %10, %11 : vector<2x1024xf32>
    %13 = arith.select %7, %5, %12 : vector<2x1024xi1>, vector<2x1024xf32>
    %14 = arith.truncf %13 : vector<2x1024xf32> to vector<2x1024xbf16>
    %c0_8 = arith.constant 0 : index
    %c0_9 = arith.constant 0 : index
    %15 = vector.load %arg4[%c0_8, %c0_9] : memref<1024x256xbf16, #tpu.memory_space<vmem>>, vector<1024x256xbf16>
    %cst_10 = arith.constant dense<0.000000e+00> : vector<2x256xf32>
    %16 = tpu.matmul %14, %15, %cst_10 {dimension_numbers = #tpu.dot_dimension_numbers<[1], [0], [0], [1], [0, 0, 1, 1], [], []>} : vector<2x1024xbf16>, vector<1024x256xbf16>, vector<2x256xf32> -> vector<2x256xf32>
    %c0_11 = arith.constant 0 : index
    %c0_12 = arith.constant 0 : index
    %17 = vector.load %arg5[%c0_11, %c0_12] : memref<1x256xf32, #tpu.memory_space<vmem>>, vector<1x256xf32>
    %18 = vector.broadcast %17 : vector<1x256xf32> to vector<2x256xf32>
    %19 = arith.addf %16, %18 : vector<2x256xf32>
    %cst_13 = arith.constant 0.000000e+00 : f32
    %20 = vector.broadcast %cst_13 : f32 to vector<2x256xf32>
    %21 = arith.cmpf ogt, %19, %20 : vector<2x256xf32>
    %cst_14 = arith.constant 0.000000e+00 : f32
    %22 = vector.broadcast %cst_14 : f32 to vector<2x256xf32>
    %23 = arith.minimumf %19, %22 : vector<2x256xf32>
    %24 = math.exp %23 : vector<2x256xf32>
    %cst_15 = arith.constant 1.000000e+00 : f32
    %25 = vector.broadcast %cst_15 : f32 to vector<2x256xf32>
    %26 = arith.subf %24, %25 : vector<2x256xf32>
    %27 = arith.select %21, %19, %26 : vector<2x256xi1>, vector<2x256xf32>
    %28 = arith.truncf %27 : vector<2x256xf32> to vector<2x256xbf16>
    %c0_16 = arith.constant 0 : index
    %c0_17 = arith.constant 0 : index
    %29 = vector.load %arg6[%c0_16, %c0_17] : memref<256x4xbf16, #tpu.memory_space<vmem>>, vector<256x4xbf16>
    %cst_18 = arith.constant dense<0.000000e+00> : vector<2x4xf32>
    %30 = tpu.matmul %28, %29, %cst_18 {dimension_numbers = #tpu.dot_dimension_numbers<[1], [0], [0], [1], [0, 0, 1, 1], [], []>} : vector<2x256xbf16>, vector<256x4xbf16>, vector<2x4xf32> -> vector<2x4xf32>
    %c0_19 = arith.constant 0 : index
    %c0_20 = arith.constant 0 : index
    %31 = vector.load %arg7[%c0_19, %c0_20] : memref<1x4xf32, #tpu.memory_space<vmem>>, vector<1x4xf32>
    %32 = vector.broadcast %31 : vector<1x4xf32> to vector<2x4xf32>
    %33 = arith.addf %30, %32 : vector<2x4xf32>
    %c0_21 = arith.constant 0 : index
    %c0_22 = arith.constant 0 : index
    %34 = vector.load %arg8[%c0_21, %c0_22] : memref<2x4xf32, #tpu.memory_space<vmem>>, vector<2x4xf32>
    tpu.vector_store %arg8[%c0_21, %c0_22], %33 {strides = array<i32>} : memref<2x4xf32, #tpu.memory_space<vmem>>, vector<2x4xf32>,
    return
  }
  func.func @transform_0(%arg0: i32) -> (i32, i32) {
    %c0_i32 = arith.constant 0 : i32
    %c0_i32_0 = arith.constant 0 : i32
    return %arg0, %c0_i32 : i32, i32
  }
  func.func @transform_1(%arg0: i32) -> (i32, i32) {
    %c0_i32 = arith.constant 0 : i32
    %c0_i32_0 = arith.constant 0 : i32
    %c0_i32_1 = arith.constant 0 : i32
    return %c0_i32, %c0_i32_0 : i32, i32
  }
  func.func @transform_2(%arg0: i32) -> (i32, i32) {
    %c0_i32 = arith.constant 0 : i32
    %c0_i32_0 = arith.constant 0 : i32
    %c0_i32_1 = arith.constant 0 : i32
    return %c0_i32, %c0_i32_0 : i32, i32
  }
  func.func @transform_3(%arg0: i32) -> (i32, i32) {
    %c0_i32 = arith.constant 0 : i32
    %c0_i32_0 = arith.constant 0 : i32
    %c0_i32_1 = arith.constant 0 : i32
    return %c0_i32, %c0_i32_0 : i32, i32
  }
  func.func @transform_4(%arg0: i32) -> (i32, i32) {
    %c0_i32 = arith.constant 0 : i32
    %c0_i32_0 = arith.constant 0 : i32
    %c0_i32_1 = arith.constant 0 : i32
    return %c0_i32, %c0_i32_0 : i32, i32
  }
  func.func @transform_5(%arg0: i32) -> (i32, i32) {
    %c0_i32 = arith.constant 0 : i32
    %c0_i32_0 = arith.constant 0 : i32
    %c0_i32_1 = arith.constant 0 : i32
    return %c0_i32, %c0_i32_0 : i32, i32
  }
  func.func @transform_6(%arg0: i32) -> (i32, i32) {
    %c0_i32 = arith.constant 0 : i32
    %c0_i32_0 = arith.constant 0 : i32
    %c0_i32_1 = arith.constant 0 : i32
    return %c0_i32, %c0_i32_0 : i32, i32
  }
  func.func @transform_7(%arg0: i32) -> (i32, i32) {
    %c0_i32 = arith.constant 0 : i32
    %c0_i32_0 = arith.constant 0 : i32
    return %arg0, %c0_i32 : i32, i32
  }
}

module attributes {stable_mosaic.version = 11 : i64} {
  func.func @_eegnet_mlp_kernel(%arg0: i32, %arg1: memref<2x512xbf16, #tpu.memory_space<vmem>>, %arg2: memref<512x1024xbf16, #tpu.memory_space<vmem>>, %arg3: memref<1x1024xf32, #tpu.memory_space<vmem>>, %arg4: memref<1024x256xbf16, #tpu.memory_space<vmem>>, %arg5: memref<1x256xf32, #tpu.memory_space<vmem>>, %arg6: memref<256x4xbf16, #tpu.memory_space<vmem>>, %arg7: memref<1x4xf32, #tpu.memory_space<vmem>>, %arg8: memref<2x4xf32, #tpu.memory_space<vmem>>) attributes {dimension_semantics = [#tpu.dimension_semantics<parallel>], iteration_bounds = array<i64: 1>, scalar_prefetch = 0 : i64, scratch_operands = 0 : i64, tpu.core_type = #tpu.core_type<tc>, window_params = [{transform_indices = @transform_0, window_bounds = array<i64: 2, 512>}, {pipeline_mode = #tpu.pipeline_mode<synchronous>, transform_indices = @transform_1, window_bounds = array<i64: 512, 1024>}, {pipeline_mode = #tpu.pipeline_mode<synchronous>, transform_indices = @transform_2, window_bounds = array<i64: 1, 1024>}, {pipeline_mode = #tpu.pipeline_mode<synchronous>, transform_indices = @transform_3, window_bounds = array<i64: 1024, 256>}, {pipeline_mode = #tpu.pipeline_mode<synchronous>, transform_indices = @transform_4, window_bounds = array<i64: 1, 256>}, {pipeline_mode = #tpu.pipeline_mode<synchronous>, transform_indices = @transform_5, window_bounds = array<i64: 256, 4>}, {pipeline_mode = #tpu.pipeline_mode<synchronous>, transform_indices = @transform_6, window_bounds = array<i64: 1, 4>}, {transform_indices = @transform_7, window_bounds = array<i64: 2, 4>}]} {
    %c0 = arith.constant 0 : index
    %c0_0 = arith.constant 0 : index
    %0 = vector.load %arg1[%c0, %c0_0] : memref<2x512xbf16, #tpu.memory_space<vmem>>, vector<2x512xbf16>
    %c0_1 = arith.constant 0 : index
    %c0_2 = arith.constant 0 : index
    %1 = vector.load %arg2[%c0_1, %c0_2] : memref<512x1024xbf16, #tpu.memory_space<vmem>>, vector<512x1024xbf16>
    %cst = arith.constant dense<0.000000e+00> : vector<2x1024xf32>
    %2 = tpu.matmul %0, %1, %cst {dimension_numbers = #tpu.dot_dimension_numbers<[1], [0], [0], [1], [0, 0, 1, 1], [], []>} : vector<2x512xbf16>, vector<512x1024xbf16>, vector<2x1024xf32> -> vector<2x1024xf32>
    %c0_3 = arith.constant 0 : index
    %c0_4 = arith.constant 0 : index
    %3 = vector.load %arg3[%c0_3, %c0_4] : memref<1x1024xf32, #tpu.memory_space<vmem>>, vector<1x1024xf32>
    %4 = vector.broadcast %3 : vector<1x1024xf32> to vector<2x1024xf32>
    %5 = arith.addf %2, %4 : vector<2x1024xf32>
    %cst_5 = arith.constant 0.000000e+00 : f32
    %6 = vector.broadcast %cst_5 : f32 to vector<2x1024xf32>
    %7 = arith.cmpf ogt, %5, %6 : vector<2x1024xf32>
    %cst_6 = arith.constant 0.000000e+00 : f32
    %8 = vector.broadcast %cst_6 : f32 to vector<2x1024xf32>
    %9 = arith.minimumf %5, %8 : vector<2x1024xf32>
    %10 = math.exp %9 : vector<2x1024xf32>
    %cst_7 = arith.constant 1.000000e+00 : f32
    %11 = vector.broadcast %cst_7 : f32 to vector<2x1024xf32>
    %12 = arith.subf %10, %11 : vector<2x1024xf32>
    %13 = arith.select %7, %5, %12 : vector<2x1024xi1>, vector<2x1024xf32>
    %14 = arith.truncf %13 : vector<2x1024xf32> to vector<2x1024xbf16>
    %c0_8 = arith.constant 0 : index
    %c0_9 = arith.constant 0 : index
    %15 = vector.load %arg4[%c0_8, %c0_9] : memref<1024x256xbf16, #tpu.memory_space<vmem>>, vector<1024x256xbf16>
    %cst_10 = arith.constant dense<0.000000e+00> : vector<2x256xf32>
    %16 = tpu.matmul %14, %15, %cst_10 {dimension_numbers = #tpu.dot_dimension_numbers<[1], [0], [0], [1], [0, 0, 1, 1], [], []>} : vector<2x1024xbf16>, vector<1024x256xbf16>, vector<2x256xf32> -> vector<2x256xf32>
    %c0_11 = arith.constant 0 : index
    %c0_12 = arith.constant 0 : index
    %17 = vector.load %arg5[%c0_11, %c0_12] : memref<1x256xf32, #tpu.memory_space<vmem>>, vector<1x256xf32>
    %18 = vector.broadcast %17 : vector<1x256xf32> to vector<2x256xf32>
    %19 = arith.addf %16, %18 : vector<2x256xf32>
    %cst_13 = arith.constant 0.000000e+00 : f32
    %20 = vector.broadcast %cst_13 : f32 to vector<2x256xf32>
    %21 = arith.cmpf ogt, %19, %20 : vector<2x256xf32>
    %cst_14 = arith.constant 0.000000e+00 : f32
    %22 = vector.broadcast %cst_14 : f32 to vector<2x256xf32>
    %23 = arith.minimumf %19, %22 : vector<2x256xf32>
    %24 = math.exp %23 : vector<2x256xf32>
    %cst_15 = arith.constant 1.000000e+00 : f32
    %25 = vector.broadcast %cst_15 : f32 to vector<2x256xf32>
    %26 = arith.subf %24, %25 : vector<2x256xf32>
    %27 = arith.select %21, %19, %26 : vector<2x256xi1>, vector<2x256xf32>
    %28 = arith.truncf %27 : vector<2x256xf32> to vector<2x256xbf16>
    %c0_16 = arith.constant 0 : index
    %c0_17 = arith.constant 0 : index
    %29 = vector.load %arg6[%c0_16, %c0_17] : memref<256x4xbf16, #tpu.memory_space<vmem>>, vector<256x4xbf16>
    %cst_18 = arith.constant dense<0.000000e+00> : vector<2x4xf32>
    %30 = tpu.matmul %28, %29, %cst_18 {dimension_numbers = #tpu.dot_dimension_numbers<[1], [0], [0], [1], [0, 0, 1, 1], [], []>} : vector<2x256xbf16>, vector<256x4xbf16>, vector<2x4xf32> -> vector<2x4xf32>
    %c0_19 = arith.constant 0 : index
    %c0_20 = arith.constant 0 : index
    %31 = vector.load %arg7[%c0_19, %c0_20] : memref<1x4xf32, #tpu.memory_space<vmem>>, vector<1x4xf32>
    %32 = vector.broadcast %31 : vector<1x4xf32> to vector<2x4xf32>
    %33 = arith.addf %30, %32 : vector<2x4xf32>
    %c0_21 = arith.constant 0 : index
    %c0_22 = arith.constant 0 : index
    %34 = vector.load %arg8[%c0_21, %c0_22] : memref<2x4xf32, #tpu.memory_space<vmem>>, vector<2x4xf32>
    tpu.vector_store %arg8[%c0_21, %c0_22], %33 {strides = array<i32>} : memref<2x4xf32, #tpu.memory_space<vmem>>, vector<2x4xf32>,
    return
  }
  func.func @transform_0(%arg0: i32) -> (i32, i32) {
    %c0_i32 = arith.constant 0 : i32
    %c0_i32_0 = arith.constant 0 : i32
    return %arg0, %c0_i32 : i32, i32
  }
  func.func @transform_1(%arg0: i32) -> (i32, i32) {
    %c0_i32 = arith.constant 0 : i32
    %c0_i32_0 = arith.constant 0 : i32
    %c0_i32_1 = arith.constant 0 : i32
    return %c0_i32, %c0_i32_0 : i32, i32
  }
  func.func @transform_2(%arg0: i32) -> (i32, i32) {
    %c0_i32 = arith.constant 0 : i32
    %c0_i32_0 = arith.constant 0 : i32
    %c0_i32_1 = arith.constant 0 : i32
    return %c0_i32, %c0_i32_0 : i32, i32
  }
  func.func @transform_3(%arg0: i32) -> (i32, i32) {
    %c0_i32 = arith.constant 0 : i32
    %c0_i32_0 = arith.constant 0 : i32
    %c0_i32_1 = arith.constant 0 : i32
    return %c0_i32, %c0_i32_0 : i32, i32
  }
  func.func @transform_4(%arg0: i32) -> (i32, i32) {
    %c0_i32 = arith.constant 0 : i32
    %c0_i32_0 = arith.constant 0 : i32
    %c0_i32_1 = arith.constant 0 : i32
    return %c0_i32, %c0_i32_0 : i32, i32
  }
  func.func @transform_5(%arg0: i32) -> (i32, i32) {
    %c0_i32 = arith.constant 0 : i32
    %c0_i32_0 = arith.constant 0 : i32
    %c0_i32_1 = arith.constant 0 : i32
    return %c0_i32, %c0_i32_0 : i32, i32
  }
  func.func @transform_6(%arg0: i32) -> (i32, i32) {
    %c0_i32 = arith.constant 0 : i32
    %c0_i32_0 = arith.constant 0 : i32
    %c0_i32_1 = arith.constant 0 : i32
    return %c0_i32, %c0_i32_0 : i32, i32
  }
  func.func @transform_7(%arg0: i32) -> (i32, i32) {
    %c0_i32 = arith.constant 0 : i32
    %c0_i32_0 = arith.constant 0 : i32
    return %arg0, %c0_i32 : i32, i32
  }
}

</mosaic_0001>

<bundles_post_ra>
// kernel: tpu_custom_call.1
= control target key start
LH: loop header
LB: loop body
LE: loop exit
PB: predicated region body
PF: predicated region fallthrough
CT: control target
= control target key end

     0   :  { %12 = vsyncpa [#allocation3], 0  ;;  %s4195_s0 = inlined_call_operand.vmem [shape: bf16[2,512], index: 0, kind: input, shape index: {}]   ;;  %s4196_s1 = inlined_call_operand.hbm [shape: bf16[512,1024], index: 1, kind: input, shape index: {}]   ;;  %s4197_s2 = inlined_call_operand.vmem [shape: f32[1,1024], index: 2, kind: input, shape index: {}]   ;;  %s4198_s3 = inlined_call_operand.hbm [shape: bf16[1024,256], index: 3, kind: input, shape index: {}]   ;;  %s4199_s4 = inlined_call_operand.vmem [shape: f32[1,256], index: 4, kind: input, shape index: {}]   ;;  %s4200_s5 = inlined_call_operand.vmem [shape: bf16[256,4], index: 5, kind: input, shape index: {}]   ;;  %s4201_s6 = inlined_call_operand.vmem [shape: f32[1,4], index: 6, kind: input, shape index: {}]   ;;  %s4202_s7 = inlined_call_operand.hbm [shape: f32[2,4], index: 7, kind: output, shape index: {}]  }
   0x1   :  { %13 = vsyncpa [#allocation6], 0 }
   0x2   :  { %14 = vsyncpa [#allocation4], 0  ;;  %s3979_s24 = smov [#allocation2]   ;;  %s3907_s28 = scalar_lea.hbm %s4196_s1, 32768 }
   0x3   :  { %s22_s25 = sshll.u32 %s3979_s24, 4  ;;  %p3908_p0 = scmp.ne.s32.totalorder %s4196_s1, %s3907_s28  ;;  %s23_s25 = int_to_ptr.vmem [resolvable:$true] %s22_s25 }
   0x4   :  { %p3911_p1 = scmp.lt.u32.totalorder %s3907_s28, %s4196_s1 }
   0x6   :  { %p3913_p2 = pnand %p3911_p1, %p3908_p0 }
   0x8   :  { %3916 = shalt.err (!%p3913_p2)
}
   0x9   :  { %s3917_s10 = scalar_lea.vmem %s23_s25, 32768  ;;  %p3922_p4 = scmp.lt.s32.totalorder %s23_s25, %s23_s25 }
   0xa   :  { %p3918_p3 = scmp.ne.s32.totalorder %s23_s25, %s3917_s10  ;;  %p3923_p5 = scmp.lt.s32.totalorder %s3917_s10, %s3917_s10 }
   0xc   :  { %p3924_p6 = por %p3923_p5, %p3922_p4 }
   0xe   :  { %p3925_p7 = pnand %p3924_p6, %p3918_p3 }
  0x10   :  { %3928 = shalt.err (!%p3925_p7)
}
  0x11   :  { %s3980_s11 = smov 512   ;;  %s3981_s12 = smov 32  }
  0x12   :  { %28 = dma.hbm_to_vmem [thread:$0]  %s4196_s1, 32768, %s23_s25, [#allocation3], %s3980_s11, %s3980_s11, %s3981_s12  }
  0x13   :  { %s3982_s15 = smov [#allocation5]   ;;  %s3929_s19 = scalar_lea.hbm %s4198_s3, 16384 }
  0x14   :  { %s36_s16 = sshll.u32 %s3982_s15, 4  ;;  %p3930_p8 = scmp.ne.s32.totalorder %s4198_s3, %s3929_s19  ;;  %s37_s16 = int_to_ptr.vmem [resolvable:$true] %s36_s16 }
  0x15   :  { %p3933_p9 = scmp.lt.u32.totalorder %s3929_s19, %s4198_s3 }
  0x17   :  { %p3935_p10 = pnand %p3933_p9, %p3930_p8 }
  0x19   :  { %3938 = shalt.err (!%p3935_p10)
}
  0x1a   :  { %s3939_s24 = scalar_lea.vmem %s37_s16, 16384  ;;  %p3944_p12 = scmp.lt.s32.totalorder %s37_s16, %s37_s16 }
  0x1b   :  { %p3940_p11 = scmp.ne.s32.totalorder %s37_s16, %s3939_s24  ;;  %p3945_p13 = scmp.lt.s32.totalorder %s3939_s24, %s3939_s24 }
  0x1d   :  { %p3946_p0 = por %p3945_p13, %p3944_p12 }
  0x1f   :  { %p3947_p1 = pnand %p3946_p0, %p3940_p11 }
  0x21   :  { %3950 = shalt.err (!%p3947_p1)
}
  0x22   :  { %s3983_s1 = smov 128   ;;  %s3984_s25 = smov 8  }
  0x23   :  { %42 = dma.hbm_to_vmem [thread:$0]  %s4198_s3, 16384, %s37_s16, [#allocation6], %s3983_s1, %s3983_s1, %s3984_s25  }
  0x24   :  { %3973 = dma.done.wait [#allocation3], 32768  }
  0x25   :  { %3974 = vsyncadd [#allocation3], 4294934528 }
  0x26   :  { %3975 = dma.done.wait [#allocation6], 16384  }
  0x27   :  { %3976 = vsyncadd [#allocation6], 4294950912  ;;  %v57_v0 = vld [vmem:[#allocation2] sm:$0xff]  ;;  %v315_v6 = vlaneseq  ;;  %v3985_v7 = vmov 1966171168   ;;  %v59_v34 = vld [vmem:[#allocation2 + $0x10] sm:$0xff] }
  0x28   :  { %v61_v1 = vld [vmem:[#allocation2 + $0x20] sm:$0xff]  ;;  %v365_v8 = vunpack.c.l.s4 %v3985_v7  ;;  %v63_v36 = vld [vmem:[#allocation2 + $0x30] sm:$0xff]  ;;  %s3986_s13 = smov [#allocation7]   ;;  %vm3181_vm10 = vcmask 25600  }
  0x29   :  { %v65_v2 = vld [vmem:[#allocation2 + $0x40] sm:$0xff]  ;;  %v3201_v3 = vcombine.high %v57_v0, %v61_v1  ;;  %v3200_v4 = vcombine.low %v57_v0, %v61_v1  ;;  %v4051_v14 = vshrl.u32 %v315_v6, 7  ;;  %v3205_v39 = vcombine.high %v59_v34, %v63_v36  ;;  %v67_v41 = vld [vmem:[#allocation2 + $0x50] sm:$0xff]  ;;  %s3189_s14 = sshll.u32 %s3986_s13, 4  ;;  %s3190_s14 = int_to_ptr.vmem [resolvable:$true] %s3189_s14 }
  0x2a   :  { %v69_v5 = vld [vmem:[#allocation2 + $0x60] sm:$0xff]  ;;  %v366_v15 = vunpack.c.0.s8 %v365_v8  ;;  %v3204_v40 = vcombine.low %v59_v34, %v63_v36  ;;  %v71_v42 = vld [vmem:[#allocation2 + $0x70] sm:$0xff]  ;;  %s3951_s15 = scalar_lea.vmem %s3190_s14, 32  ;;  %p3956_p3 = scmp.lt.s32.totalorder %s3190_s14, %s3190_s14 }
  0x2b   :  { %v3209_v9 = vcombine.high %v65_v2, %v69_v5  ;;  %v73_v10 = vld [vmem:[#allocation2 + $0x80] sm:$0xff]  ;;  %1664 = vmatprep.subr.bf16.mxu1 %v3201_v3  ;;  %v3208_v12 = vcombine.low %v65_v2, %v69_v5  ;;  %v3213_v44 = vcombine.high %v67_v41, %v71_v42  ;;  %v75_v45 = vld [vmem:[#allocation2 + $0x90] sm:$0xff]  ;;  %1828 = vmatprep.subr.bf16.mxu0 %v3205_v39  ;;  %p3952_p2 = scmp.ne.s32.totalorder %s3190_s14, %s3951_s15  ;;  %p3957_p4 = scmp.lt.s32.totalorder %s3951_s15, %s3951_s15 }
  0x2c   :  { %v77_v11 = vld [vmem:[#allocation2 + $0xa0] sm:$0xff]  ;;  %1665 = vmatpush1.bf16.msra.mxu1 %v3200_v4  ;;  %v4054_v20 = vsub.s32 %v366_v15, %v4051_v14  ;;  %v79_v46 = vld [vmem:[#allocation2 + $0xb0] sm:$0xff]  ;;  %1829 = vmatpush1.bf16.msra.mxu0 %v3204_v40  ;;  %v3212_v48 = vcombine.low %v67_v41, %v71_v42 }
  0x2d   :  { %1666 = vmatprep.subr.bf16.mxu1 %v3209_v9  ;;  %v3217_v13 = vcombine.high %v73_v10, %v77_v11  ;;  %v81_v16 = vld [vmem:[#allocation2 + $0xc0] sm:$0xff]  ;;  %v3216_v18 = vcombine.low %v73_v10, %v77_v11  ;;  %1830 = vmatprep.subr.bf16.mxu0 %v3213_v44  ;;  %v3221_v51 = vcombine.high %v75_v45, %v79_v46  ;;  %v83_v53 = vld [vmem:[#allocation2 + $0xd0] sm:$0xff]  ;;  %p3958_p5 = por %p3957_p4, %p3956_p3 }
  0x2e   :  { %v85_v17 = vld [vmem:[#allocation2 + $0xe0] sm:$0xff]  ;;  %v87_v54 = vld [vmem:[#allocation2 + $0xf0] sm:$0xff]  ;;  %v3220_v56 = vcombine.low %v75_v45, %v79_v46 }
  0x2f   :  { %v3225_v19 = vcombine.high %v81_v16, %v85_v17  ;;  %v89_v21 = vld [vmem:[#allocation2 + $0x100] sm:$0xff]  ;;  %v3224_v25 = vcombine.low %v81_v16, %v85_v17  ;;  %v3229_v59 = vcombine.high %v83_v53, %v87_v54  ;;  %v91_v61 = vld [vmem:[#allocation2 + $0x110] sm:$0xff]  ;;  %v3228_v0 = vcombine.low %v83_v53, %v87_v54  ;;  %p3959_p6 = pnand %p3958_p5, %p3952_p2 }
  0x30   :  { %1667 = vmatpush1.bf16.msra.mxu1 %v3208_v12  ;;  %v93_v22 = vld [vmem:[#allocation2 + $0x120] sm:$0xff]  ;;  %1831 = vmatpush1.bf16.msra.mxu0 %v3212_v48  ;;  %v95_v62 = vld [vmem:[#allocation2 + $0x130] sm:$0xff] }
  0x31   :  { %1668 = vmatprep.subr.bf16.mxu1 %v3217_v13  ;;  %v4059_v23 = vld.sshfl [vmem:[%s4195_s0] sm:$0x33 pattern:$0x75316420]  ;;  %v3233_v26 = vcombine.high %v89_v21, %v93_v22  ;;  %v3232_v30 = vcombine.low %v89_v21, %v93_v22  ;;  %1832 = vmatprep.subr.bf16.mxu0 %v3221_v51  ;;  %v3237_v3 = vcombine.high %v91_v61, %v95_v62  ;;  %v99_v5 = vld [vmem:[#allocation2 + $0x150] sm:$0xff] }
  0x32   :  { %v363_v24 = vcombine.high %v4059_v23, %v4059_v23  ;;  %v97_v28 = vld [vmem:[#allocation2 + $0x140] sm:$0xff]  ;;  %v103_v6 = vld [vmem:[#allocation2 + $0x170] sm:$0xff]  ;;  %v3236_v10 = vcombine.low %v91_v61, %v95_v62 }
  0x33   :  { %v101_v29 = vld [vmem:[#allocation2 + $0x160] sm:$0xff]  ;;  %v3245_v12 = vcombine.high %v99_v5, %v103_v6  ;;  %v107_v13 = vld [vmem:[#allocation2 + $0x190] sm:$0xff] }
  0x34   :  { %1669 = vmatpush1.bf16.msra.mxu1 %v3216_v18  ;;  %v4064_v27 = vrot.slane %v363_v24, %v4054_v20  ;;  %v3241_v31 = vcombine.high %v97_v28, %v101_v29  ;;  %v105_v32 = vld [vmem:[#allocation2 + $0x180] sm:$0xff]  ;;  %v3240_v35 = vcombine.low %v97_v28, %v101_v29  ;;  %1833 = vmatpush1.bf16.msra.mxu0 %v3220_v56  ;;  %v111_v15 = vld [vmem:[#allocation2 + $0x1b0] sm:$0xff] }
  0x35   :  { %1670 = vmatprep.subr.bf16.mxu1 %v3225_v19  ;;  %v109_v33 = vld [vmem:[#allocation2 + $0x1a0] sm:$0xff]  ;;  %1834 = vmatprep.subr.bf16.mxu0 %v3229_v59  ;;  %v3244_v19 = vcombine.low %v99_v5, %v103_v6  ;;  %v115_v21 = vld [vmem:[#allocation2 + $0x1d0] sm:$0xff]  ;;  %v3253_v24 = vcombine.high %v107_v13, %v111_v15 }
  0x36   :  { %1696 = vmatprep.mubr.bf16.mxu1 %v4064_v27  ;;  %1860 = vmatprep.mubr.bf16.mxu0 %v4064_v27  ;;  %v3249_v37 = vcombine.high %v105_v32, %v109_v33  ;;  %v113_v38 = vld [vmem:[#allocation2 + $0x1c0] sm:$0xff]  ;;  %v3248_v47 = vcombine.low %v105_v32, %v109_v33  ;;  %v127_v34 = vld [vmem:[#allocation2 + $0x230] sm:$0xff] }
  0x37   :  { %v117_v43 = vld [vmem:[#allocation2 + $0x1e0] sm:$0xff]  ;;  %v131_v39 = vld [vmem:[#allocation2 + $0x250] sm:$0xff] }
  0x38   :  { %1671 = vmatpush1.bf16.msra.mxu1 %v3224_v25  ;;  %v3257_v49 = vcombine.high %v113_v38, %v117_v43  ;;  %v121_v50 = vld [vmem:[#allocation2 + $0x200] sm:$0xff]  ;;  %v3256_v55 = vcombine.low %v113_v38, %v117_v43  ;;  %1835 = vmatpush1.bf16.msra.mxu0 %v3228_v0  ;;  %v119_v25 = vld [vmem:[#allocation2 + $0x1f0] sm:$0xff] }
  0x39   :  { %1672 = vmatprep.subr.bf16.mxu1 %v3233_v26  ;;  %v125_v52 = vld [vmem:[#allocation2 + $0x220] sm:$0xff]  ;;  %1836 = vmatprep.subr.bf16.mxu0 %v3237_v3  ;;  %v3261_v33 = vcombine.high %v115_v21, %v119_v25  ;;  %v3260_v38 = vcombine.low %v115_v21, %v119_v25  ;;  %v135_v42 = vld [vmem:[#allocation2 + $0x270] sm:$0xff]  ;;  %v4070_v3 = vrot.slane %v4059_v23, %v4054_v20 }
  0x3a   :  { %v3265_v57 = vcombine.high %v121_v50, %v125_v52  ;;  %v129_v58 = vld [vmem:[#allocation2 + $0x240] sm:$0xff]  ;;  %v3264_v63 = vcombine.low %v121_v50, %v125_v52  ;;  %v143_v50 = vld [vmem:[#allocation2 + $0x2b0] sm:$0xff]  ;;  %v3276_v54 = vcombine.low %v131_v39, %v135_v42 }
  0x3b   :  { %v133_v60 = vld [vmem:[#allocation2 + $0x260] sm:$0xff] }
  0x3c   :  { %1673 = vmatpush1.bf16.msra.mxu1 %v3232_v30  ;;  %v3273_v1 = vcombine.high %v129_v58, %v133_v60  ;;  %v137_v2 = vld [vmem:[#allocation2 + $0x280] sm:$0xff]  ;;  %v3272_v7 = vcombine.low %v129_v58, %v133_v60  ;;  %1837 = vmatpush1.bf16.msra.mxu0 %v3236_v10  ;;  %v3252_v30 = vcombine.low %v107_v13, %v111_v15  ;;  %v151_v58 = vld [vmem:[#allocation2 + $0x2f0] sm:$0xff] }
  0x3d   :  { %1674 = vmatprep.subr.bf16.mxu1 %v3241_v31  ;;  %v141_v4 = vld [vmem:[#allocation2 + $0x2a0] sm:$0xff]  ;;  %1838 = vmatprep.subr.bf16.mxu0 %v3245_v12  ;;  %v123_v31 = vld [vmem:[#allocation2 + $0x210] sm:$0xff] }
  0x3e   :  { %v145_v8 = vld [vmem:[#allocation2 + $0x2c0] sm:$0xff]  ;;  %v3281_v11 = vcombine.high %v137_v2, %v141_v4  ;;  %v3280_v16 = vcombine.low %v137_v2, %v141_v4  ;;  %v3269_v41 = vcombine.high %v123_v31, %v127_v34  ;;  %v3268_v46 = vcombine.low %v123_v31, %v127_v34  ;;  %v159_v2 = vld [vmem:[#allocation2 + $0x330] sm:$0xff] }
  0x3f   :  { %v149_v9 = vld [vmem:[#allocation2 + $0x2e0] sm:$0xff]  ;;  %v163_v10 = vld [vmem:[#allocation2 + $0x350] sm:$0xff] }
  0x40   :  { %1675 = vmatpush1.bf16.msra.mxu1 %v3240_v35  ;;  %v153_v17 = vld [vmem:[#allocation2 + $0x300] sm:$0xff]  ;;  %v3289_v22 = vcombine.high %v145_v8, %v149_v9  ;;  %v3288_v26 = vcombine.low %v145_v8, %v149_v9  ;;  %1839 = vmatpush1.bf16.msra.mxu0 %v3244_v19 }
  0x41   :  { %1676 = vmatprep.subr.bf16.mxu1 %v3249_v37  ;;  %v157_v18 = vld [vmem:[#allocation2 + $0x320] sm:$0xff]  ;;  %1840 = vmatprep.subr.bf16.mxu0 %v3253_v24 }
  0x42   :  { %v161_v28 = vld [vmem:[#allocation2 + $0x340] sm:$0xff]  ;;  %v3297_v32 = vcombine.high %v153_v17, %v157_v18  ;;  %v3296_v35 = vcombine.low %v153_v17, %v157_v18  ;;  %v171_v17 = vld [vmem:[#allocation2 + $0x390] sm:$0xff] }
  0x43   :  { %v165_v29 = vld [vmem:[#allocation2 + $0x360] sm:$0xff]  ;;  %v175_v18 = vld [vmem:[#allocation2 + $0x3b0] sm:$0xff] }
  0x44   :  { %1677 = vmatpush1.bf16.msra.mxu1 %v3248_v47  ;;  %v169_v36 = vld [vmem:[#allocation2 + $0x380] sm:$0xff]  ;;  %1841 = vmatpush1.bf16.msra.mxu0 %v3252_v30  ;;  %v3305_v40 = vcombine.high %v161_v28, %v165_v29  ;;  %v3304_v43 = vcombine.low %v161_v28, %v165_v29  ;;  %v139_v47 = vld [vmem:[#allocation2 + $0x290] sm:$0xff]  ;;  %v3317_v30 = vcombine.high %v171_v17, %v175_v18 }
  0x45   :  { %1678 = vmatprep.subr.bf16.mxu1 %v3257_v49  ;;  %v173_v37 = vld [vmem:[#allocation2 + $0x3a0] sm:$0xff]  ;;  %1842 = vmatprep.subr.bf16.mxu0 %v3261_v33  ;;  %v3277_v49 = vcombine.high %v131_v39, %v135_v42  ;;  %v3284_v62 = vcombine.low %v139_v47, %v143_v50  ;;  %v179_v28 = vld [vmem:[#allocation2 + $0x3d0] sm:$0xff] }
  0x46   :  { %v177_v44 = vld [vmem:[#allocation2 + $0x3c0] sm:$0xff]  ;;  %v3313_v48 = vcombine.high %v169_v36, %v173_v37  ;;  %v3312_v51 = vcombine.low %v169_v36, %v173_v37  ;;  %v183_v29 = vld [vmem:[#allocation2 + $0x3f0] sm:$0xff] }
  0x47   :  { %v181_v45 = vld [vmem:[#allocation2 + $0x3e0] sm:$0xff]  ;;  %v187_v36 = vld [vmem:[#allocation2 + $0x410] sm:$0xff] }
  0x48   :  { %1679 = vmatpush1.bf16.msra.mxu1 %v3256_v55  ;;  %1843 = vmatpush1.bf16.msra.mxu0 %v3260_v38  ;;  %v185_v52 = vld [vmem:[#allocation2 + $0x400] sm:$0xff]  ;;  %v147_v55 = vld [vmem:[#allocation2 + $0x2d0] sm:$0xff]  ;;  %v3321_v56 = vcombine.high %v177_v44, %v181_v45  ;;  %v3320_v59 = vcombine.low %v177_v44, %v181_v45  ;;  %v3325_v38 = vcombine.high %v179_v28, %v183_v29 }
  0x49   :  { %1680 = vmatprep.subr.bf16.mxu1 %v3265_v57  ;;  %1844 = vmatprep.subr.bf16.mxu0 %v3269_v41  ;;  %v189_v53 = vld [vmem:[#allocation2 + $0x420] sm:$0xff]  ;;  %v3285_v57 = vcombine.high %v139_v47, %v143_v50  ;;  %v3293_v0 = vcombine.high %v147_v55, %v151_v58  ;;  %v3292_v9 = vcombine.low %v147_v55, %v151_v58  ;;  %v191_v37 = vld [vmem:[#allocation2 + $0x430] sm:$0xff] }
  0x4a   :  { %v193_v60 = vld [vmem:[#allocation2 + $0x440] sm:$0xff]  ;;  %v3328_v4 = vcombine.low %v185_v52, %v189_v53  ;;  %v195_v44 = vld [vmem:[#allocation2 + $0x450] sm:$0xff] }
  0x4b   :  { %v197_v61 = vld [vmem:[#allocation2 + $0x460] sm:$0xff]  ;;  %v199_v45 = vld [vmem:[#allocation2 + $0x470] sm:$0xff] }
  0x4c   :  { %1681 = vmatpush1.bf16.msra.mxu1 %v3264_v63  ;;  %1845 = vmatpush1.bf16.msra.mxu0 %v3268_v46  ;;  %v3329_v63 = vcombine.high %v185_v52, %v189_v53  ;;  %v201_v5 = vld [vmem:[#allocation2 + $0x480] sm:$0xff]  ;;  %v3337_v8 = vcombine.high %v193_v60, %v197_v61  ;;  %v3336_v20 = vcombine.low %v193_v60, %v197_v61  ;;  %v203_v52 = vld [vmem:[#allocation2 + $0x490] sm:$0xff] }
  0x4d   :  { %1682 = vmatprep.subr.bf16.mxu1 %v3273_v1  ;;  %1846 = vmatprep.subr.bf16.mxu0 %v3277_v49  ;;  %v155_v1 = vld [vmem:[#allocation2 + $0x310] sm:$0xff]  ;;  %v205_v6 = vld [vmem:[#allocation2 + $0x4a0] sm:$0xff]  ;;  %v3333_v46 = vcombine.high %v187_v36, %v191_v37 }
  0x4e   :  { %v3301_v12 = vcombine.high %v155_v1, %v159_v2  ;;  %v209_v23 = vld [vmem:[#allocation2 + $0x4c0] sm:$0xff]  ;;  %v3345_v15 = vcombine.high %v201_v5, %v205_v6  ;;  %v3344_v21 = vcombine.low %v201_v5, %v205_v6  ;;  %v207_v53 = vld [vmem:[#allocation2 + $0x4b0] sm:$0xff] }
  0x4f   :  { %v213_v13 = vld [vmem:[#allocation2 + $0x4e0] sm:$0xff]  ;;  %v211_v60 = vld [vmem:[#allocation2 + $0x4d0] sm:$0xff] }
  0x50   :  { %1683 = vmatpush1.bf16.msra.mxu1 %v3272_v7  ;;  %1847 = vmatpush1.bf16.msra.mxu0 %v3276_v54  ;;  %v4074_v7 = vcombine.high %v4064_v27, %v4064_v27  ;;  %v221_v24 = vld [vmem:[#allocation2 + $0x520] sm:$0xff]  ;;  %v3353_v25 = vcombine.high %v209_v23, %v213_v13  ;;  %v3352_v31 = vcombine.low %v209_v23, %v213_v13  ;;  %v215_v61 = vld [vmem:[#allocation2 + $0x4f0] sm:$0xff] }
  0x51   :  { %1684 = vmatprep.subr.bf16.mxu1 %v3281_v11  ;;  %1848 = vmatprep.subr.bf16.mxu0 %v3285_v57  ;;  %v167_v11 = vld [vmem:[#allocation2 + $0x370] sm:$0xff]  ;;  %v229_v33 = vld [vmem:[#allocation2 + $0x560] sm:$0xff]  ;;  %v3341_v54 = vcombine.high %v195_v44, %v199_v45 }
  0x52   :  { %v3309_v19 = vcombine.high %v163_v10, %v167_v11  ;;  %v237_v41 = vld [vmem:[#allocation2 + $0x5a0] sm:$0xff]  ;;  %v219_v5 = vld [vmem:[#allocation2 + $0x510] sm:$0xff] }
  0x53   :  { %v245_v49 = vld [vmem:[#allocation2 + $0x5e0] sm:$0xff]  ;;  %v223_v6 = vld [vmem:[#allocation2 + $0x530] sm:$0xff] }
  0x54   :  { %1685 = vmatpush1.bf16.msra.mxu1 %v3280_v16  ;;  %1849 = vmatpush1.bf16.msra.mxu0 %v3284_v62  ;;  %v3300_v16 = vcombine.low %v155_v1, %v159_v2  ;;  %v253_v57 = vld [vmem:[#allocation2 + $0x620] sm:$0xff]  ;;  %v3349_v62 = vcombine.high %v203_v52, %v207_v53  ;;  %v227_v23 = vld [vmem:[#allocation2 + $0x550] sm:$0xff] }
  0x55   :  { %1686 = vmatprep.subr.bf16.mxu1 %v3289_v22  ;;  %1850 = vmatprep.subr.bf16.mxu0 %v3293_v0  ;;  %v217_v22 = vld [vmem:[#allocation2 + $0x500] sm:$0xff]  ;;  %v231_v13 = vld [vmem:[#allocation2 + $0x570] sm:$0xff] }
  0x56   :  { %v3361_v34 = vcombine.high %v217_v22, %v221_v24  ;;  %v3360_v39 = vcombine.low %v217_v22, %v221_v24  ;;  %v257_v0 = vld [vmem:[#allocation2 + $0x640] sm:$0xff]  ;;  %v235_v22 = vld [vmem:[#allocation2 + $0x590] sm:$0xff] }
  0x57   :  { %v261_v1 = vld [vmem:[#allocation2 + $0x660] sm:$0xff]  ;;  %v239_v24 = vld [vmem:[#allocation2 + $0x5b0] sm:$0xff] }
  0x58   :  { %1687 = vmatpush1.bf16.msra.mxu1 %v3288_v26  ;;  %1851 = vmatpush1.bf16.msra.mxu0 %v3292_v9  ;;  %v3308_v26 = vcombine.low %v163_v10, %v167_v11  ;;  %v265_v10 = vld [vmem:[#allocation2 + $0x680] sm:$0xff] }
  0x59   :  { %1688 = vmatprep.subr.bf16.mxu1 %v3297_v32  ;;  %1852 = vmatprep.subr.bf16.mxu0 %v3301_v12  ;;  %v225_v32 = vld [vmem:[#allocation2 + $0x540] sm:$0xff]  ;;  %v3401_v12 = vcombine.high %v257_v0, %v261_v1 }
  0x5a   :  { %v3369_v42 = vcombine.high %v225_v32, %v229_v33  ;;  %v3368_v47 = vcombine.low %v225_v32, %v229_v33  ;;  %v269_v11 = vld [vmem:[#allocation2 + $0x6a0] sm:$0xff]  ;;  %v243_v32 = vld [vmem:[#allocation2 + $0x5d0] sm:$0xff] }
  0x5b   :  { %v247_v33 = vld [vmem:[#allocation2 + $0x5f0] sm:$0xff] }
  0x5c   :  { %1689 = vmatpush1.bf16.msra.mxu1 %v3296_v35  ;;  %1853 = vmatpush1.bf16.msra.mxu0 %v3300_v16  ;;  %v3316_v35 = vcombine.low %v171_v17, %v175_v18  ;;  %v3400_v16 = vcombine.low %v257_v0, %v261_v1  ;;  %v273_v17 = vld [vmem:[#allocation2 + $0x6c0] sm:$0xff]  ;;  %v275_v1 = vld [vmem:[#allocation2 + $0x6d0] sm:$0xff] }
  0x5d   :  { %1690 = vmatprep.subr.bf16.mxu1 %v3305_v40  ;;  %1854 = vmatprep.subr.bf16.mxu0 %v3309_v19  ;;  %v233_v40 = vld [vmem:[#allocation2 + $0x580] sm:$0xff]  ;;  %v3409_v19 = vcombine.high %v265_v10, %v269_v11 }
  0x5e   :  { %v3377_v50 = vcombine.high %v233_v40, %v237_v41  ;;  %v3376_v55 = vcombine.low %v233_v40, %v237_v41  ;;  %v277_v18 = vld [vmem:[#allocation2 + $0x6e0] sm:$0xff]  ;;  %v251_v40 = vld [vmem:[#allocation2 + $0x610] sm:$0xff] }
  0x5f   :  { %v255_v41 = vld [vmem:[#allocation2 + $0x630] sm:$0xff] }
  0x60   :  { %1691 = vmatpush1.bf16.msra.mxu1 %v3304_v43  ;;  %1855 = vmatpush1.bf16.msra.mxu0 %v3308_v26  ;;  %v3324_v43 = vcombine.low %v179_v28, %v183_v29  ;;  %v3408_v26 = vcombine.low %v265_v10, %v269_v11  ;;  %v281_v28 = vld [vmem:[#allocation2 + $0x700] sm:$0xff]  ;;  %v4082_v11 = vcombine.high %v4070_v3, %v4070_v3 }
  0x61   :  { %1692 = vmatprep.subr.bf16.mxu1 %v3313_v48  ;;  %1856 = vmatprep.subr.bf16.mxu0 %v3317_v30  ;;  %v241_v48 = vld [vmem:[#allocation2 + $0x5c0] sm:$0xff]  ;;  %v3417_v30 = vcombine.high %v273_v17, %v277_v18 }
  0x62   :  { %v3385_v58 = vcombine.high %v241_v48, %v245_v49  ;;  %v285_v29 = vld [vmem:[#allocation2 + $0x720] sm:$0xff] }
  0x64   :  { %1693 = vmatpush1.bf16.msra.mxu1 %v3312_v51  ;;  %1857 = vmatpush1.bf16.msra.mxu0 %v3316_v35  ;;  %v3332_v51 = vcombine.low %v187_v36, %v191_v37  ;;  %v3416_v35 = vcombine.low %v273_v17, %v277_v18  ;;  %v289_v36 = vld [vmem:[#allocation2 + $0x740] sm:$0xff]  ;;  %v78_v17 = vld [vmem:[#allocation2 + $0xa8] sm:$0xff] }
  0x65   :  { %1694 = vmatprep.subr.bf16.mxu1 %v3321_v56  ;;  %1858 = vmatprep.subr.bf16.mxu0 %v3325_v38  ;;  %v249_v56 = vld [vmem:[#allocation2 + $0x600] sm:$0xff]  ;;  %v3425_v38 = vcombine.high %v281_v28, %v285_v29 }
  0x66   :  { %v3393_v2 = vcombine.high %v249_v56, %v253_v57  ;;  %v3392_v9 = vcombine.low %v249_v56, %v253_v57  ;;  %v293_v37 = vld [vmem:[#allocation2 + $0x760] sm:$0xff]  ;;  %v267_v57 = vld [vmem:[#allocation2 + $0x690] sm:$0xff] }
  0x68   :  { %1695 = vmatpush1.bf16.msra.mxu1 %v3320_v59  ;;  %1859 = vmatpush1.bf16.msra.mxu0 %v3324_v43  ;;  %v3340_v59 = vcombine.low %v195_v44, %v199_v45  ;;  %v3424_v43 = vcombine.low %v281_v28, %v285_v29  ;;  %v297_v44 = vld [vmem:[#allocation2 + $0x780] sm:$0xff]  ;;  %v86_v28 = vld [vmem:[#allocation2 + $0xe8] sm:$0xff] }
  0x69   :  { %1705 = vmatprep.subr.bf16.mxu1 %v3329_v63  ;;  %1869 = vmatprep.subr.bf16.mxu0 %v3333_v46  ;;  %v3384_v63 = vcombine.low %v241_v48, %v245_v49  ;;  %v301_v45 = vld [vmem:[#allocation2 + $0x7a0] sm:$0xff]  ;;  %v3433_v46 = vcombine.high %v289_v36, %v293_v37  ;;  %v259_v48 = vld [vmem:[#allocation2 + $0x650] sm:$0xff]  ;;  %v3397_v49 = vcombine.high %v251_v40, %v255_v41 }
  0x6b   :  { %1697 = vmatmul.mubr.bf16.vlgmr.msra.gmra.mrb[0].mxu1 %v4070_v3  ;;  %1861 = vmatmul.mubr.bf16.vlgmr.msra.gmra.mrb[0].mxu0 %v4070_v3 }
  0x6c   :  { %1706 = vmatpush1.bf16.msra.mxu1 %v3328_v4  ;;  %1737 = vmatprep.mubr.bf16.mxu1 %v4074_v7  ;;  %v3348_v4 = vcombine.low %v203_v52, %v207_v53  ;;  %v3441_v52 = vcombine.high %v297_v44, %v301_v45  ;;  %v3396_v53 = vcombine.low %v251_v40, %v255_v41 }
  0x6d   :  { %1707 = vmatprep.subr.bf16.mxu1 %v3337_v8  ;;  %1870 = vmatpush1.bf16.msra.mxu0 %v3332_v51  ;;  %v3357_v8 = vcombine.high %v211_v60, %v215_v61  ;;  %v3432_v51 = vcombine.low %v289_v36, %v293_v37  ;;  %v94_v36 = vld [vmem:[#allocation2 + $0x128] sm:$0xff] }
  0x6e   :  { %1871 = vmatprep.subr.bf16.mxu0 %v3341_v54  ;;  %1901 = vmatprep.mubr.bf16.mxu0 %v4074_v7  ;;  %v305_v54 = vld [vmem:[#allocation2 + $0x7c0] sm:$0xff] }
  0x70   :  { %1708 = vmatpush1.bf16.msra.mxu1 %v3336_v20  ;;  %v3356_v20 = vcombine.low %v211_v60, %v215_v61 }
  0x71   :  { %1709 = vmatprep.subr.bf16.mxu1 %v3345_v15  ;;  %1872 = vmatpush1.bf16.msra.mxu0 %v3340_v59  ;;  %v3365_v15 = vcombine.high %v219_v5, %v223_v6  ;;  %v3440_v59 = vcombine.low %v297_v44, %v301_v45  ;;  %v102_v44 = vld [vmem:[#allocation2 + $0x168] sm:$0xff] }
  0x72   :  { %1873 = vmatprep.subr.bf16.mxu0 %v3349_v62  ;;  %v58_v62 = vld [vmem:[#allocation2 + $0x8] sm:$0xff] }
  0x74   :  { %1710 = vmatpush1.bf16.msra.mxu1 %v3344_v21  ;;  %v3364_v21 = vcombine.low %v219_v5, %v223_v6 }
  0x75   :  { %1711 = vmatprep.subr.bf16.mxu1 %v3353_v25  ;;  %1874 = vmatpush1.bf16.msra.mxu0 %v3348_v4  ;;  %v3373_v25 = vcombine.high %v227_v23, %v231_v13 }
  0x76   :  { %1875 = vmatprep.subr.bf16.mxu0 %v3357_v8  ;;  %v66_v8 = vld [vmem:[#allocation2 + $0x48] sm:$0xff] }
  0x78   :  { %1712 = vmatpush1.bf16.msra.mxu1 %v3352_v31  ;;  %v3372_v31 = vcombine.low %v227_v23, %v231_v13 }
  0x79   :  { %1713 = vmatprep.subr.bf16.mxu1 %v3361_v34  ;;  %1876 = vmatpush1.bf16.msra.mxu0 %v3356_v20  ;;  %v3381_v34 = vcombine.high %v235_v22, %v239_v24  ;;  %v287_v20 = vld [vmem:[#allocation2 + $0x730] sm:$0xff] }
  0x7a   :  { %1877 = vmatprep.subr.bf16.mxu0 %v3365_v15 }
  0x7c   :  { %1714 = vmatpush1.bf16.msra.mxu1 %v3360_v39  ;;  %v3380_v39 = vcombine.low %v235_v22, %v239_v24 }
  0x7d   :  { %1715 = vmatprep.subr.bf16.mxu1 %v3369_v42  ;;  %1878 = vmatpush1.bf16.msra.mxu0 %v3364_v21  ;;  %v3389_v42 = vcombine.high %v243_v32, %v247_v33  ;;  %v295_v21 = vld [vmem:[#allocation2 + $0x770] sm:$0xff] }
  0x7e   :  { %1879 = vmatprep.subr.bf16.mxu0 %v3373_v25 }
  0x80   :  { %1716 = vmatpush1.bf16.msra.mxu1 %v3368_v47  ;;  %v3388_v47 = vcombine.low %v243_v32, %v247_v33 }
  0x81   :  { %1717 = vmatprep.subr.bf16.mxu1 %v3377_v50  ;;  %1880 = vmatpush1.bf16.msra.mxu0 %v3372_v31  ;;  %v263_v50 = vld [vmem:[#allocation2 + $0x670] sm:$0xff] }
  0x82   :  { %1881 = vmatprep.subr.bf16.mxu0 %v3381_v34  ;;  %v3405_v56 = vcombine.high %v259_v48, %v263_v50  ;;  %v3404_v61 = vcombine.low %v259_v48, %v263_v50  ;;  %v303_v31 = vld [vmem:[#allocation2 + $0x7b0] sm:$0xff]  ;;  %v110_v50 = vld [vmem:[#allocation2 + $0x1a8] sm:$0xff] }
  0x84   :  { %1718 = vmatpush1.bf16.msra.mxu1 %v3376_v55  ;;  %v309_v55 = vld [vmem:[#allocation2 + $0x7e0] sm:$0xff] }
  0x85   :  { %1719 = vmatprep.subr.bf16.mxu1 %v3385_v58  ;;  %1882 = vmatpush1.bf16.msra.mxu0 %v3380_v39  ;;  %v271_v58 = vld [vmem:[#allocation2 + $0x6b0] sm:$0xff]  ;;  %v3449_v60 = vcombine.high %v305_v54, %v309_v55  ;;  %v3448_v4 = vcombine.low %v305_v54, %v309_v55  ;;  %v118_v54 = vld [vmem:[#allocation2 + $0x1e8] sm:$0xff] }
  0x86   :  { %1883 = vmatprep.subr.bf16.mxu0 %v3389_v42  ;;  %v3413_v0 = vcombine.high %v267_v57, %v271_v58  ;;  %v3412_v6 = vcombine.low %v267_v57, %v271_v58  ;;  %v311_v39 = vld [vmem:[#allocation2 + $0x7f0] sm:$0xff]  ;;  %v122_v57 = vld [vmem:[#allocation2 + $0x208] sm:$0xff] }
  0x87   :  { %v126_v58 = vld [vmem:[#allocation2 + $0x228] sm:$0xff] }
  0x88   :  { %1720 = vmatpush1.bf16.msra.mxu1 %v3384_v63  ;;  %v62_v63 = vld [vmem:[#allocation2 + $0x28] sm:$0xff] }
  0x89   :  { %1721 = vmatprep.subr.bf16.mxu1 %v3393_v2  ;;  %1884 = vmatpush1.bf16.msra.mxu0 %v3388_v47  ;;  %v279_v2 = vld [vmem:[#allocation2 + $0x6f0] sm:$0xff]  ;;  %v3203_v5 = vcombine.high %v58_v62, %v62_v63  ;;  %v3202_v23 = vcombine.low %v58_v62, %v62_v63  ;;  %v134_v62 = vld [vmem:[#allocation2 + $0x268] sm:$0xff]  ;;  %v3266_v63 = vcombine.low %v122_v57, %v126_v58 }
  0x8a   :  { %1885 = vmatprep.subr.bf16.mxu0 %v3397_v49  ;;  %v3421_v10 = vcombine.high %v275_v1, %v279_v2  ;;  %v3420_v15 = vcombine.low %v275_v1, %v279_v2  ;;  %v106_v49 = vld [vmem:[#allocation2 + $0x188] sm:$0xff] }
  0x8b   :  { %v3250_v55 = vcombine.low %v106_v49, %v110_v50  ;;  %v138_v1 = vld [vmem:[#allocation2 + $0x288] sm:$0xff] }
  0x8c   :  { %1722 = vmatpush1.bf16.msra.mxu1 %v3392_v9  ;;  %v70_v9 = vld [vmem:[#allocation2 + $0x68] sm:$0xff] }
  0x8d   :  { %1723 = vmatprep.subr.bf16.mxu1 %v3401_v12  ;;  %1886 = vmatpush1.bf16.msra.mxu0 %v3396_v53  ;;  %v283_v12 = vld [vmem:[#allocation2 + $0x710] sm:$0xff]  ;;  %v3211_v13 = vcombine.high %v66_v8, %v70_v9  ;;  %v3210_v22 = vcombine.low %v66_v8, %v70_v9  ;;  %v114_v53 = vld [vmem:[#allocation2 + $0x1c8] sm:$0xff] }
  0x8e   :  { %1887 = vmatprep.subr.bf16.mxu0 %v3405_v56  ;;  %v3429_v18 = vcombine.high %v283_v12, %v287_v20  ;;  %v3428_v25 = vcombine.low %v283_v12, %v287_v20  ;;  %v3259_v56 = vcombine.high %v114_v53, %v118_v54  ;;  %v142_v2 = vld [vmem:[#allocation2 + $0x2a8] sm:$0xff] }
  0x8f   :  { %v150_v8 = vld [vmem:[#allocation2 + $0x2e8] sm:$0xff]  ;;  %v3282_v9 = vcombine.low %v138_v1, %v142_v2 }
  0x90   :  { %1724 = vmatpush1.bf16.msra.mxu1 %v3400_v16  ;;  %v74_v16 = vld [vmem:[#allocation2 + $0x88] sm:$0xff] }
  0x91   :  { %1725 = vmatprep.subr.bf16.mxu1 %v3409_v19  ;;  %1888 = vmatpush1.bf16.msra.mxu0 %v3404_v61  ;;  %v291_v19 = vld [vmem:[#allocation2 + $0x750] sm:$0xff]  ;;  %v3219_v24 = vcombine.high %v74_v16, %v78_v17  ;;  %v3218_v32 = vcombine.low %v74_v16, %v78_v17  ;;  %v130_v61 = vld [vmem:[#allocation2 + $0x248] sm:$0xff] }
  0x92   :  { %1889 = vmatprep.subr.bf16.mxu0 %v3413_v0  ;;  %v3437_v29 = vcombine.high %v291_v19, %v295_v21  ;;  %v3436_v34 = vcombine.low %v291_v19, %v295_v21  ;;  %v3275_v0 = vcombine.high %v130_v61, %v134_v62  ;;  %v154_v12 = vld [vmem:[#allocation2 + $0x308] sm:$0xff] }
  0x93   :  { %v158_v20 = vld [vmem:[#allocation2 + $0x328] sm:$0xff] }
  0x94   :  { %1726 = vmatpush1.bf16.msra.mxu1 %v3408_v26  ;;  %v82_v26 = vld [vmem:[#allocation2 + $0xc8] sm:$0xff]  ;;  %v3298_v19 = vcombine.low %v154_v12, %v158_v20 }
  0x95   :  { %1727 = vmatprep.subr.bf16.mxu1 %v3417_v30  ;;  %1890 = vmatpush1.bf16.msra.mxu0 %v3412_v6  ;;  %v299_v30 = vld [vmem:[#allocation2 + $0x790] sm:$0xff]  ;;  %v3227_v33 = vcombine.high %v82_v26, %v86_v28  ;;  %v3226_v40 = vcombine.low %v82_v26, %v86_v28  ;;  %v146_v6 = vld [vmem:[#allocation2 + $0x2c8] sm:$0xff] }
  0x96   :  { %1891 = vmatprep.subr.bf16.mxu0 %v3421_v10  ;;  %v3445_v37 = vcombine.high %v299_v30, %v303_v31  ;;  %v3444_v42 = vcombine.low %v299_v30, %v303_v31  ;;  %v3291_v10 = vcombine.high %v146_v6, %v150_v8  ;;  %v3681_v16 = vld [vmem:[#allocation5 + $0x4] ss:$8 sps:$4 sm:$0xff]   ;;  %v3685_v30 = vld [vmem:[#allocation5 + $0x20] ss:$8 sps:$4 sm:$0xff]  }
  0x97   :  { %v162_v17 = vld [vmem:[#allocation2 + $0x348] sm:$0xff] }
  0x98   :  { %1728 = vmatpush1.bf16.msra.mxu1 %v3416_v35  ;;  %v90_v35 = vld [vmem:[#allocation2 + $0x108] sm:$0xff] }
  0x99   :  { %1729 = vmatprep.subr.bf16.mxu1 %v3425_v38  ;;  %1892 = vmatpush1.bf16.msra.mxu0 %v3420_v15  ;;  %v307_v38 = vld [vmem:[#allocation2 + $0x7d0] sm:$0xff]  ;;  %v3235_v41 = vcombine.high %v90_v35, %v94_v36  ;;  %v3679_v15 = vld [vmem:[#allocation5] ss:$8 sps:$4 sm:$0xff]   ;;  %v3687_v31 = vld [vmem:[#allocation5 + $0x24] ss:$8 sps:$4 sm:$0xff]  }
  0x9a   :  { %1893 = vmatprep.subr.bf16.mxu0 %v3429_v18  ;;  %v3453_v45 = vcombine.high %v307_v38, %v311_v39  ;;  %v3452_v48 = vcombine.low %v307_v38, %v311_v39  ;;  %v166_v18 = vld [vmem:[#allocation2 + $0x368] sm:$0xff] }
  0x9b   :  { %v3307_v21 = vcombine.high %v162_v17, %v166_v18  ;;  %v174_v26 = vld [vmem:[#allocation2 + $0x3a8] sm:$0xff]  ;;  %v3306_v28 = vcombine.low %v162_v17, %v166_v18 }
  0x9c   :  { %1730 = vmatpush1.bf16.msra.mxu1 %v3424_v43  ;;  %v98_v43 = vld [vmem:[#allocation2 + $0x148] sm:$0xff] }
  0x9d   :  { %1731 = vmatprep.subr.bf16.mxu1 %v3433_v46  ;;  %1894 = vmatpush1.bf16.msra.mxu0 %v3428_v25  ;;  %v3234_v46 = vcombine.low %v90_v35, %v94_v36  ;;  %v3243_v47 = vcombine.high %v98_v43, %v102_v44  ;;  %v170_v25 = vld [vmem:[#allocation2 + $0x388] sm:$0xff]  ;;  %v3688_v36 = vld [vmem:[#allocation5 + $0x30] ss:$8 sps:$4 sm:$0xff]  }
  0x9e   :  { %1895 = vmatprep.subr.bf16.mxu0 %v3437_v29  ;;  %v3315_v29 = vcombine.high %v170_v25, %v174_v26  ;;  %v186_v38 = vld [vmem:[#allocation2 + $0x408] sm:$0xff] }
  0x9f   :  { %v190_v39 = vld [vmem:[#allocation2 + $0x428] sm:$0xff] }
  0xa0   :  { %1732 = vmatpush1.bf16.msra.mxu1 %v3432_v51  ;;  %v3242_v51 = vcombine.low %v98_v43, %v102_v44  ;;  %v3693_v43 = vld [vmem:[#allocation5 + $0x44] ss:$8 sps:$4 sm:$0xff]  }
  0xa1   :  { %1733 = vmatprep.subr.bf16.mxu1 %v3441_v52  ;;  %1896 = vmatpush1.bf16.msra.mxu0 %v3436_v34  ;;  %v3251_v52 = vcombine.high %v106_v49, %v110_v50  ;;  %v3314_v34 = vcombine.low %v170_v25, %v174_v26  ;;  %v194_v44 = vld [vmem:[#allocation2 + $0x448] sm:$0xff]  ;;  %v3696_v49 = vld [vmem:[#allocation5 + $0x54] ss:$8 sps:$4 sm:$0xff]  }
  0xa2   :  { %1897 = vmatprep.subr.bf16.mxu0 %v3445_v37  ;;  %v3690_v37 = vld [vmem:[#allocation5 + $0x34] ss:$8 sps:$4 sm:$0xff]   ;;  %v202_v50 = vld [vmem:[#allocation2 + $0x488] sm:$0xff] }
  0xa3   :  { %v242_v17 = vld [vmem:[#allocation2 + $0x5c8] sm:$0xff] }
  0xa4   :  { %1734 = vmatpush1.bf16.msra.mxu1 %v3440_v59  ;;  %v3258_v59 = vcombine.low %v114_v53, %v118_v54  ;;  %v3697_v54 = vld [vmem:[#allocation5 + $0x60] ss:$8 sps:$4 sm:$0xff]  }
  0xa5   :  { %1735 = vmatprep.subr.bf16.mxu1 %v3449_v60  ;;  %1898 = vmatpush1.bf16.msra.mxu0 %v3444_v42  ;;  %v3267_v60 = vcombine.high %v122_v57, %v126_v58  ;;  %v3691_v42 = vld [vmem:[#allocation5 + $0x40] ss:$8 sps:$4 sm:$0xff]  }
  0xa6   :  { %1899 = vmatprep.subr.bf16.mxu0 %v3453_v45  ;;  %v198_v45 = vld [vmem:[#allocation2 + $0x468] sm:$0xff] }
  0xa7   :  { %v214_v57 = vld [vmem:[#allocation2 + $0x4e8] sm:$0xff] }
  0xa8   :  { %1736 = vmatpush1.bf16.msra.mxu1 %v3448_v4  ;;  %v3274_v4 = vcombine.low %v130_v61, %v134_v62  ;;  %v3702_v61 = vld [vmem:[#allocation5 + $0x74] ss:$8 sps:$4 sm:$0xff]   ;;  %v218_v62 = vld [vmem:[#allocation2 + $0x508] sm:$0xff] }
  0xa9   :  { %1746 = vmatprep.subr.bf16.mxu1 %v3203_v5  ;;  %1900 = vmatpush1.bf16.msra.mxu0 %v3452_v48  ;;  %v3283_v5 = vcombine.high %v138_v1, %v142_v2  ;;  %v3694_v48 = vld [vmem:[#allocation5 + $0x50] ss:$8 sps:$4 sm:$0xff]   ;;  %v3703_v2 = vld [vmem:[#allocation5 + $0x80] ss:$8 sps:$4 sm:$0xff]  }
  0xaa   :  { %2828 = vmatprep.subr.bf16.mxu0 %v3681_v16  ;;  %v3711_v16 = vld [vmem:[#allocation5 + $0xa4] ss:$8 sps:$4 sm:$0xff]  }
  0xab   :  { %1738 = vmatmul.mubr.bf16.vlgmr.msra.gmra.mrb[0].mxu1 %v4082_v11  ;;  %v246_v18 = vld [vmem:[#allocation2 + $0x5e8] sm:$0xff] }
  0xac   :  { %1747 = vmatpush1.bf16.msra.mxu1 %v3202_v23  ;;  %1778 = vmatprep.mubr.bf16.mxu1 %v4064_v27  ;;  %v3290_v23 = vcombine.low %v146_v6, %v150_v8  ;;  %v230_v6 = vld [vmem:[#allocation2 + $0x568] sm:$0xff] }
  0xad   :  { %1748 = vmatprep.subr.bf16.mxu1 %v3211_v13  ;;  %1902 = vmatmul.mubr.bf16.vlgmr.msra.gmra.mrb[0].mxu0 %v4082_v11  ;;  %v3299_v13 = vcombine.high %v154_v12, %v158_v20  ;;  %v3708_v12 = vld [vmem:[#allocation5 + $0x94] ss:$8 sps:$4 sm:$0xff]   ;;  %v234_v20 = vld [vmem:[#allocation2 + $0x588] sm:$0xff] }
  0xae   :  { %2829 = vmatpush1.bf16.msra.mxu0 %v3679_v15  ;;  %v250_v25 = vld [vmem:[#allocation2 + $0x608] sm:$0xff] }
  0xaf   :  { %v254_v26 = vld [vmem:[#allocation2 + $0x628] sm:$0xff] }
  0xb0   :  { %1749 = vmatpush1.bf16.msra.mxu1 %v3210_v22  ;;  %v3682_v22 = vld [vmem:[#allocation5 + $0x10] ss:$8 sps:$4 sm:$0xff]  }
  0xb1   :  { %1750 = vmatprep.subr.bf16.mxu1 %v3219_v24  ;;  %v3684_v24 = vld [vmem:[#allocation5 + $0x14] ss:$8 sps:$4 sm:$0xff]  }
  0xb2   :  { %2830 = vmatprep.subr.bf16.mxu0 %v3684_v24  ;;  %v3714_v24 = vld [vmem:[#allocation5 + $0xb4] ss:$8 sps:$4 sm:$0xff]  }
  0xb3   :  { %2831 = vmatpush1.bf16.msra.mxu0 %v3682_v22  ;;  %v3387_v22 = vcombine.high %v242_v17, %v246_v18 }
  0xb4   :  { %1751 = vmatpush1.bf16.msra.mxu1 %v3218_v32  ;;  %v178_v32 = vld [vmem:[#allocation2 + $0x3c8] sm:$0xff]  ;;  %2832 = vmatprep.subr.bf16.mxu0 %v3687_v31 }
  0xb5   :  { %1752 = vmatprep.subr.bf16.mxu1 %v3227_v33  ;;  %v182_v33 = vld [vmem:[#allocation2 + $0x3e8] sm:$0xff] }
  0xb6   :  { %v3323_v35 = vcombine.high %v178_v32, %v182_v33  ;;  %v3717_v31 = vld [vmem:[#allocation5 + $0xc4] ss:$8 sps:$4 sm:$0xff]  }
  0xb7   :  { %2833 = vmatpush1.bf16.msra.mxu0 %v3685_v30  ;;  %v3395_v30 = vcombine.high %v250_v25, %v254_v26 }
  0xb8   :  { %1753 = vmatpush1.bf16.msra.mxu1 %v3226_v40  ;;  %2834 = vmatprep.subr.bf16.mxu0 %v3690_v37  ;;  %v3322_v40 = vcombine.low %v178_v32, %v182_v33  ;;  %v258_v32 = vld [vmem:[#allocation2 + $0x648] sm:$0xff]  ;;  %v3720_v37 = vld [vmem:[#allocation5 + $0xd4] ss:$8 sps:$4 sm:$0xff]  }
  0xb9   :  { %1754 = vmatprep.subr.bf16.mxu1 %v3235_v41  ;;  %v3331_v41 = vcombine.high %v186_v38, %v190_v39  ;;  %v262_v33 = vld [vmem:[#allocation2 + $0x668] sm:$0xff] }
  0xbb   :  { %2835 = vmatpush1.bf16.msra.mxu0 %v3688_v36  ;;  %v3403_v36 = vcombine.high %v258_v32, %v262_v33 }
  0xbc   :  { %1755 = vmatpush1.bf16.msra.mxu1 %v3234_v46  ;;  %2836 = vmatprep.subr.bf16.mxu0 %v3693_v43  ;;  %v3330_v46 = vcombine.low %v186_v38, %v190_v39  ;;  %v266_v38 = vld [vmem:[#allocation2 + $0x688] sm:$0xff] }
  0xbd   :  { %1756 = vmatprep.subr.bf16.mxu1 %v3243_v47  ;;  %v3339_v47 = vcombine.high %v194_v44, %v198_v45  ;;  %v270_v39 = vld [vmem:[#allocation2 + $0x6a8] sm:$0xff] }
  0xbe   :  { %v3723_v43 = vld [vmem:[#allocation5 + $0xe4] ss:$8 sps:$4 sm:$0xff]  }
  0xbf   :  { %2837 = vmatpush1.bf16.msra.mxu0 %v3691_v42  ;;  %v3411_v42 = vcombine.high %v266_v38, %v270_v39 }
  0xc0   :  { %1757 = vmatpush1.bf16.msra.mxu1 %v3242_v51  ;;  %v206_v51 = vld [vmem:[#allocation2 + $0x4a8] sm:$0xff]  ;;  %2838 = vmatprep.subr.bf16.mxu0 %v3696_v49  ;;  %v3726_v49 = vld [vmem:[#allocation5 + $0xf4] ss:$8 sps:$4 sm:$0xff]  }
  0xc1   :  { %1758 = vmatprep.subr.bf16.mxu1 %v3251_v52  ;;  %v3338_v52 = vcombine.low %v194_v44, %v198_v45  ;;  %v3347_v53 = vcombine.high %v202_v50, %v206_v51  ;;  %v3346_v58 = vcombine.low %v202_v50, %v206_v51  ;;  %v274_v44 = vld [vmem:[#allocation2 + $0x6c8] sm:$0xff] }
  0xc2   :  { %v278_v45 = vld [vmem:[#allocation2 + $0x6e8] sm:$0xff] }
  0xc3   :  { %2839 = vmatpush1.bf16.msra.mxu0 %v3694_v48  ;;  %v3419_v48 = vcombine.high %v274_v44, %v278_v45  ;;  %v282_v50 = vld [vmem:[#allocation2 + $0x708] sm:$0xff] }
  0xc4   :  { %1759 = vmatpush1.bf16.msra.mxu1 %v3250_v55  ;;  %v3699_v55 = vld [vmem:[#allocation5 + $0x64] ss:$8 sps:$4 sm:$0xff]  }
  0xc5   :  { %1760 = vmatprep.subr.bf16.mxu1 %v3259_v56  ;;  %v210_v56 = vld [vmem:[#allocation2 + $0x4c8] sm:$0xff]  ;;  %2840 = vmatprep.subr.bf16.mxu0 %v3699_v55 }
  0xc6   :  { %v286_v51 = vld [vmem:[#allocation2 + $0x728] sm:$0xff] }
  0xc7   :  { %2841 = vmatpush1.bf16.msra.mxu0 %v3697_v54  ;;  %v3427_v54 = vcombine.high %v282_v50, %v286_v51  ;;  %v290_v55 = vld [vmem:[#allocation2 + $0x748] sm:$0xff] }
  0xc8   :  { %1761 = vmatpush1.bf16.msra.mxu1 %v3258_v59  ;;  %v3355_v59 = vcombine.high %v210_v56, %v214_v57  ;;  %2842 = vmatprep.subr.bf16.mxu0 %v3702_v61 }
  0xc9   :  { %1762 = vmatprep.subr.bf16.mxu1 %v3267_v60  ;;  %v3700_v60 = vld [vmem:[#allocation5 + $0x70] ss:$8 sps:$4 sm:$0xff]  }
  0xcb   :  { %2843 = vmatpush1.bf16.msra.mxu0 %v3700_v60  ;;  %v302_v60 = vld [vmem:[#allocation2 + $0x7a8] sm:$0xff] }
  0xcc   :  { %1763 = vmatpush1.bf16.msra.mxu1 %v3266_v63  ;;  %v222_v63 = vld [vmem:[#allocation2 + $0x528] sm:$0xff] }
  0xcd   :  { %1764 = vmatprep.subr.bf16.mxu1 %v3275_v0  ;;  %v3354_v0 = vcombine.low %v210_v56, %v214_v57  ;;  %v3363_v1 = vcombine.high %v218_v62, %v222_v63  ;;  %v3362_v8 = vcombine.low %v218_v62, %v222_v63  ;;  %v294_v56 = vld [vmem:[#allocation2 + $0x768] sm:$0xff]  ;;  %v3426_v57 = vcombine.low %v282_v50, %v286_v51 }
  0xce   :  { %v3434_v61 = vcombine.low %v290_v55, %v294_v56  ;;  %v306_v63 = vld [vmem:[#allocation2 + $0x7c8] sm:$0xff] }
  0xd0   :  { %1765 = vmatpush1.bf16.msra.mxu1 %v3274_v4  ;;  %v3705_v4 = vld [vmem:[#allocation5 + $0x84] ss:$8 sps:$4 sm:$0xff]  }
  0xd1   :  { %1766 = vmatprep.subr.bf16.mxu1 %v3283_v5  ;;  %v226_v5 = vld [vmem:[#allocation2 + $0x548] sm:$0xff]  ;;  %2844 = vmatprep.subr.bf16.mxu0 %v3705_v4  ;;  %v60_v4 = vld [vmem:[#allocation2 + $0x18] sm:$0xff] }
  0xd2   :  { %2845 = vmatpush1.bf16.msra.mxu0 %v3703_v2 }
  0xd3   :  { %2846 = vmatprep.subr.bf16.mxu0 %v3708_v12 }
  0xd4   :  { %1767 = vmatpush1.bf16.msra.mxu1 %v3282_v9  ;;  %v3371_v9 = vcombine.high %v226_v5, %v230_v6 }
  0xd5   :  { %1768 = vmatprep.subr.bf16.mxu1 %v3291_v10  ;;  %v3706_v10 = vld [vmem:[#allocation5 + $0x90] ss:$8 sps:$4 sm:$0xff]  }
  0xd6   :  { %2847 = vmatpush1.bf16.msra.mxu0 %v3706_v10  ;;  %v72_v10 = vld [vmem:[#allocation2 + $0x78] sm:$0xff] }
  0xd7   :  { %2848 = vmatprep.subr.bf16.mxu0 %v3711_v16 }
  0xd8   :  { %1769 = vmatpush1.bf16.msra.mxu1 %v3290_v23  ;;  %v238_v23 = vld [vmem:[#allocation2 + $0x5a8] sm:$0xff] }
  0xd9   :  { %1770 = vmatprep.subr.bf16.mxu1 %v3299_v13  ;;  %v3370_v13 = vcombine.low %v226_v5, %v230_v6  ;;  %v3379_v15 = vcombine.high %v234_v20, %v238_v23  ;;  %v64_v5 = vld [vmem:[#allocation2 + $0x38] sm:$0xff] }
  0xda   :  { %v3206_v12 = vcombine.low %v60_v4, %v64_v5 }
  0xdc   :  { %1771 = vmatpush1.bf16.msra.mxu1 %v3298_v19  ;;  %v3709_v19 = vld [vmem:[#allocation5 + $0xa0] ss:$8 sps:$4 sm:$0xff]  }
  0xdd   :  { %1772 = vmatprep.subr.bf16.mxu1 %v3307_v21  ;;  %v3378_v21 = vcombine.low %v234_v20, %v238_v23  ;;  %2849 = vmatpush1.bf16.msra.mxu0 %v3709_v19  ;;  %v76_v23 = vld [vmem:[#allocation2 + $0x98] sm:$0xff] }
  0xde   :  { %2850 = vmatprep.subr.bf16.mxu0 %v3714_v24  ;;  %v88_v19 = vld [vmem:[#allocation2 + $0xf8] sm:$0xff] }
  0xdf   :  { %v92_v24 = vld [vmem:[#allocation2 + $0x118] sm:$0xff] }
  0xe0   :  { %1773 = vmatpush1.bf16.msra.mxu1 %v3306_v28  ;;  %v3712_v28 = vld [vmem:[#allocation5 + $0xb0] ss:$8 sps:$4 sm:$0xff]  }
  0xe1   :  { %1774 = vmatprep.subr.bf16.mxu1 %v3315_v29  ;;  %v3386_v29 = vcombine.low %v242_v17, %v246_v18  ;;  %2851 = vmatpush1.bf16.msra.mxu0 %v3712_v28  ;;  %v84_v18 = vld [vmem:[#allocation2 + $0xd8] sm:$0xff] }
  0xe2   :  { %2852 = vmatprep.subr.bf16.mxu0 %v3717_v31 }
  0xe4   :  { %1775 = vmatpush1.bf16.msra.mxu1 %v3314_v34  ;;  %v3715_v34 = vld [vmem:[#allocation5 + $0xc0] ss:$8 sps:$4 sm:$0xff]  }
  0xe5   :  { %1776 = vmatprep.subr.bf16.mxu1 %v3323_v35  ;;  %v3394_v35 = vcombine.low %v250_v25, %v254_v26  ;;  %2853 = vmatpush1.bf16.msra.mxu0 %v3715_v34  ;;  %v96_v25 = vld [vmem:[#allocation2 + $0x138] sm:$0xff]  ;;  %v3230_v26 = vcombine.low %v84_v18, %v88_v19 }
  0xe6   :  { %2854 = vmatprep.subr.bf16.mxu0 %v3720_v37  ;;  %v3239_v28 = vcombine.high %v92_v24, %v96_v25  ;;  %v3238_v31 = vcombine.low %v92_v24, %v96_v25  ;;  %v120_v37 = vld [vmem:[#allocation2 + $0x1f8] sm:$0xff] }
  0xe7   :  { %v212_v24 = vld [vmem:[#allocation2 + $0x4d8] sm:$0xff] }
  0xe8   :  { %1777 = vmatpush1.bf16.msra.mxu1 %v3322_v40  ;;  %v3718_v40 = vld [vmem:[#allocation5 + $0xd0] ss:$8 sps:$4 sm:$0xff]  }
  0xe9   :  { %1787 = vmatprep.subr.bf16.mxu1 %v3331_v41  ;;  %v3402_v41 = vcombine.low %v258_v32, %v262_v33  ;;  %2855 = vmatpush1.bf16.msra.mxu0 %v3718_v40  ;;  %v108_v32 = vld [vmem:[#allocation2 + $0x198] sm:$0xff] }
  0xea   :  { %2856 = vmatprep.subr.bf16.mxu0 %v3723_v43  ;;  %v112_v33 = vld [vmem:[#allocation2 + $0x1b8] sm:$0xff] }
  0xeb   :  { %1779 = vmatmul.mubr.bf16.vlgmr.msra.gmra.mrb[4].mxu1 %v4070_v3  ;;  %v124_v40 = vld [vmem:[#allocation2 + $0x218] sm:$0xff] }
  0xec   :  { %1788 = vmatpush1.bf16.msra.mxu1 %v3330_v46  ;;  %1819 = vmatprep.mubr.bf16.mxu1 %v4074_v7  ;;  %v3721_v46 = vld [vmem:[#allocation5 + $0xe0] ss:$8 sps:$4 sm:$0xff]   ;;  %v216_v25 = vld [vmem:[#allocation2 + $0x4f8] sm:$0xff] }
  0xed   :  { %1789 = vmatprep.subr.bf16.mxu1 %v3339_v47  ;;  %v3410_v47 = vcombine.low %v266_v38, %v270_v39  ;;  %2857 = vmatpush1.bf16.msra.mxu0 %v3721_v46  ;;  %v3254_v38 = vcombine.low %v108_v32, %v112_v33 }
  0xee   :  { %2858 = vmatprep.subr.bf16.mxu0 %v3726_v49  ;;  %v144_v49 = vld [vmem:[#allocation2 + $0x2b8] sm:$0xff] }
  0xf0   :  { %1790 = vmatpush1.bf16.msra.mxu1 %v3338_v52  ;;  %v3724_v52 = vld [vmem:[#allocation5 + $0xf0] ss:$8 sps:$4 sm:$0xff]  }
  0xf1   :  { %1791 = vmatprep.subr.bf16.mxu1 %v3347_v53  ;;  %v3418_v53 = vcombine.low %v274_v44, %v278_v45  ;;  %2859 = vmatpush1.bf16.msra.mxu0 %v3724_v52  ;;  %v132_v44 = vld [vmem:[#allocation2 + $0x258] sm:$0xff] }
  0xf2   :  { %v136_v45 = vld [vmem:[#allocation2 + $0x278] sm:$0xff] }
  0xf3   :  { %v3278_v50 = vcombine.low %v132_v44, %v136_v45  ;;  %v148_v52 = vld [vmem:[#allocation2 + $0x2d8] sm:$0xff] }
  0xf4   :  { %1792 = vmatpush1.bf16.msra.mxu1 %v3346_v58  ;;  %v3435_v58 = vcombine.high %v290_v55, %v294_v56  ;;  %v156_v56 = vld [vmem:[#allocation2 + $0x318] sm:$0xff] }
  0xf5   :  { %1793 = vmatprep.subr.bf16.mxu1 %v3355_v59  ;;  %v298_v59 = vld [vmem:[#allocation2 + $0x788] sm:$0xff] }
  0xf6   :  { %v3443_v62 = vcombine.high %v298_v59, %v302_v60 }
  0xf8   :  { %1794 = vmatpush1.bf16.msra.mxu1 %v3354_v0  ;;  %v310_v0 = vld [vmem:[#allocation2 + $0x7e8] sm:$0xff] }
  0xf9   :  { %1795 = vmatprep.subr.bf16.mxu1 %v3363_v1  ;;  %v3442_v1 = vcombine.low %v298_v59, %v302_v60  ;;  %v3451_v2 = vcombine.high %v306_v63, %v310_v0  ;;  %v3450_v6 = vcombine.low %v306_v63, %v310_v0  ;;  %v164_v60 = vld [vmem:[#allocation2 + $0x358] sm:$0xff] }
  0xfa   :  { %v172_v0 = vld [vmem:[#allocation2 + $0x398] sm:$0xff] }
  0xfc   :  { %1796 = vmatpush1.bf16.msra.mxu1 %v3362_v8  ;;  %v3207_v8 = vcombine.high %v60_v4, %v64_v5  ;;  %v180_v5 = vld [vmem:[#allocation2 + $0x3d8] sm:$0xff] }
  0xfd   :  { %1797 = vmatprep.subr.bf16.mxu1 %v3371_v9  ;;  %v68_v9 = vld [vmem:[#allocation2 + $0x58] sm:$0xff] }
  0xfe   :  { %v3215_v20 = vcombine.high %v68_v9, %v72_v10  ;;  %v3214_v16 = vcombine.low %v68_v9, %v72_v10  ;;  %v188_v10 = vld [vmem:[#allocation2 + $0x418] sm:$0xff] }
 0x100   :  { %1798 = vmatpush1.bf16.msra.mxu1 %v3370_v13  ;;  %v80_v13 = vld [vmem:[#allocation2 + $0xb8] sm:$0xff] }
 0x101   :  { %1799 = vmatprep.subr.bf16.mxu1 %v3379_v15  ;;  %v3729_v15 = vld [vmem:[#allocation5 + $0x104] ss:$8 sps:$4 sm:$0xff]   ;;  %v3223_v17 = vcombine.high %v76_v23, %v80_v13 }
 0x102   :  { %2869 = vmatprep.subr.bf16.mxu0 %v3729_v15  ;;  %v200_v15 = vld [vmem:[#allocation2 + $0x478] sm:$0xff] }
 0x104   :  { %1800 = vmatpush1.bf16.msra.mxu1 %v3378_v21  ;;  %v3222_v21 = vcombine.low %v76_v23, %v80_v13  ;;  %v196_v13 = vld [vmem:[#allocation2 + $0x458] sm:$0xff] }
 0x105   :  { %1801 = vmatprep.subr.bf16.mxu1 %v3387_v22  ;;  %v3231_v22 = vcombine.high %v84_v18, %v88_v19  ;;  %v204_v18 = vld [vmem:[#allocation2 + $0x498] sm:$0xff] }
 0x106   :  { %v208_v19 = vld [vmem:[#allocation2 + $0x4b8] sm:$0xff] }
 0x108   :  { %1802 = vmatpush1.bf16.msra.mxu1 %v3386_v29  ;;  %v100_v29 = vld [vmem:[#allocation2 + $0x158] sm:$0xff] }
 0x109   :  { %1803 = vmatprep.subr.bf16.mxu1 %v3395_v30  ;;  %v104_v30 = vld [vmem:[#allocation2 + $0x178] sm:$0xff] }
 0x10a   :  { %v3246_v34 = vcombine.low %v100_v29, %v104_v30 }
 0x10c   :  { %1804 = vmatpush1.bf16.msra.mxu1 %v3394_v35  ;;  %v3255_v35 = vcombine.high %v108_v32, %v112_v33  ;;  %v228_v32 = vld [vmem:[#allocation2 + $0x558] sm:$0xff]  ;;  %v317_v33 = vsub.s32 0, %v4051_v14 }
 0x10d   :  { %1805 = vmatprep.subr.bf16.mxu1 %v3403_v36  ;;  %v116_v36 = vld [vmem:[#allocation2 + $0x1d8] sm:$0xff] }
 0x10e   :  { %v3263_v39 = vcombine.high %v116_v36, %v120_v37 }
 0x110   :  { %1806 = vmatpush1.bf16.msra.mxu1 %v3402_v41  ;;  %v128_v41 = vld [vmem:[#allocation2 + $0x238] sm:$0xff] }
 0x111   :  { %1807 = vmatprep.subr.bf16.mxu1 %v3411_v42  ;;  %v3262_v42 = vcombine.low %v116_v36, %v120_v37  ;;  %v3271_v43 = vcombine.high %v124_v40, %v128_v41  ;;  %v3270_v46 = vcombine.low %v124_v40, %v128_v41  ;;  %v236_v37 = vld [vmem:[#allocation2 + $0x598] sm:$0xff] }
 0x114   :  { %1808 = vmatpush1.bf16.msra.mxu1 %v3410_v47  ;;  %v3279_v47 = vcombine.high %v132_v44, %v136_v45  ;;  %v244_v44 = vld [vmem:[#allocation2 + $0x5d8] sm:$0xff] }
 0x115   :  { %1809 = vmatprep.subr.bf16.mxu1 %v3419_v48  ;;  %v140_v48 = vld [vmem:[#allocation2 + $0x298] sm:$0xff] }
 0x116   :  { %v3287_v51 = vcombine.high %v140_v48, %v144_v49  ;;  %v248_v45 = vld [vmem:[#allocation2 + $0x5f8] sm:$0xff] }
 0x118   :  { %1810 = vmatpush1.bf16.msra.mxu1 %v3418_v53  ;;  %v152_v53 = vld [vmem:[#allocation2 + $0x2f8] sm:$0xff] }
 0x119   :  { %1811 = vmatprep.subr.bf16.mxu1 %v3427_v54  ;;  %v3286_v54 = vcombine.low %v140_v48, %v144_v49  ;;  %v3295_v55 = vcombine.high %v148_v52, %v152_v53 }
 0x11c   :  { %1812 = vmatpush1.bf16.msra.mxu1 %v3426_v57  ;;  %v160_v57 = vld [vmem:[#allocation2 + $0x338] sm:$0xff] }
 0x11d   :  { %1813 = vmatprep.subr.bf16.mxu1 %v3435_v58  ;;  %v3294_v58 = vcombine.low %v148_v52, %v152_v53  ;;  %v3303_v59 = vcombine.high %v156_v56, %v160_v57  ;;  %v3391_v53 = vcombine.high %v244_v44, %v248_v45 }
 0x120   :  { %1814 = vmatpush1.bf16.msra.mxu1 %v3434_v61  ;;  %v168_v61 = vld [vmem:[#allocation2 + $0x378] sm:$0xff] }
 0x121   :  { %1815 = vmatprep.subr.bf16.mxu1 %v3443_v62  ;;  %v3302_v62 = vcombine.low %v156_v56, %v160_v57  ;;  %v3311_v63 = vcombine.high %v164_v60, %v168_v61  ;;  %v256_v56 = vld [vmem:[#allocation2 + $0x638] sm:$0xff] }
 0x124   :  { %1816 = vmatpush1.bf16.msra.mxu1 %v3442_v1  ;;  %v176_v1 = vld [vmem:[#allocation2 + $0x3b8] sm:$0xff] }
 0x125   :  { %1817 = vmatprep.subr.bf16.mxu1 %v3451_v2  ;;  %v3310_v2 = vcombine.low %v164_v60, %v168_v61  ;;  %v3319_v4 = vcombine.high %v172_v0, %v176_v1  ;;  %v260_v61 = vld [vmem:[#allocation2 + $0x658] sm:$0xff] }
 0x128   :  { %1818 = vmatpush1.bf16.msra.mxu1 %v3450_v6  ;;  %v184_v6 = vld [vmem:[#allocation2 + $0x3f8] sm:$0xff] }
 0x129   :  { %1910 = vmatprep.subr.bf16.mxu1 %v3207_v8  ;;  %v3318_v8 = vcombine.low %v172_v0, %v176_v1  ;;  %v3327_v9 = vcombine.high %v180_v5, %v184_v6  ;;  %v268_v1 = vld [vmem:[#allocation2 + $0x698] sm:$0xff] }
 0x12b   :  { %1820 = vmatmul.mubr.bf16.vlgmr.msra.gmra.mrb[4].mxu1 %v4082_v11 }
 0x12c   :  { %1911 = vmatpush1.bf16.msra.mxu1 %v3206_v12  ;;  %1942 = vmatprep.mubr.bf16.mxu1 %v4064_v27  ;;  %v3247_v27 = vcombine.high %v100_v29, %v104_v30  ;;  %v192_v12 = vld [vmem:[#allocation2 + $0x438] sm:$0xff] }
 0x12d   :  { %1912 = vmatprep.subr.bf16.mxu1 %v3215_v20  ;;  %v3326_v20 = vcombine.low %v180_v5, %v184_v6  ;;  %v3335_v23 = vcombine.high %v188_v10, %v192_v12  ;;  %v220_v29 = vld [vmem:[#allocation2 + $0x518] sm:$0xff] }
 0x12e   :  { %v224_v30 = vld [vmem:[#allocation2 + $0x538] sm:$0xff] }
 0x12f   :  { %v276_v6 = vld [vmem:[#allocation2 + $0x6d8] sm:$0xff] }
 0x130   :  { %1913 = vmatpush1.bf16.msra.mxu1 %v3214_v16  ;;  %v3334_v16 = vcombine.low %v188_v10, %v192_v12 }
 0x131   :  { %1914 = vmatprep.subr.bf16.mxu1 %v3223_v17  ;;  %v3343_v17 = vcombine.high %v196_v13, %v200_v15 }
 0x134   :  { %1915 = vmatpush1.bf16.msra.mxu1 %v3222_v21  ;;  %v3342_v21 = vcombine.low %v196_v13, %v200_v15 }
 0x135   :  { %1916 = vmatprep.subr.bf16.mxu1 %v3231_v22  ;;  %v3351_v22 = vcombine.high %v204_v18, %v208_v19 }
 0x138   :  { %1917 = vmatpush1.bf16.msra.mxu1 %v3230_v26  ;;  %v3350_v26 = vcombine.low %v204_v18, %v208_v19 }
 0x139   :  { %1918 = vmatprep.subr.bf16.mxu1 %v3239_v28  ;;  %v3359_v28 = vcombine.high %v212_v24, %v216_v25 }
 0x13c   :  { %1919 = vmatpush1.bf16.msra.mxu1 %v3238_v31  ;;  %v3358_v31 = vcombine.low %v212_v24, %v216_v25  ;;  %v3727_v24 = vld [vmem:[#allocation5 + $0x100] ss:$8 sps:$4 sm:$0xff]  }
 0x13d   :  { %1920 = vmatprep.subr.bf16.mxu1 %v3247_v27  ;;  %v3367_v27 = vcombine.high %v220_v29, %v224_v30 }
 0x140   :  { %1921 = vmatpush1.bf16.msra.mxu1 %v3246_v34  ;;  %v4097_v34 = vld [vmem:[%s4197_s2] sm:$0xff] }
 0x141   :  { %1922 = vmatprep.subr.bf16.mxu1 %v3255_v35  ;;  %v321_v35 = vsub.s32 1, %v4051_v14 }
 0x143   :  { %v322_v40 = vrot.slane %v4097_v34, %v321_v35 }
 0x144   :  { %1923 = vmatpush1.bf16.msra.mxu1 %v3254_v38  ;;  %v240_v38 = vld [vmem:[#allocation2 + $0x5b8] sm:$0xff] }
 0x145   :  { %1924 = vmatprep.subr.bf16.mxu1 %v3263_v39  ;;  %v318_v39 = vrot.slane %v4097_v34, %v317_v33 }
 0x148   :  { %1925 = vmatpush1.bf16.msra.mxu1 %v3262_v42  ;;  %v3383_v42 = vcombine.high %v236_v37, %v240_v38 }
 0x149   :  { %1926 = vmatprep.subr.bf16.mxu1 %v3271_v43 }
 0x14c   :  { %1927 = vmatpush1.bf16.msra.mxu1 %v3270_v46 }
 0x14d   :  { %1928 = vmatprep.subr.bf16.mxu1 %v3279_v47 }
 0x150   :  { %1929 = vmatpush1.bf16.msra.mxu1 %v3278_v50  ;;  %v3382_v50 = vcombine.low %v236_v37, %v240_v38  ;;  %v3735_v37 = vld [vmem:[#allocation5 + $0x124] ss:$8 sps:$4 sm:$0xff]   ;;  %v300_v38 = vld [vmem:[#allocation2 + $0x798] sm:$0xff] }
 0x151   :  { %1930 = vmatprep.subr.bf16.mxu1 %v3287_v51 }
 0x154   :  { %1931 = vmatpush1.bf16.msra.mxu1 %v3286_v54 }
 0x155   :  { %1932 = vmatprep.subr.bf16.mxu1 %v3295_v55  ;;  %v252_v55 = vld [vmem:[#allocation2 + $0x618] sm:$0xff] }
 0x156   :  { %v3399_v60 = vcombine.high %v252_v55, %v256_v56 }
 0x158   :  { %1933 = vmatpush1.bf16.msra.mxu1 %v3294_v58 }
 0x159   :  { %1934 = vmatprep.subr.bf16.mxu1 %v3303_v59  ;;  %v3390_v59 = vcombine.low %v244_v44, %v248_v45  ;;  %v308_v44 = vld [vmem:[#allocation2 + $0x7d8] sm:$0xff] }
 0x15a   :  { %v312_v45 = vld [vmem:[#allocation2 + $0x7f8] sm:$0xff] }
 0x15c   :  { %1935 = vmatpush1.bf16.msra.mxu1 %v3302_v62  ;;  %v264_v62 = vld [vmem:[#allocation2 + $0x678] sm:$0xff] }
 0x15d   :  { %1936 = vmatprep.subr.bf16.mxu1 %v3311_v63  ;;  %v3398_v63 = vcombine.low %v252_v55, %v256_v56  ;;  %v3407_v0 = vcombine.high %v260_v61, %v264_v62  ;;  %v3745_v55 = vld [vmem:[#allocation5 + $0x160] ss:$8 sps:$4 sm:$0xff]   ;;  %v3750_v56 = vld [vmem:[#allocation5 + $0x174] ss:$8 sps:$4 sm:$0xff]  }
 0x160   :  { %1937 = vmatpush1.bf16.msra.mxu1 %v3310_v2  ;;  %v272_v2 = vld [vmem:[#allocation2 + $0x6b8] sm:$0xff] }
 0x161   :  { %1938 = vmatprep.subr.bf16.mxu1 %v3319_v4  ;;  %v3406_v4 = vcombine.low %v260_v61, %v264_v62  ;;  %v3415_v5 = vcombine.high %v268_v1, %v272_v2  ;;  %v3754_v61 = vld [vmem:[#allocation5 + $0x190] ss:$8 sps:$4 sm:$0xff]   ;;  %v3759_v62 = vld [vmem:[#allocation5 + $0x1a4] ss:$8 sps:$4 sm:$0xff]  }
 0x164   :  { %1939 = vmatpush1.bf16.msra.mxu1 %v3318_v8  ;;  %v280_v8 = vld [vmem:[#allocation2 + $0x6f8] sm:$0xff] }
 0x165   :  { %1940 = vmatprep.subr.bf16.mxu1 %v3327_v9  ;;  %v3423_v13 = vcombine.high %v276_v6, %v280_v8 }
 0x168   :  { %1941 = vmatpush1.bf16.msra.mxu1 %v3326_v20  ;;  %v3414_v20 = vcombine.low %v268_v1, %v272_v2  ;;  %v3765_v1 = vld [vmem:[#allocation5 + $0x1c4] ss:$8 sps:$4 sm:$0xff]   ;;  %v3763_v2 = vld [vmem:[#allocation5 + $0x1c0] ss:$8 sps:$4 sm:$0xff]  }
 0x169   :  { %1951 = vmatprep.subr.bf16.mxu1 %v3335_v23 }
 0x16b   :  { %1943 = vmatmul.mubr.bf16.vlgmr.msra.gmra.mrb[8].mxu1 %v4070_v3  ;;  %v232_v3 = vld [vmem:[#allocation2 + $0x578] sm:$0xff] }
 0x16c   :  { %1952 = vmatpush1.bf16.msra.mxu1 %v3334_v16  ;;  %1983 = vmatprep.mubr.bf16.mxu1 %v4074_v7  ;;  %v3366_v7 = vcombine.low %v220_v29, %v224_v30  ;;  %v3375_v36 = vcombine.high %v228_v32, %v232_v3  ;;  %v3374_v41 = vcombine.low %v228_v32, %v232_v3  ;;  %v284_v16 = vld [vmem:[#allocation2 + $0x718] sm:$0xff] }
 0x16d   :  { %1953 = vmatprep.subr.bf16.mxu1 %v3343_v17  ;;  %v288_v17 = vld [vmem:[#allocation2 + $0x738] sm:$0xff] }
 0x16e   :  { %v3732_v29 = vld [vmem:[#allocation5 + $0x114] ss:$8 sps:$4 sm:$0xff]   ;;  %v3430_v3 = vcombine.low %v284_v16, %v288_v17 }
 0x170   :  { %1954 = vmatpush1.bf16.msra.mxu1 %v3342_v21 }
 0x171   :  { %1955 = vmatprep.subr.bf16.mxu1 %v3351_v22  ;;  %v3422_v22 = vcombine.low %v276_v6, %v280_v8  ;;  %v3771_v6 = vld [vmem:[#allocation5 + $0x1e4] ss:$8 sps:$4 sm:$0xff]   ;;  %v3769_v8 = vld [vmem:[#allocation5 + $0x1e0] ss:$8 sps:$4 sm:$0xff]  }
 0x174   :  { %1956 = vmatpush1.bf16.msra.mxu1 %v3350_v26 }
 0x175   :  { %1957 = vmatprep.subr.bf16.mxu1 %v3359_v28  ;;  %v3431_v28 = vcombine.high %v284_v16, %v288_v17  ;;  %v329_v16 = vsub.s32 3, %v4051_v14 }
 0x178   :  { %1958 = vmatpush1.bf16.msra.mxu1 %v3358_v31  ;;  %v292_v31 = vld [vmem:[#allocation2 + $0x758] sm:$0xff] }
 0x179   :  { %1959 = vmatprep.subr.bf16.mxu1 %v3367_v27  ;;  %v296_v27 = vld [vmem:[#allocation2 + $0x778] sm:$0xff] }
 0x17c   :  { %1960 = vmatpush1.bf16.msra.mxu1 %v3366_v7  ;;  %v3730_v7 = vld [vmem:[#allocation5 + $0x110] ss:$8 sps:$4 sm:$0xff]  }
 0x17d   :  { %1961 = vmatprep.subr.bf16.mxu1 %v3375_v36  ;;  %v3439_v36 = vcombine.high %v292_v31, %v296_v27 }
 0x17e   :  { %v1739_v43 = vpop.f32.mrb[0].mxu1 }
 0x17f   :  { %v3633_v46 = vadd.f32 %v1739_v43, %v318_v39  ;;  %v1741_v47 = vpop.f32.mrb[1].mxu1  ;;  %v304_v39 = vld [vmem:[#allocation2 + $0x7b8] sm:$0xff] }
 0x180   :  { %v3634_v48 = vadd.f32 %v1741_v47, %v322_v40  ;;  %v1743_v49 = vpop.f32.mrb[2].mxu1  ;;  %1962 = vmatpush1.bf16.msra.mxu1 %v3374_v41  ;;  %v4106_v19 = vpop.f32.mrb[0].mxu0  ;;  %v3438_v40 = vcombine.low %v292_v31, %v296_v27  ;;  %v3733_v41 = vld [vmem:[#allocation5 + $0x120] ss:$8 sps:$4 sm:$0xff]   ;;  %v3738_v43 = vld [vmem:[#allocation5 + $0x134] ss:$8 sps:$4 sm:$0xff]  }
 0x181   :  { %v2000_v51 = vmin.f32 %v3633_v46, 0.0  ;;  %v1744_v52 = vpop.f32.mrb[3].mxu1  ;;  %1963 = vmatprep.subr.bf16.mxu1 %v3383_v42  ;;  %vm1992_vm0 = vcmp.gt.f32.partialorder %v3633_v46, 0.0  ;;  %v4108_v25 = vpop.f32.mrb[1].mxu0  ;;  %v3447_v42 = vcombine.high %v300_v38, %v304_v39  ;;  %v3736_v47 = vld [vmem:[#allocation5 + $0x130] ss:$8 sps:$4 sm:$0xff]  }
 0x182   :  { %v2001_v54 = vmin.f32 %v3634_v48, 0.0  ;;  %vm1993_vm1 = vcmp.gt.f32.partialorder %v3634_v48, 0.0  ;;  %v1907_v30 = vpop.f32.mrb[2].mxu0  ;;  %v3741_v49 = vld [vmem:[#allocation5 + $0x144] ss:$8 sps:$4 sm:$0xff]  }
 0x183   :  { %v2008_v57 = vmul.f32 1.442695, %v2000_v51  ;;  %v1908_v32 = vpop.f32.mrb[3].mxu0  ;;  %v3739_v51 = vld [vmem:[#allocation5 + $0x140] ss:$8 sps:$4 sm:$0xff]  }
 0x184   :  { %v2010_v58 = vmul.f32 1.442695, %v2001_v54  ;;  %1964 = vmatpush1.bf16.msra.mxu1 %v3382_v50  ;;  %v3454_v50 = vcombine.low %v308_v44, %v312_v45  ;;  %v3744_v52 = vld [vmem:[#allocation5 + $0x154] ss:$8 sps:$4 sm:$0xff]   ;;  %v3747_v54 = vld [vmem:[#allocation5 + $0x164] ss:$8 sps:$4 sm:$0xff]  }
 0x185   :  { %3887 = vpow2.f32 %v2008_v57  ;;  %1965 = vmatprep.subr.bf16.mxu1 %v3391_v53  ;;  %v3742_v53 = vld [vmem:[#allocation5 + $0x150] ss:$8 sps:$4 sm:$0xff]  }
 0x186   :  { %3889 = vpow2.f32 %v2010_v58  ;;  %v3748_v57 = vld [vmem:[#allocation5 + $0x170] ss:$8 sps:$4 sm:$0xff]   ;;  %v3753_v58 = vld [vmem:[#allocation5 + $0x184] ss:$8 sps:$4 sm:$0xff]  }
 0x188   :  { %1966 = vmatpush1.bf16.msra.mxu1 %v3390_v59  ;;  %v3751_v59 = vld [vmem:[#allocation5 + $0x180] ss:$8 sps:$4 sm:$0xff]  }
 0x189   :  { %1967 = vmatprep.subr.bf16.mxu1 %v3399_v60  ;;  %v3756_v60 = vld [vmem:[#allocation5 + $0x194] ss:$8 sps:$4 sm:$0xff]  }
 0x18c   :  { %1968 = vmatpush1.bf16.msra.mxu1 %v3398_v63  ;;  %v3757_v63 = vld [vmem:[#allocation5 + $0x1a0] ss:$8 sps:$4 sm:$0xff]  }
 0x18d   :  { %1969 = vmatprep.subr.bf16.mxu1 %v3407_v0  ;;  %v3760_v0 = vld [vmem:[#allocation5 + $0x1b0] ss:$8 sps:$4 sm:$0xff]  }
 0x18f   :  { %v3888_v9 = vpop.eup %3887 }
 0x190   :  { %v3890_v10 = vpop.eup %3889  ;;  %v3456_v12 = vadd.f32 -1.0, %v3888_v9  ;;  %1970 = vmatpush1.bf16.msra.mxu1 %v3406_v4  ;;  %v3768_v4 = vld [vmem:[#allocation5 + $0x1d4] ss:$8 sps:$4 sm:$0xff]  }
 0x191   :  { %1971 = vmatprep.subr.bf16.mxu1 %v3415_v5  ;;  %v3457_v23 = vadd.f32 -1.0, %v3890_v10  ;;  %v3766_v5 = vld [vmem:[#allocation5 + $0x1d0] ss:$8 sps:$4 sm:$0xff]   ;;  %v3774_v9 = vld [vmem:[#allocation5 + $0x1f4] ss:$8 sps:$4 sm:$0xff]  }
 0x192   :  { %v2032_v15 = vsel %vm1992_vm0, %v3633_v46, %v3456_v12  ;;  %v3446_v46 = vcombine.low %v300_v38, %v304_v39  ;;  %v3772_v10 = vld [vmem:[#allocation5 + $0x1f0] ss:$8 sps:$4 sm:$0xff]   ;;  %v3777_v12 = vld [vmem:[#allocation5 + $0x204] ss:$8 sps:$4 sm:$0xff]  }
 0x193   :  { %v2033_v18 = vsel %vm1993_vm1, %v3634_v48, %v3457_v23  ;;  %v2040_v26 = vpack.c.bf16 %v2032_v15, %v2032_v15  ;;  %v3455_v48 = vcombine.high %v308_v44, %v312_v45  ;;  %v325_v15 = vsub.s32 2, %v4051_v14  ;;  %v3775_v45 = vld [vmem:[#allocation5 + $0x200] ss:$8 sps:$4 sm:$0xff]  }
 0x194   :  { %1972 = vmatpush1.bf16.msra.mxu1 %v3414_v20  ;;  %v2041_v21 = vpack.c.bf16 %v2033_v18, %v2033_v18  ;;  %v337_v20 = vsub.s32 5, %v4051_v14 }
 0x195   :  { %1973 = vmatprep.subr.bf16.mxu1 %v3423_v13  ;;  %v326_v18 = vrot.slane %v4097_v34, %v325_v15  ;;  %v3808_v15 = vld [vmem:[#allocation5 + $0x2b0] ss:$8 sps:$4 sm:$0xff]  }
 0x196   :  { %2860 = vmatprep.mubr.bf16.mxu0 %v2041_v21  ;;  %v338_v23 = vrot.slane %v4097_v34, %v337_v20  ;;  %v330_v21 = vrot.slane %v4097_v34, %v329_v16  ;;  %v3805_v20 = vld [vmem:[#allocation5 + $0x2a0] ss:$8 sps:$4 sm:$0xff]   ;;  %v3813_v16 = vld [vmem:[#allocation5 + $0x2c4] ss:$8 sps:$4 sm:$0xff]  }
 0x197   :  { %2861 = vmatmul.mubr.bf16.vlgmr.msra.gmra.mrb[4].mxu0 %v2040_v26 }
 0x198   :  { %1974 = vmatpush1.bf16.msra.mxu1 %v3422_v22  ;;  %2870 = vmatpush1.bf16.msra.mxu0 %v3727_v24  ;;  %v3638_v13 = vadd.f32 %v4108_v25, %v338_v23 }
 0x199   :  { %1975 = vmatprep.subr.bf16.mxu1 %v3431_v28  ;;  %2871 = vmatprep.subr.bf16.mxu0 %v3732_v29 }
 0x19a   :  { %v2005_v17 = vmin.f32 %v3638_v13, 0.0  ;;  %vm1997_vm2 = vcmp.gt.f32.partialorder %v3638_v13, 0.0 }
 0x19c   :  { %1976 = vmatpush1.bf16.msra.mxu1 %v3430_v3  ;;  %2872 = vmatpush1.bf16.msra.mxu0 %v3730_v7  ;;  %v2018_v22 = vmul.f32 1.442695, %v2005_v17  ;;  %v3811_v17 = vld [vmem:[#allocation5 + $0x2c0] ss:$8 sps:$4 sm:$0xff]  }
 0x19d   :  { %1977 = vmatprep.subr.bf16.mxu1 %v3439_v36  ;;  %2873 = vmatprep.subr.bf16.mxu0 %v3735_v37 }
 0x19e   :  { %3891 = vpow2.f32 %v2018_v22 }
 0x1a0   :  { %1978 = vmatpush1.bf16.msra.mxu1 %v3438_v40  ;;  %2874 = vmatpush1.bf16.msra.mxu0 %v3733_v41 }
 0x1a1   :  { %1979 = vmatprep.subr.bf16.mxu1 %v3447_v42  ;;  %2875 = vmatprep.subr.bf16.mxu0 %v3738_v43 }
 0x1a4   :  { %1980 = vmatpush1.bf16.msra.mxu1 %v3446_v46  ;;  %2876 = vmatpush1.bf16.msra.mxu0 %v3736_v47  ;;  %v3780_v47 = vld [vmem:[#allocation5 + $0x214] ss:$8 sps:$4 sm:$0xff]  }
 0x1a5   :  { %1981 = vmatprep.subr.bf16.mxu1 %v3455_v48  ;;  %2877 = vmatprep.subr.bf16.mxu0 %v3741_v49  ;;  %v3871_v49 = vld [vmem:[%s4200_s5 + $0x40] sm:$0xff]  }
 0x1a8   :  { %1982 = vmatpush1.bf16.msra.mxu1 %v3454_v50  ;;  %2878 = vmatpush1.bf16.msra.mxu0 %v3739_v51  ;;  %v3892_v7 = vpop.eup %3891  ;;  %v3872_v50 = vld [vmem:[%s4200_s5] sm:$0xff]   ;;  %v3873_v51 = vld [vmem:[%s4200_s5 + $0x48] sm:$0xff]  }
 0x1a9   :  { %2879 = vmatprep.subr.bf16.mxu0 %v3744_v52  ;;  %v3461_v37 = vadd.f32 -1.0, %v3892_v7  ;;  %v3778_v52 = vld [vmem:[#allocation5 + $0x210] ss:$8 sps:$4 sm:$0xff]   ;;  %3611 = vmatprep.subr.bf16.mxu1 %v3871_v49  ;;  %v3831_v7 = vld [vmem:[#allocation5 + $0x324] ss:$8 sps:$4 sm:$0xff]  }
 0x1aa   :  { %v3852_v49 = vld [vmem:[#allocation5 + $0x394] ss:$8 sps:$4 sm:$0xff]  }
 0x1ab   :  { %1984 = vmatmul.mubr.bf16.vlgmr.msra.gmra.mrb[8].mxu1 %v4082_v11  ;;  %v3762_v11 = vld [vmem:[#allocation5 + $0x1b4] ss:$8 sps:$4 sm:$0xff]   ;;  %v2037_v43 = vsel %vm1997_vm2, %v3638_v13, %v3461_v37 }
 0x1ac   :  { %2880 = vmatpush1.bf16.msra.mxu0 %v3742_v53  ;;  %v2045_v48 = vpack.c.bf16 %v2037_v43, %v2037_v43  ;;  %v3783_v53 = vld [vmem:[#allocation5 + $0x224] ss:$8 sps:$4 sm:$0xff]   ;;  %3612 = vmatpush3.bf16.msra.mxu1 %v3872_v50  ;;  %v3810_v13 = vld [vmem:[#allocation5 + $0x2b4] ss:$8 sps:$4 sm:$0xff]   ;;  %v341_v50 = vsub.s32 6, %v4051_v14 }
 0x1ad   :  { %2881 = vmatprep.subr.bf16.mxu0 %v3747_v54  ;;  %v3874_v54 = vld [vmem:[%s4200_s5 + $0x8] sm:$0xff]   ;;  %3613 = vmatprep.subr.bf16.mxu1 %v3873_v51  ;;  %v3834_v37 = vld [vmem:[#allocation5 + $0x334] ss:$8 sps:$4 sm:$0xff]   ;;  %v3850_v51 = vld [vmem:[#allocation5 + $0x390] ss:$8 sps:$4 sm:$0xff]  }
 0x1ae   :  { %v3843_v43 = vld [vmem:[#allocation5 + $0x364] ss:$8 sps:$4 sm:$0xff]  }
 0x1b0   :  { %2882 = vmatpush1.bf16.msra.mxu0 %v3745_v55  ;;  %v3781_v55 = vld [vmem:[#allocation5 + $0x220] ss:$8 sps:$4 sm:$0xff]   ;;  %3614 = vmatpush3.bf16.msra.mxu1 %v3874_v54  ;;  %v342_v54 = vrot.slane %v4097_v34, %v341_v50 }
 0x1b1   :  { %2883 = vmatprep.subr.bf16.mxu0 %v3750_v56  ;;  %v3786_v56 = vld [vmem:[#allocation5 + $0x234] ss:$8 sps:$4 sm:$0xff]  }
 0x1b4   :  { %2884 = vmatpush1.bf16.msra.mxu0 %v3748_v57  ;;  %v3784_v57 = vld [vmem:[#allocation5 + $0x230] ss:$8 sps:$4 sm:$0xff]  }
 0x1b5   :  { %2885 = vmatprep.subr.bf16.mxu0 %v3753_v58  ;;  %v3789_v58 = vld [vmem:[#allocation5 + $0x244] ss:$8 sps:$4 sm:$0xff]  }
 0x1b8   :  { %2886 = vmatpush1.bf16.msra.mxu0 %v3751_v59  ;;  %v3787_v59 = vld [vmem:[#allocation5 + $0x240] ss:$8 sps:$4 sm:$0xff]  }
 0x1b9   :  { %2887 = vmatprep.subr.bf16.mxu0 %v3756_v60  ;;  %v3792_v60 = vld [vmem:[#allocation5 + $0x254] ss:$8 sps:$4 sm:$0xff]  }
 0x1bc   :  { %2888 = vmatpush1.bf16.msra.mxu0 %v3754_v61  ;;  %v3790_v61 = vld [vmem:[#allocation5 + $0x250] ss:$8 sps:$4 sm:$0xff]  }
 0x1bd   :  { %2889 = vmatprep.subr.bf16.mxu0 %v3759_v62  ;;  %v3795_v62 = vld [vmem:[#allocation5 + $0x264] ss:$8 sps:$4 sm:$0xff]  }
 0x1c0   :  { %2890 = vmatpush1.bf16.msra.mxu0 %v3757_v63  ;;  %v3793_v63 = vld [vmem:[#allocation5 + $0x260] ss:$8 sps:$4 sm:$0xff]  }
 0x1c1   :  { %2891 = vmatprep.subr.bf16.mxu0 %v3762_v11  ;;  %v333_v11 = vsub.s32 4, %v4051_v14 }
 0x1c4   :  { %2892 = vmatpush1.bf16.msra.mxu0 %v3760_v0  ;;  %v3798_v0 = vld [vmem:[#allocation5 + $0x274] ss:$8 sps:$4 sm:$0xff]  }
 0x1c5   :  { %2893 = vmatprep.subr.bf16.mxu0 %v3765_v1  ;;  %v3796_v1 = vld [vmem:[#allocation5 + $0x270] ss:$8 sps:$4 sm:$0xff]  }
 0x1c8   :  { %2894 = vmatpush1.bf16.msra.mxu0 %v3763_v2  ;;  %v334_v2 = vrot.slane %v4097_v34, %v333_v11 }
 0x1c9   :  { %2895 = vmatprep.subr.bf16.mxu0 %v3768_v4  ;;  %v3801_v4 = vld [vmem:[#allocation5 + $0x284] ss:$8 sps:$4 sm:$0xff]  }
 0x1cc   :  { %2896 = vmatpush1.bf16.msra.mxu0 %v3766_v5  ;;  %v3799_v5 = vld [vmem:[#allocation5 + $0x280] ss:$8 sps:$4 sm:$0xff]  }
 0x1cd   :  { %2897 = vmatprep.subr.bf16.mxu0 %v3771_v6  ;;  %v3637_v6 = vadd.f32 %v4106_v19, %v334_v2  ;;  %v3816_v19 = vld [vmem:[#allocation5 + $0x2d4] ss:$8 sps:$4 sm:$0xff]  }
 0x1cf   :  { %vm1996_vm5 = vcmp.gt.f32.partialorder %v3637_v6, 0.0 }
 0x1d0   :  { %2898 = vmatpush1.bf16.msra.mxu0 %v3769_v8  ;;  %v3804_v8 = vld [vmem:[#allocation5 + $0x294] ss:$8 sps:$4 sm:$0xff]  }
 0x1d1   :  { %2899 = vmatprep.subr.bf16.mxu0 %v3774_v9  ;;  %v3802_v9 = vld [vmem:[#allocation5 + $0x290] ss:$8 sps:$4 sm:$0xff]  }
 0x1d4   :  { %2900 = vmatpush1.bf16.msra.mxu0 %v3772_v10  ;;  %v2004_v10 = vmin.f32 %v3637_v6, 0.0 }
 0x1d5   :  { %2910 = vmatprep.subr.bf16.mxu0 %v3777_v12  ;;  %v3807_v12 = vld [vmem:[#allocation5 + $0x2a4] ss:$8 sps:$4 sm:$0xff]  }
 0x1d6   :  { %v2016_v23 = vmul.f32 1.442695, %v2004_v10  ;;  %v3865_v10 = vld [vmem:[#allocation5 + $0x3e0] ss:$8 sps:$4 sm:$0xff]  }
 0x1fe   :  { %v1821_v24 = vpop.f32.mrb[4].mxu1 }
 0x1ff   :  { %v3635_v26 = vadd.f32 %v1821_v24, %v326_v18  ;;  %v1823_v28 = vpop.f32.mrb[5].mxu1  ;;  %v3814_v18 = vld [vmem:[#allocation5 + $0x2d0] ss:$8 sps:$4 sm:$0xff]   ;;  %v3817_v24 = vld [vmem:[#allocation5 + $0x2e0] ss:$8 sps:$4 sm:$0xff]  }
 0x200   :  { %v3636_v29 = vadd.f32 %v1823_v28, %v330_v21  ;;  %v1825_v30 = vpop.f32.mrb[6].mxu1  ;;  %v3819_v21 = vld [vmem:[#allocation5 + $0x2e4] ss:$8 sps:$4 sm:$0xff]  }
 0x201   :  { %v2002_v31 = vmin.f32 %v3635_v26, 0.0  ;;  %v1826_v27 = vpop.f32.mrb[7].mxu1  ;;  %vm1994_vm3 = vcmp.gt.f32.partialorder %v3635_v26, 0.0  ;;  %v3825_v30 = vld [vmem:[#allocation5 + $0x304] ss:$8 sps:$4 sm:$0xff]  }
 0x202   :  { %v2003_v32 = vmin.f32 %v3636_v29, 0.0  ;;  %vm1995_vm4 = vcmp.gt.f32.partialorder %v3636_v29, 0.0  ;;  %v3823_v27 = vld [vmem:[#allocation5 + $0x300] ss:$8 sps:$4 sm:$0xff]  }
 0x203   :  { %v2012_v25 = vmul.f32 1.442695, %v2002_v31 }
 0x204   :  { %v2014_v3 = vmul.f32 1.442695, %v2003_v32 }
 0x205   :  { %3893 = vpow2.f32 %v2012_v25  ;;  %v3828_v25 = vld [vmem:[#allocation5 + $0x314] ss:$8 sps:$4 sm:$0xff]  }
 0x206   :  { %3895 = vpow2.f32 %v2014_v3  ;;  %v3826_v3 = vld [vmem:[#allocation5 + $0x310] ss:$8 sps:$4 sm:$0xff]  }
 0x207   :  { %3897 = vpow2.f32 %v2016_v23 }
 0x20f   :  { %v3894_v36 = vpop.eup %3893 }
 0x210   :  { %v3896_v38 = vpop.eup %3895  ;;  %v3458_v39 = vadd.f32 -1.0, %v3894_v36  ;;  %v3829_v36 = vld [vmem:[#allocation5 + $0x320] ss:$8 sps:$4 sm:$0xff]  }
 0x211   :  { %v3459_v40 = vadd.f32 -1.0, %v3896_v38  ;;  %v3898_v22 = vpop.eup %3897  ;;  %v3832_v38 = vld [vmem:[#allocation5 + $0x330] ss:$8 sps:$4 sm:$0xff]  }
 0x212   :  { %v2034_v41 = vsel %vm1994_vm3, %v3635_v26, %v3458_v39  ;;  %v3822_v26 = vld [vmem:[#allocation5 + $0x2f4] ss:$8 sps:$4 sm:$0xff]   ;;  %v3460_v28 = vadd.f32 -1.0, %v3898_v22  ;;  %v3837_v39 = vld [vmem:[#allocation5 + $0x344] ss:$8 sps:$4 sm:$0xff]  }
 0x213   :  { %v2035_v42 = vsel %vm1995_vm4, %v3636_v29, %v3459_v40  ;;  %v2042_v46 = vpack.c.bf16 %v2034_v41, %v2034_v41  ;;  %v3820_v29 = vld [vmem:[#allocation5 + $0x2f0] ss:$8 sps:$4 sm:$0xff]   ;;  %v3835_v40 = vld [vmem:[#allocation5 + $0x340] ss:$8 sps:$4 sm:$0xff]   ;;  %v3840_v41 = vld [vmem:[#allocation5 + $0x354] ss:$8 sps:$4 sm:$0xff]  }
 0x214   :  { %v2043_v44 = vpack.c.bf16 %v2035_v42, %v2035_v42  ;;  %v2036_v31 = vsel %vm1996_vm5, %v3637_v6, %v3460_v28  ;;  %v3838_v42 = vld [vmem:[#allocation5 + $0x350] ss:$8 sps:$4 sm:$0xff]   ;;  %v3859_v6 = vld [vmem:[#allocation5 + $0x3c0] ss:$8 sps:$4 sm:$0xff]  }
 0x215   :  { %v2044_v32 = vpack.c.bf16 %v2036_v31, %v2036_v31  ;;  %v3875_v22 = vld [vmem:[%s4200_s5 + $0x50] sm:$0xff]   ;;  %v3878_v28 = vld [vmem:[%s4200_s5 + $0x18] sm:$0xff]   ;;  %v3881_v31 = vld [vmem:[%s4200_s5 + $0x68] sm:$0xff]  }
 0x216   :  { %2901 = vmatprep.mubr.bf16.mxu0 %v2043_v44  ;;  %v3841_v44 = vld [vmem:[#allocation5 + $0x360] ss:$8 sps:$4 sm:$0xff]   ;;  %3615 = vmatprep.subr.bf16.mxu1 %v3875_v22 }
 0x217   :  { %2902 = vmatmul.mubr.bf16.vlgmr.msra.gmra.mrb[4].mxu0 %v2042_v46  ;;  %v3844_v46 = vld [vmem:[#allocation5 + $0x370] ss:$8 sps:$4 sm:$0xff]  }
 0x218   :  { %2911 = vmatpush1.bf16.msra.mxu0 %v3775_v45  ;;  %2942 = vmatprep.mubr.bf16.mxu0 %v2045_v48  ;;  %v3846_v45 = vld [vmem:[#allocation5 + $0x374] ss:$8 sps:$4 sm:$0xff]   ;;  %v3847_v48 = vld [vmem:[#allocation5 + $0x380] ss:$8 sps:$4 sm:$0xff]  }
 0x219   :  { %2912 = vmatprep.subr.bf16.mxu0 %v3780_v47  ;;  %v3849_v47 = vld [vmem:[#allocation5 + $0x384] ss:$8 sps:$4 sm:$0xff]  }
 0x21c   :  { %2913 = vmatpush1.bf16.msra.mxu0 %v3778_v52  ;;  %v345_v52 = vsub.s32 7, %v4051_v14 }
 0x21d   :  { %2914 = vmatprep.subr.bf16.mxu0 %v3783_v53  ;;  %v3855_v53 = vld [vmem:[#allocation5 + $0x3a4] ss:$8 sps:$4 sm:$0xff]  }
 0x220   :  { %2915 = vmatpush1.bf16.msra.mxu0 %v3781_v55  ;;  %v346_v55 = vrot.slane %v4097_v34, %v345_v52  ;;  %v3864_v34 = vld [vmem:[#allocation5 + $0x3d4] ss:$8 sps:$4 sm:$0xff]  }
 0x221   :  { %2916 = vmatprep.subr.bf16.mxu0 %v3786_v56  ;;  %v3853_v56 = vld [vmem:[#allocation5 + $0x3a0] ss:$8 sps:$4 sm:$0xff]  }
 0x224   :  { %2917 = vmatpush1.bf16.msra.mxu0 %v3784_v57  ;;  %v3858_v57 = vld [vmem:[#allocation5 + $0x3b4] ss:$8 sps:$4 sm:$0xff]  }
 0x225   :  { %2918 = vmatprep.subr.bf16.mxu0 %v3789_v58 }
 0x228   :  { %2919 = vmatpush1.bf16.msra.mxu0 %v3787_v59 }
 0x229   :  { %2920 = vmatprep.subr.bf16.mxu0 %v3792_v60 }
 0x22c   :  { %2921 = vmatpush1.bf16.msra.mxu0 %v3790_v61 }
 0x22d   :  { %2922 = vmatprep.subr.bf16.mxu0 %v3795_v62 }
 0x230   :  { %2923 = vmatpush1.bf16.msra.mxu0 %v3793_v63  ;;  %v3856_v63 = vld [vmem:[#allocation5 + $0x3b0] ss:$8 sps:$4 sm:$0xff]  }
 0x231   :  { %2924 = vmatprep.subr.bf16.mxu0 %v3798_v0 }
 0x234   :  { %2925 = vmatpush1.bf16.msra.mxu0 %v3796_v1  ;;  %v3861_v1 = vld [vmem:[#allocation5 + $0x3c4] ss:$8 sps:$4 sm:$0xff]  }
 0x235   :  { %2926 = vmatprep.subr.bf16.mxu0 %v3801_v4 }
 0x238   :  { %2927 = vmatpush1.bf16.msra.mxu0 %v3799_v5 }
 0x239   :  { %2928 = vmatprep.subr.bf16.mxu0 %v3804_v8  ;;  %v3862_v8 = vld [vmem:[#allocation5 + $0x3d0] ss:$8 sps:$4 sm:$0xff]  }
 0x23c   :  { %2929 = vmatpush1.bf16.msra.mxu0 %v3802_v9  ;;  %v3867_v9 = vld [vmem:[#allocation5 + $0x3e4] ss:$8 sps:$4 sm:$0xff]  }
 0x23d   :  { %2930 = vmatprep.subr.bf16.mxu0 %v3807_v12  ;;  %v3870_v12 = vld [vmem:[#allocation5 + $0x3f4] ss:$8 sps:$4 sm:$0xff]  }
 0x240   :  { %2931 = vmatpush1.bf16.msra.mxu0 %v3805_v20 }
 0x241   :  { %2932 = vmatprep.subr.bf16.mxu0 %v3810_v13 }
 0x244   :  { %2933 = vmatpush1.bf16.msra.mxu0 %v3808_v15  ;;  %v3868_v15 = vld [vmem:[#allocation5 + $0x3f0] ss:$8 sps:$4 sm:$0xff]  }
 0x245   :  { %2934 = vmatprep.subr.bf16.mxu0 %v3813_v16 }
 0x248   :  { %2935 = vmatpush1.bf16.msra.mxu0 %v3811_v17 }
 0x249   :  { %2936 = vmatprep.subr.bf16.mxu0 %v3816_v19 }
 0x24c   :  { %2937 = vmatpush1.bf16.msra.mxu0 %v3814_v18 }
 0x24d   :  { %2938 = vmatprep.subr.bf16.mxu0 %v3819_v21 }
 0x250   :  { %2939 = vmatpush1.bf16.msra.mxu0 %v3817_v24  ;;  %v3876_v24 = vld [vmem:[%s4200_s5 + $0x10] sm:$0xff]  }
 0x251   :  { %2940 = vmatprep.subr.bf16.mxu0 %v3822_v26  ;;  %3616 = vmatpush3.bf16.msra.mxu1 %v3876_v24  ;;  %v3877_v26 = vld [vmem:[%s4200_s5 + $0x58] sm:$0xff]  }
 0x252   :  { %3617 = vmatprep.subr.bf16.mxu1 %v3877_v26 }
 0x254   :  { %2941 = vmatpush1.bf16.msra.mxu0 %v3820_v29  ;;  %v3879_v29 = vld [vmem:[%s4200_s5 + $0x60] sm:$0xff]  }
 0x255   :  { %2951 = vmatprep.subr.bf16.mxu0 %v3825_v30  ;;  %3618 = vmatpush3.bf16.msra.mxu1 %v3878_v28  ;;  %v3880_v30 = vld [vmem:[%s4200_s5 + $0x20] sm:$0xff]  }
 0x256   :  { %3619 = vmatprep.subr.bf16.mxu1 %v3879_v29 }
 0x257   :  { %2943 = vmatmul.mubr.bf16.vlgmr.msra.gmra.mrb[4].mxu0 %v2044_v32  ;;  %v3883_v32 = vld [vmem:[%s4200_s5 + $0x70] sm:$0xff]  }
 0x258   :  { %2952 = vmatpush1.bf16.msra.mxu0 %v3823_v27  ;;  %v3882_v27 = vld [vmem:[%s4200_s5 + $0x28] sm:$0xff]  }
 0x259   :  { %2953 = vmatprep.subr.bf16.mxu0 %v3828_v25  ;;  %3620 = vmatpush3.bf16.msra.mxu1 %v3880_v30  ;;  %v3884_v25 = vld [vmem:[%s4200_s5 + $0x30] sm:$0xff]  }
 0x25a   :  { %3621 = vmatprep.subr.bf16.mxu1 %v3881_v31 }
 0x25c   :  { %2954 = vmatpush1.bf16.msra.mxu0 %v3826_v3  ;;  %v3885_v3 = vld [vmem:[%s4200_s5 + $0x78] sm:$0xff]  }
 0x25d   :  { %2955 = vmatprep.subr.bf16.mxu0 %v3831_v7  ;;  %3622 = vmatpush3.bf16.msra.mxu1 %v3882_v27  ;;  %v3886_v7 = vld [vmem:[%s4200_s5 + $0x38] sm:$0xff]  }
 0x25e   :  { %3623 = vmatprep.subr.bf16.mxu1 %v3883_v32 }
 0x260   :  { %2956 = vmatpush1.bf16.msra.mxu0 %v3829_v36  ;;  %v2176_v36 = vld [vmem:[%s4199_s4] sm:$0x3] }
 0x261   :  { %2957 = vmatprep.subr.bf16.mxu0 %v3834_v37  ;;  %3624 = vmatpush3.bf16.msra.mxu1 %v3884_v25  ;;  %v2181_v37 = vrot.slane %v2176_v36, %v317_v33 }
 0x262   :  { %3625 = vmatprep.subr.bf16.mxu1 %v3885_v3 }
 0x264   :  { %2958 = vmatpush1.bf16.msra.mxu0 %v3832_v38  ;;  %v2185_v38 = vrot.slane %v2176_v36, %v321_v35 }
 0x265   :  { %2959 = vmatprep.subr.bf16.mxu0 %v3837_v39  ;;  %3626 = vmatpush3.bf16.msra.mxu1 %v3886_v7 }
 0x268   :  { %2960 = vmatpush1.bf16.msra.mxu0 %v3835_v40 }
 0x269   :  { %2961 = vmatprep.subr.bf16.mxu0 %v3840_v41 }
 0x26c   :  { %2962 = vmatpush1.bf16.msra.mxu0 %v3838_v42 }
 0x26d   :  { %2963 = vmatprep.subr.bf16.mxu0 %v3843_v43 }
 0x270   :  { %2964 = vmatpush1.bf16.msra.mxu0 %v3841_v44 }
 0x271   :  { %2965 = vmatprep.subr.bf16.mxu0 %v3846_v45 }
 0x274   :  { %2966 = vmatpush1.bf16.msra.mxu0 %v3844_v46 }
 0x275   :  { %2967 = vmatprep.subr.bf16.mxu0 %v3849_v47 }
 0x278   :  { %2968 = vmatpush1.bf16.msra.mxu0 %v3847_v48 }
 0x279   :  { %2969 = vmatprep.subr.bf16.mxu0 %v3852_v49 }
 0x27c   :  { %2970 = vmatpush1.bf16.msra.mxu0 %v3850_v51 }
 0x27d   :  { %2971 = vmatprep.subr.bf16.mxu0 %v3855_v53 }
 0x27e   :  { %v1985_v58 = vpop.f32.mrb[8].mxu1 }
 0x27f   :  { %v3639_v59 = vadd.f32 %v1985_v58, %v342_v54  ;;  %v1987_v60 = vpop.f32.mrb[9].mxu1 }
 0x280   :  { %v3640_v61 = vadd.f32 %v1987_v60, %v346_v55  ;;  %v1989_v62 = vpop.f32.mrb[10].mxu1  ;;  %2972 = vmatpush1.bf16.msra.mxu0 %v3853_v56  ;;  %v3594_v55 = vld [vmem:[%s4201_s6] ss:$0 sm:$0xff] }
 0x281   :  { %v2006_v11 = vmin.f32 %v3639_v59, 0.0  ;;  %v1990_v0 = vpop.f32.mrb[11].mxu1  ;;  %2973 = vmatprep.subr.bf16.mxu0 %v3858_v57  ;;  %vm1998_vm6 = vcmp.gt.f32.partialorder %v3639_v59, 0.0 }
 0x282   :  { %v2007_v2 = vmin.f32 %v3640_v61, 0.0  ;;  %vm1999_vm7 = vcmp.gt.f32.partialorder %v3640_v61, 0.0 }
 0x283   :  { %v2020_v4 = vmul.f32 1.442695, %v2006_v11 }
 0x284   :  { %v2022_v5 = vmul.f32 1.442695, %v2007_v2  ;;  %2974 = vmatpush1.bf16.msra.mxu0 %v3856_v63 }
 0x285   :  { %3899 = vpow2.f32 %v2020_v4  ;;  %2975 = vmatprep.subr.bf16.mxu0 %v3861_v1 }
 0x286   :  { %3901 = vpow2.f32 %v2022_v5 }
 0x288   :  { %2976 = vmatpush1.bf16.msra.mxu0 %v3859_v6 }
 0x289   :  { %2977 = vmatprep.subr.bf16.mxu0 %v3864_v34 }
 0x28c   :  { %2978 = vmatpush1.bf16.msra.mxu0 %v3862_v8 }
 0x28d   :  { %2979 = vmatprep.subr.bf16.mxu0 %v3867_v9 }
 0x28f   :  { %v3900_v20 = vpop.eup %3899 }
 0x290   :  { %v3902_v23 = vpop.eup %3901  ;;  %v3462_v13 = vadd.f32 -1.0, %v3900_v20  ;;  %2980 = vmatpush1.bf16.msra.mxu0 %v3865_v10 }
 0x291   :  { %2981 = vmatprep.subr.bf16.mxu0 %v3870_v12  ;;  %v3463_v16 = vadd.f32 -1.0, %v3902_v23 }
 0x292   :  { %v2038_v17 = vsel %vm1998_vm6, %v3639_v59, %v3462_v13 }
 0x293   :  { %v2039_v19 = vsel %vm1999_vm7, %v3640_v61, %v3463_v16  ;;  %v2046_v21 = vpack.c.bf16 %v2038_v17, %v2038_v17 }
 0x294   :  { %2982 = vmatpush1.bf16.msra.mxu0 %v3868_v15  ;;  %v2047_v18 = vpack.c.bf16 %v2039_v19, %v2039_v19 }
 0x296   :  { %2983 = vmatprep.mubr.bf16.mxu0 %v2047_v18 }
 0x297   :  { %2984 = vmatmul.mubr.bf16.vlgmr.msra.gmra.mrb[4].mxu0 %v2046_v21 }
 0x36a   :  { %v2985_v39 = vpop.f32.mrb[4].mxu0 }
 0x36b   :  { %v3641_v40 = vadd.f32 %v2985_v39, %v2181_v37  ;;  %v2987_v41 = vpop.f32.mrb[5].mxu0 }
 0x36c   :  { %v3642_v42 = vadd.f32 %v2987_v41, %v2185_v38  ;;  %v2989_v43 = vpop.f32.mrb[6].mxu0 }
 0x36d   :  { %v2994_v44 = vmin.f32 %v3641_v40, 0.0  ;;  %v2990_v45 = vpop.f32.mrb[7].mxu0  ;;  %vm2992_vm8 = vcmp.gt.f32.partialorder %v3641_v40, 0.0 }
 0x36e   :  { %v2995_v46 = vmin.f32 %v3642_v42, 0.0  ;;  %vm2993_vm9 = vcmp.gt.f32.partialorder %v3642_v42, 0.0 }
 0x36f   :  { %v2996_v47 = vmul.f32 1.442695, %v2994_v44 }
 0x370   :  { %v2998_v48 = vmul.f32 1.442695, %v2995_v46 }
 0x371   :  { %3903 = vpow2.f32 %v2996_v47 }
 0x372   :  { %3905 = vpow2.f32 %v2998_v48 }
 0x37b   :  { %v3904_v49 = vpop.eup %3903 }
 0x37c   :  { %v3906_v50 = vpop.eup %3905  ;;  %v3592_v51 = vadd.f32 -1.0, %v3904_v49 }
 0x37d   :  { %v3593_v33 = vadd.f32 -1.0, %v3906_v50 }
 0x37e   :  { %v3002_v52 = vsel %vm2992_vm8, %v3641_v40, %v3592_v51 }
 0x37f   :  { %v3003_v14 = vsel %vm2993_vm9, %v3642_v42, %v3593_v33  ;;  %v3004_v53 = vpack.c.bf16 %v3002_v52, %v3002_v52 }
 0x380   :  { %v3005_v35 = vpack.c.bf16 %v3003_v14, %v3003_v14 }
 0x382   :  { %3173 = vmatprep.mubr.bf16.mxu1 %v3005_v35 }
 0x383   :  { %3174 = vmatmul.mubr.bf16.vlgmr.msra.gmra.mrb[12].mxu1 %v3004_v53 }
 0x456   :  { %v3627_v54 = vpop.f32.mrb[12].mxu1 }
 0x457   :  { %v3628_v56 = vpop.f32.mrb[13].mxu1 }
 0x458   :  { %v3629_v57 = vadd.f32 %v3628_v56, %v3627_v54  ;;  %v3630_v58 = vpop.f32.mrb[14].mxu1 }
 0x459   :  { %v3631_v59 = vpop.f32.mrb[15].mxu1 }
 0x45a   :  { %v3176_v60 = vadd.f32 %v3629_v57, %v3594_v55 }
 0x45c   :  { %3182 = vst.msk [vmem:[#allocation7] sm:$0x3] %vm3181_vm10, %v3176_v60 }
 0x45d   :  { %3962 = shalt.err (!%p3959_p6)
}
 0x45e   :  { %s3963_s6 = scalar_lea.hbm %s4202_s7, 32 }
 0x45f   :  { %p3964_p7 = scmp.ne.s32.totalorder %s4202_s7, %s3963_s6  ;;  %p3967_p8 = scmp.lt.u32.totalorder %s3963_s6, %s4202_s7 }
 0x461   :  { %p3969_p9 = pnand %p3967_p8, %p3964_p7 }
 0x463   :  { %3972 = shalt.err (!%p3969_p9)
}
 0x464   :  { %3192 = dma.vmem_to_hbm [thread:$0]  %s3190_s14, 32, %s4202_s7, [#allocation4]  }
 0x465   :  { %3977 = dma.done.wait [#allocation4], 32  }
 0x466   :  { %3978 = vsyncadd [#allocation4], 4294967264 }
 0x467   :  { %3196 = vsyncpa [#allocation3], 1 }
 0x468   :  { %3197 = vsyncpa [#allocation6], 1 }
 0x469   :  { %3198 = vsyncpa [#allocation4], 1 }

// kernel: tpu_custom_call.1
= control target key start
LH: loop header
LB: loop body
LE: loop exit
PB: predicated region body
PF: predicated region fallthrough
CT: control target
= control target key end

     0   :  { %12 = vsyncpa [#allocation3], 0  ;;  %s4195_s0 = inlined_call_operand.vmem [shape: bf16[2,512], index: 0, kind: input, shape index: {}]   ;;  %s4196_s1 = inlined_call_operand.hbm [shape: bf16[512,1024], index: 1, kind: input, shape index: {}]   ;;  %s4197_s2 = inlined_call_operand.vmem [shape: f32[1,1024], index: 2, kind: input, shape index: {}]   ;;  %s4198_s3 = inlined_call_operand.hbm [shape: bf16[1024,256], index: 3, kind: input, shape index: {}]   ;;  %s4199_s4 = inlined_call_operand.vmem [shape: f32[1,256], index: 4, kind: input, shape index: {}]   ;;  %s4200_s5 = inlined_call_operand.vmem [shape: bf16[256,4], index: 5, kind: input, shape index: {}]   ;;  %s4201_s6 = inlined_call_operand.vmem [shape: f32[1,4], index: 6, kind: input, shape index: {}]   ;;  %s4202_s7 = inlined_call_operand.hbm [shape: f32[2,4], index: 7, kind: output, shape index: {}]  }
   0x1   :  { %13 = vsyncpa [#allocation6], 0 }
   0x2   :  { %14 = vsyncpa [#allocation4], 0  ;;  %s3979_s24 = smov [#allocation2]   ;;  %s3907_s28 = scalar_lea.hbm %s4196_s1, 32768 }
   0x3   :  { %s22_s25 = sshll.u32 %s3979_s24, 4  ;;  %p3908_p0 = scmp.ne.s32.totalorder %s4196_s1, %s3907_s28  ;;  %s23_s25 = int_to_ptr.vmem [resolvable:$true] %s22_s25 }
   0x4   :  { %p3911_p1 = scmp.lt.u32.totalorder %s3907_s28, %s4196_s1 }
   0x6   :  { %p3913_p2 = pnand %p3911_p1, %p3908_p0 }
   0x8   :  { %3916 = shalt.err (!%p3913_p2)
}
   0x9   :  { %s3917_s10 = scalar_lea.vmem %s23_s25, 32768  ;;  %p3922_p4 = scmp.lt.s32.totalorder %s23_s25, %s23_s25 }
   0xa   :  { %p3918_p3 = scmp.ne.s32.totalorder %s23_s25, %s3917_s10  ;;  %p3923_p5 = scmp.lt.s32.totalorder %s3917_s10, %s3917_s10 }
   0xc   :  { %p3924_p6 = por %p3923_p5, %p3922_p4 }
   0xe   :  { %p3925_p7 = pnand %p3924_p6, %p3918_p3 }
  0x10   :  { %3928 = shalt.err (!%p3925_p7)
}
  0x11   :  { %s3980_s11 = smov 512   ;;  %s3981_s12 = smov 32  }
  0x12   :  { %28 = dma.hbm_to_vmem [thread:$0]  %s4196_s1, 32768, %s23_s25, [#allocation3], %s3980_s11, %s3980_s11, %s3981_s12  }
  0x13   :  { %s3982_s15 = smov [#allocation5]   ;;  %s3929_s19 = scalar_lea.hbm %s4198_s3, 16384 }
  0x14   :  { %s36_s16 = sshll.u32 %s3982_s15, 4  ;;  %p3930_p8 = scmp.ne.s32.totalorder %s4198_s3, %s3929_s19  ;;  %s37_s16 = int_to_ptr.vmem [resolvable:$true] %s36_s16 }
  0x15   :  { %p3933_p9 = scmp.lt.u32.totalorder %s3929_s19, %s4198_s3 }
  0x17   :  { %p3935_p10 = pnand %p3933_p9, %p3930_p8 }
  0x19   :  { %3938 = shalt.err (!%p3935_p10)
}
  0x1a   :  { %s3939_s24 = scalar_lea.vmem %s37_s16, 16384  ;;  %p3944_p12 = scmp.lt.s32.totalorder %s37_s16, %s37_s16 }
  0x1b   :  { %p3940_p11 = scmp.ne.s32.totalorder %s37_s16, %s3939_s24  ;;  %p3945_p13 = scmp.lt.s32.totalorder %s3939_s24, %s3939_s24 }
  0x1d   :  { %p3946_p0 = por %p3945_p13, %p3944_p12 }
  0x1f   :  { %p3947_p1 = pnand %p3946_p0, %p3940_p11 }
  0x21   :  { %3950 = shalt.err (!%p3947_p1)
}
  0x22   :  { %s3983_s1 = smov 128   ;;  %s3984_s25 = smov 8  }
  0x23   :  { %42 = dma.hbm_to_vmem [thread:$0]  %s4198_s3, 16384, %s37_s16, [#allocation6], %s3983_s1, %s3983_s1, %s3984_s25  }
  0x24   :  { %3973 = dma.done.wait [#allocation3], 32768  }
  0x25   :  { %3974 = vsyncadd [#allocation3], 4294934528 }
  0x26   :  { %3975 = dma.done.wait [#allocation6], 16384  }
  0x27   :  { %3976 = vsyncadd [#allocation6], 4294950912  ;;  %v57_v0 = vld [vmem:[#allocation2] sm:$0xff]  ;;  %v315_v6 = vlaneseq  ;;  %v3985_v7 = vmov 1966171168   ;;  %v59_v34 = vld [vmem:[#allocation2 + $0x10] sm:$0xff] }
  0x28   :  { %v61_v1 = vld [vmem:[#allocation2 + $0x20] sm:$0xff]  ;;  %v365_v8 = vunpack.c.l.s4 %v3985_v7  ;;  %v63_v36 = vld [vmem:[#allocation2 + $0x30] sm:$0xff]  ;;  %s3986_s13 = smov [#allocation7]   ;;  %vm3181_vm10 = vcmask 25600  }
  0x29   :  { %v65_v2 = vld [vmem:[#allocation2 + $0x40] sm:$0xff]  ;;  %v3201_v3 = vcombine.high %v57_v0, %v61_v1  ;;  %v3200_v4 = vcombine.low %v57_v0, %v61_v1  ;;  %v4051_v14 = vshrl.u32 %v315_v6, 7  ;;  %v3205_v39 = vcombine.high %v59_v34, %v63_v36  ;;  %v67_v41 = vld [vmem:[#allocation2 + $0x50] sm:$0xff]  ;;  %s3189_s14 = sshll.u32 %s3986_s13, 4  ;;  %s3190_s14 = int_to_ptr.vmem [resolvable:$true] %s3189_s14 }
  0x2a   :  { %v69_v5 = vld [vmem:[#allocation2 + $0x60] sm:$0xff]  ;;  %v366_v15 = vunpack.c.0.s8 %v365_v8  ;;  %v3204_v40 = vcombine.low %v59_v34, %v63_v36  ;;  %v71_v42 = vld [vmem:[#allocation2 + $0x70] sm:$0xff]  ;;  %s3951_s15 = scalar_lea.vmem %s3190_s14, 32  ;;  %p3956_p3 = scmp.lt.s32.totalorder %s3190_s14, %s3190_s14 }
  0x2b   :  { %v3209_v9 = vcombine.high %v65_v2, %v69_v5  ;;  %v73_v10 = vld [vmem:[#allocation2 + $0x80] sm:$0xff]  ;;  %1664 = vmatprep.subr.bf16.mxu1 %v3201_v3  ;;  %v3208_v12 = vcombine.low %v65_v2, %v69_v5  ;;  %v3213_v44 = vcombine.high %v67_v41, %v71_v42  ;;  %v75_v45 = vld [vmem:[#allocation2 + $0x90] sm:$0xff]  ;;  %1828 = vmatprep.subr.bf16.mxu0 %v3205_v39  ;;  %p3952_p2 = scmp.ne.s32.totalorder %s3190_s14, %s3951_s15  ;;  %p3957_p4 = scmp.lt.s32.totalorder %s3951_s15, %s3951_s15 }
  0x2c   :  { %v77_v11 = vld [vmem:[#allocation2 + $0xa0] sm:$0xff]  ;;  %1665 = vmatpush1.bf16.msra.mxu1 %v3200_v4  ;;  %v4054_v20 = vsub.s32 %v366_v15, %v4051_v14  ;;  %v79_v46 = vld [vmem:[#allocation2 + $0xb0] sm:$0xff]  ;;  %1829 = vmatpush1.bf16.msra.mxu0 %v3204_v40  ;;  %v3212_v48 = vcombine.low %v67_v41, %v71_v42 }
  0x2d   :  { %1666 = vmatprep.subr.bf16.mxu1 %v3209_v9  ;;  %v3217_v13 = vcombine.high %v73_v10, %v77_v11  ;;  %v81_v16 = vld [vmem:[#allocation2 + $0xc0] sm:$0xff]  ;;  %v3216_v18 = vcombine.low %v73_v10, %v77_v11  ;;  %1830 = vmatprep.subr.bf16.mxu0 %v3213_v44  ;;  %v3221_v51 = vcombine.high %v75_v45, %v79_v46  ;;  %v83_v53 = vld [vmem:[#allocation2 + $0xd0] sm:$0xff]  ;;  %p3958_p5 = por %p3957_p4, %p3956_p3 }
  0x2e   :  { %v85_v17 = vld [vmem:[#allocation2 + $0xe0] sm:$0xff]  ;;  %v87_v54 = vld [vmem:[#allocation2 + $0xf0] sm:$0xff]  ;;  %v3220_v56 = vcombine.low %v75_v45, %v79_v46 }
  0x2f   :  { %v3225_v19 = vcombine.high %v81_v16, %v85_v17  ;;  %v89_v21 = vld [vmem:[#allocation2 + $0x100] sm:$0xff]  ;;  %v3224_v25 = vcombine.low %v81_v16, %v85_v17  ;;  %v3229_v59 = vcombine.high %v83_v53, %v87_v54  ;;  %v91_v61 = vld [vmem:[#allocation2 + $0x110] sm:$0xff]  ;;  %v3228_v0 = vcombine.low %v83_v53, %v87_v54  ;;  %p3959_p6 = pnand %p3958_p5, %p3952_p2 }
  0x30   :  { %1667 = vmatpush1.bf16.msra.mxu1 %v3208_v12  ;;  %v93_v22 = vld [vmem:[#allocation2 + $0x120] sm:$0xff]  ;;  %1831 = vmatpush1.bf16.msra.mxu0 %v3212_v48  ;;  %v95_v62 = vld [vmem:[#allocation2 + $0x130] sm:$0xff] }
  0x31   :  { %1668 = vmatprep.subr.bf16.mxu1 %v3217_v13  ;;  %v4059_v23 = vld.sshfl [vmem:[%s4195_s0] sm:$0x33 pattern:$0x75316420]  ;;  %v3233_v26 = vcombine.high %v89_v21, %v93_v22  ;;  %v3232_v30 = vcombine.low %v89_v21, %v93_v22  ;;  %1832 = vmatprep.subr.bf16.mxu0 %v3221_v51  ;;  %v3237_v3 = vcombine.high %v91_v61, %v95_v62  ;;  %v99_v5 = vld [vmem:[#allocation2 + $0x150] sm:$0xff] }
  0x32   :  { %v363_v24 = vcombine.high %v4059_v23, %v4059_v23  ;;  %v97_v28 = vld [vmem:[#allocation2 + $0x140] sm:$0xff]  ;;  %v103_v6 = vld [vmem:[#allocation2 + $0x170] sm:$0xff]  ;;  %v3236_v10 = vcombine.low %v91_v61, %v95_v62 }
  0x33   :  { %v101_v29 = vld [vmem:[#allocation2 + $0x160] sm:$0xff]  ;;  %v3245_v12 = vcombine.high %v99_v5, %v103_v6  ;;  %v107_v13 = vld [vmem:[#allocation2 + $0x190] sm:$0xff] }
  0x34   :  { %1669 = vmatpush1.bf16.msra.mxu1 %v3216_v18  ;;  %v4064_v27 = vrot.slane %v363_v24, %v4054_v20  ;;  %v3241_v31 = vcombine.high %v97_v28, %v101_v29  ;;  %v105_v32 = vld [vmem:[#allocation2 + $0x180] sm:$0xff]  ;;  %v3240_v35 = vcombine.low %v97_v28, %v101_v29  ;;  %1833 = vmatpush1.bf16.msra.mxu0 %v3220_v56  ;;  %v111_v15 = vld [vmem:[#allocation2 + $0x1b0] sm:$0xff] }
  0x35   :  { %1670 = vmatprep.subr.bf16.mxu1 %v3225_v19  ;;  %v109_v33 = vld [vmem:[#allocation2 + $0x1a0] sm:$0xff]  ;;  %1834 = vmatprep.subr.bf16.mxu0 %v3229_v59  ;;  %v3244_v19 = vcombine.low %v99_v5, %v103_v6  ;;  %v115_v21 = vld [vmem:[#allocation2 + $0x1d0] sm:$0xff]  ;;  %v3253_v24 = vcombine.high %v107_v13, %v111_v15 }
  0x36   :  { %1696 = vmatprep.mubr.bf16.mxu1 %v4064_v27  ;;  %1860 = vmatprep.mubr.bf16.mxu0 %v4064_v27  ;;  %v3249_v37 = vcombine.high %v105_v32, %v109_v33  ;;  %v113_v38 = vld [vmem:[#allocation2 + $0x1c0] sm:$0xff]  ;;  %v3248_v47 = vcombine.low %v105_v32, %v109_v33  ;;  %v127_v34 = vld [vmem:[#allocation2 + $0x230] sm:$0xff] }
  0x37   :  { %v117_v43 = vld [vmem:[#allocation2 + $0x1e0] sm:$0xff]  ;;  %v131_v39 = vld [vmem:[#allocation2 + $0x250] sm:$0xff] }
  0x38   :  { %1671 = vmatpush1.bf16.msra.mxu1 %v3224_v25  ;;  %v3257_v49 = vcombine.high %v113_v38, %v117_v43  ;;  %v121_v50 = vld [vmem:[#allocation2 + $0x200] sm:$0xff]  ;;  %v3256_v55 = vcombine.low %v113_v38, %v117_v43  ;;  %1835 = vmatpush1.bf16.msra.mxu0 %v3228_v0  ;;  %v119_v25 = vld [vmem:[#allocation2 + $0x1f0] sm:$0xff] }
  0x39   :  { %1672 = vmatprep.subr.bf16.mxu1 %v3233_v26  ;;  %v125_v52 = vld [vmem:[#allocation2 + $0x220] sm:$0xff]  ;;  %1836 = vmatprep.subr.bf16.mxu0 %v3237_v3  ;;  %v3261_v33 = vcombine.high %v115_v21, %v119_v25  ;;  %v3260_v38 = vcombine.low %v115_v21, %v119_v25  ;;  %v135_v42 = vld [vmem:[#allocation2 + $0x270] sm:$0xff]  ;;  %v4070_v3 = vrot.slane %v4059_v23, %v4054_v20 }
  0x3a   :  { %v3265_v57 = vcombine.high %v121_v50, %v125_v52  ;;  %v129_v58 = vld [vmem:[#allocation2 + $0x240] sm:$0xff]  ;;  %v3264_v63 = vcombine.low %v121_v50, %v125_v52  ;;  %v143_v50 = vld [vmem:[#allocation2 + $0x2b0] sm:$0xff]  ;;  %v3276_v54 = vcombine.low %v131_v39, %v135_v42 }
  0x3b   :  { %v133_v60 = vld [vmem:[#allocation2 + $0x260] sm:$0xff] }
  0x3c   :  { %1673 = vmatpush1.bf16.msra.mxu1 %v3232_v30  ;;  %v3273_v1 = vcombine.high %v129_v58, %v133_v60  ;;  %v137_v2 = vld [vmem:[#allocation2 + $0x280] sm:$0xff]  ;;  %v3272_v7 = vcombine.low %v129_v58, %v133_v60  ;;  %1837 = vmatpush1.bf16.msra.mxu0 %v3236_v10  ;;  %v3252_v30 = vcombine.low %v107_v13, %v111_v15  ;;  %v151_v58 = vld [vmem:[#allocation2 + $0x2f0] sm:$0xff] }
  0x3d   :  { %1674 = vmatprep.subr.bf16.mxu1 %v3241_v31  ;;  %v141_v4 = vld [vmem:[#allocation2 + $0x2a0] sm:$0xff]  ;;  %1838 = vmatprep.subr.bf16.mxu0 %v3245_v12  ;;  %v123_v31 = vld [vmem:[#allocation2 + $0x210] sm:$0xff] }
  0x3e   :  { %v145_v8 = vld [vmem:[#allocation2 + $0x2c0] sm:$0xff]  ;;  %v3281_v11 = vcombine.high %v137_v2, %v141_v4  ;;  %v3280_v16 = vcombine.low %v137_v2, %v141_v4  ;;  %v3269_v41 = vcombine.high %v123_v31, %v127_v34  ;;  %v3268_v46 = vcombine.low %v123_v31, %v127_v34  ;;  %v159_v2 = vld [vmem:[#allocation2 + $0x330] sm:$0xff] }
  0x3f   :  { %v149_v9 = vld [vmem:[#allocation2 + $0x2e0] sm:$0xff]  ;;  %v163_v10 = vld [vmem:[#allocation2 + $0x350] sm:$0xff] }
  0x40   :  { %1675 = vmatpush1.bf16.msra.mxu1 %v3240_v35  ;;  %v153_v17 = vld [vmem:[#allocation2 + $0x300] sm:$0xff]  ;;  %v3289_v22 = vcombine.high %v145_v8, %v149_v9  ;;  %v3288_v26 = vcombine.low %v145_v8, %v149_v9  ;;  %1839 = vmatpush1.bf16.msra.mxu0 %v3244_v19 }
  0x41   :  { %1676 = vmatprep.subr.bf16.mxu1 %v3249_v37  ;;  %v157_v18 = vld [vmem:[#allocation2 + $0x320] sm:$0xff]  ;;  %1840 = vmatprep.subr.bf16.mxu0 %v3253_v24 }
  0x42   :  { %v161_v28 = vld [vmem:[#allocation2 + $0x340] sm:$0xff]  ;;  %v3297_v32 = vcombine.high %v153_v17, %v157_v18  ;;  %v3296_v35 = vcombine.low %v153_v17, %v157_v18  ;;  %v171_v17 = vld [vmem:[#allocation2 + $0x390] sm:$0xff] }
  0x43   :  { %v165_v29 = vld [vmem:[#allocation2 + $0x360] sm:$0xff]  ;;  %v175_v18 = vld [vmem:[#allocation2 + $0x3b0] sm:$0xff] }
  0x44   :  { %1677 = vmatpush1.bf16.msra.mxu1 %v3248_v47  ;;  %v169_v36 = vld [vmem:[#allocation2 + $0x380] sm:$0xff]  ;;  %1841 = vmatpush1.bf16.msra.mxu0 %v3252_v30  ;;  %v3305_v40 = vcombine.high %v161_v28, %v165_v29  ;;  %v3304_v43 = vcombine.low %v161_v28, %v165_v29  ;;  %v139_v47 = vld [vmem:[#allocation2 + $0x290] sm:$0xff]  ;;  %v3317_v30 = vcombine.high %v171_v17, %v175_v18 }
  0x45   :  { %1678 = vmatprep.subr.bf16.mxu1 %v3257_v49  ;;  %v173_v37 = vld [vmem:[#allocation2 + $0x3a0] sm:$0xff]  ;;  %1842 = vmatprep.subr.bf16.mxu0 %v3261_v33  ;;  %v3277_v49 = vcombine.high %v131_v39, %v135_v42  ;;  %v3284_v62 = vcombine.low %v139_v47, %v143_v50  ;;  %v179_v28 = vld [vmem:[#allocation2 + $0x3d0] sm:$0xff] }
  0x46   :  { %v177_v44 = vld [vmem:[#allocation2 + $0x3c0] sm:$0xff]  ;;  %v3313_v48 = vcombine.high %v169_v36, %v173_v37  ;;  %v3312_v51 = vcombine.low %v169_v36, %v173_v37  ;;  %v183_v29 = vld [vmem:[#allocation2 + $0x3f0] sm:$0xff] }
  0x47   :  { %v181_v45 = vld [vmem:[#allocation2 + $0x3e0] sm:$0xff]  ;;  %v187_v36 = vld [vmem:[#allocation2 + $0x410] sm:$0xff] }
  0x48   :  { %1679 = vmatpush1.bf16.msra.mxu1 %v3256_v55  ;;  %1843 = vmatpush1.bf16.msra.mxu0 %v3260_v38  ;;  %v185_v52 = vld [vmem:[#allocation2 + $0x400] sm:$0xff]  ;;  %v147_v55 = vld [vmem:[#allocation2 + $0x2d0] sm:$0xff]  ;;  %v3321_v56 = vcombine.high %v177_v44, %v181_v45  ;;  %v3320_v59 = vcombine.low %v177_v44, %v181_v45  ;;  %v3325_v38 = vcombine.high %v179_v28, %v183_v29 }
  0x49   :  { %1680 = vmatprep.subr.bf16.mxu1 %v3265_v57  ;;  %1844 = vmatprep.subr.bf16.mxu0 %v3269_v41  ;;  %v189_v53 = vld [vmem:[#allocation2 + $0x420] sm:$0xff]  ;;  %v3285_v57 = vcombine.high %v139_v47, %v143_v50  ;;  %v3293_v0 = vcombine.high %v147_v55, %v151_v58  ;;  %v3292_v9 = vcombine.low %v147_v55, %v151_v58  ;;  %v191_v37 = vld [vmem:[#allocation2 + $0x430] sm:$0xff] }
  0x4a   :  { %v193_v60 = vld [vmem:[#allocation2 + $0x440] sm:$0xff]  ;;  %v3328_v4 = vcombine.low %v185_v52, %v189_v53  ;;  %v195_v44 = vld [vmem:[#allocation2 + $0x450] sm:$0xff] }
  0x4b   :  { %v197_v61 = vld [vmem:[#allocation2 + $0x460] sm:$0xff]  ;;  %v199_v45 = vld [vmem:[#allocation2 + $0x470] sm:$0xff] }
  0x4c   :  { %1681 = vmatpush1.bf16.msra.mxu1 %v3264_v63  ;;  %1845 = vmatpush1.bf16.msra.mxu0 %v3268_v46  ;;  %v3329_v63 = vcombine.high %v185_v52, %v189_v53  ;;  %v201_v5 = vld [vmem:[#allocation2 + $0x480] sm:$0xff]  ;;  %v3337_v8 = vcombine.high %v193_v60, %v197_v61  ;;  %v3336_v20 = vcombine.low %v193_v60, %v197_v61  ;;  %v203_v52 = vld [vmem:[#allocation2 + $0x490] sm:$0xff] }
  0x4d   :  { %1682 = vmatprep.subr.bf16.mxu1 %v3273_v1  ;;  %1846 = vmatprep.subr.bf16.mxu0 %v3277_v49  ;;  %v155_v1 = vld [vmem:[#allocation2 + $0x310] sm:$0xff]  ;;  %v205_v6 = vld [vmem:[#allocation2 + $0x4a0] sm:$0xff]  ;;  %v3333_v46 = vcombine.high %v187_v36, %v191_v37 }
  0x4e   :  { %v3301_v12 = vcombine.high %v155_v1, %v159_v2  ;;  %v209_v23 = vld [vmem:[#allocation2 + $0x4c0] sm:$0xff]  ;;  %v3345_v15 = vcombine.high %v201_v5, %v205_v6  ;;  %v3344_v21 = vcombine.low %v201_v5, %v205_v6  ;;  %v207_v53 = vld [vmem:[#allocation2 + $0x4b0] sm:$0xff] }
  0x4f   :  { %v213_v13 = vld [vmem:[#allocation2 + $0x4e0] sm:$0xff]  ;;  %v211_v60 = vld [vmem:[#allocation2 + $0x4d0] sm:$0xff] }
  0x50   :  { %1683 = vmatpush1.bf16.msra.mxu1 %v3272_v7  ;;  %1847 = vmatpush1.bf16.msra.mxu0 %v3276_v54  ;;  %v4074_v7 = vcombine.high %v4064_v27, %v4064_v27  ;;  %v221_v24 = vld [vmem:[#allocation2 + $0x520] sm:$0xff]  ;;  %v3353_v25 = vcombine.high %v209_v23, %v213_v13  ;;  %v3352_v31 = vcombine.low %v209_v23, %v213_v13  ;;  %v215_v61 = vld [vmem:[#allocation2 + $0x4f0] sm:$0xff] }
  0x51   :  { %1684 = vmatprep.subr.bf16.mxu1 %v3281_v11  ;;  %1848 = vmatprep.subr.bf16.mxu0 %v3285_v57  ;;  %v167_v11 = vld [vmem:[#allocation2 + $0x370] sm:$0xff]  ;;  %v229_v33 = vld [vmem:[#allocation2 + $0x560] sm:$0xff]  ;;  %v3341_v54 = vcombine.high %v195_v44, %v199_v45 }
  0x52   :  { %v3309_v19 = vcombine.high %v163_v10, %v167_v11  ;;  %v237_v41 = vld [vmem:[#allocation2 + $0x5a0] sm:$0xff]  ;;  %v219_v5 = vld [vmem:[#allocation2 + $0x510] sm:$0xff] }
  0x53   :  { %v245_v49 = vld [vmem:[#allocation2 + $0x5e0] sm:$0xff]  ;;  %v223_v6 = vld [vmem:[#allocation2 + $0x530] sm:$0xff] }
  0x54   :  { %1685 = vmatpush1.bf16.msra.mxu1 %v3280_v16  ;;  %1849 = vmatpush1.bf16.msra.mxu0 %v3284_v62  ;;  %v3300_v16 = vcombine.low %v155_v1, %v159_v2  ;;  %v253_v57 = vld [vmem:[#allocation2 + $0x620] sm:$0xff]  ;;  %v3349_v62 = vcombine.high %v203_v52, %v207_v53  ;;  %v227_v23 = vld [vmem:[#allocation2 + $0x550] sm:$0xff] }
  0x55   :  { %1686 = vmatprep.subr.bf16.mxu1 %v3289_v22  ;;  %1850 = vmatprep.subr.bf16.mxu0 %v3293_v0  ;;  %v217_v22 = vld [vmem:[#allocation2 + $0x500] sm:$0xff]  ;;  %v231_v13 = vld [vmem:[#allocation2 + $0x570] sm:$0xff] }
  0x56   :  { %v3361_v34 = vcombine.high %v217_v22, %v221_v24  ;;  %v3360_v39 = vcombine.low %v217_v22, %v221_v24  ;;  %v257_v0 = vld [vmem:[#allocation2 + $0x640] sm:$0xff]  ;;  %v235_v22 = vld [vmem:[#allocation2 + $0x590] sm:$0xff] }
  0x57   :  { %v261_v1 = vld [vmem:[#allocation2 + $0x660] sm:$0xff]  ;;  %v239_v24 = vld [vmem:[#allocation2 + $0x5b0] sm:$0xff] }
  0x58   :  { %1687 = vmatpush1.bf16.msra.mxu1 %v3288_v26  ;;  %1851 = vmatpush1.bf16.msra.mxu0 %v3292_v9  ;;  %v3308_v26 = vcombine.low %v163_v10, %v167_v11  ;;  %v265_v10 = vld [vmem:[#allocation2 + $0x680] sm:$0xff] }
  0x59   :  { %1688 = vmatprep.subr.bf16.mxu1 %v3297_v32  ;;  %1852 = vmatprep.subr.bf16.mxu0 %v3301_v12  ;;  %v225_v32 = vld [vmem:[#allocation2 + $0x540] sm:$0xff]  ;;  %v3401_v12 = vcombine.high %v257_v0, %v261_v1 }
  0x5a   :  { %v3369_v42 = vcombine.high %v225_v32, %v229_v33  ;;  %v3368_v47 = vcombine.low %v225_v32, %v229_v33  ;;  %v269_v11 = vld [vmem:[#allocation2 + $0x6a0] sm:$0xff]  ;;  %v243_v32 = vld [vmem:[#allocation2 + $0x5d0] sm:$0xff] }
  0x5b   :  { %v247_v33 = vld [vmem:[#allocation2 + $0x5f0] sm:$0xff] }
  0x5c   :  { %1689 = vmatpush1.bf16.msra.mxu1 %v3296_v35  ;;  %1853 = vmatpush1.bf16.msra.mxu0 %v3300_v16  ;;  %v3316_v35 = vcombine.low %v171_v17, %v175_v18  ;;  %v3400_v16 = vcombine.low %v257_v0, %v261_v1  ;;  %v273_v17 = vld [vmem:[#allocation2 + $0x6c0] sm:$0xff]  ;;  %v275_v1 = vld [vmem:[#allocation2 + $0x6d0] sm:$0xff] }
  0x5d   :  { %1690 = vmatprep.subr.bf16.mxu1 %v3305_v40  ;;  %1854 = vmatprep.subr.bf16.mxu0 %v3309_v19  ;;  %v233_v40 = vld [vmem:[#allocation2 + $0x580] sm:$0xff]  ;;  %v3409_v19 = vcombine.high %v265_v10, %v269_v11 }
  0x5e   :  { %v3377_v50 = vcombine.high %v233_v40, %v237_v41  ;;  %v3376_v55 = vcombine.low %v233_v40, %v237_v41  ;;  %v277_v18 = vld [vmem:[#allocation2 + $0x6e0] sm:$0xff]  ;;  %v251_v40 = vld [vmem:[#allocation2 + $0x610] sm:$0xff] }
  0x5f   :  { %v255_v41 = vld [vmem:[#allocation2 + $0x630] sm:$0xff] }
  0x60   :  { %1691 = vmatpush1.bf16.msra.mxu1 %v3304_v43  ;;  %1855 = vmatpush1.bf16.msra.mxu0 %v3308_v26  ;;  %v3324_v43 = vcombine.low %v179_v28, %v183_v29  ;;  %v3408_v26 = vcombine.low %v265_v10, %v269_v11  ;;  %v281_v28 = vld [vmem:[#allocation2 + $0x700] sm:$0xff]  ;;  %v4082_v11 = vcombine.high %v4070_v3, %v4070_v3 }
  0x61   :  { %1692 = vmatprep.subr.bf16.mxu1 %v3313_v48  ;;  %1856 = vmatprep.subr.bf16.mxu0 %v3317_v30  ;;  %v241_v48 = vld [vmem:[#allocation2 + $0x5c0] sm:$0xff]  ;;  %v3417_v30 = vcombine.high %v273_v17, %v277_v18 }
  0x62   :  { %v3385_v58 = vcombine.high %v241_v48, %v245_v49  ;;  %v285_v29 = vld [vmem:[#allocation2 + $0x720] sm:$0xff] }
  0x64   :  { %1693 = vmatpush1.bf16.msra.mxu1 %v3312_v51  ;;  %1857 = vmatpush1.bf16.msra.mxu0 %v3316_v35  ;;  %v3332_v51 = vcombine.low %v187_v36, %v191_v37  ;;  %v3416_v35 = vcombine.low %v273_v17, %v277_v18  ;;  %v289_v36 = vld [vmem:[#allocation2 + $0x740] sm:$0xff]  ;;  %v78_v17 = vld [vmem:[#allocation2 + $0xa8] sm:$0xff] }
  0x65   :  { %1694 = vmatprep.subr.bf16.mxu1 %v3321_v56  ;;  %1858 = vmatprep.subr.bf16.mxu0 %v3325_v38  ;;  %v249_v56 = vld [vmem:[#allocation2 + $0x600] sm:$0xff]  ;;  %v3425_v38 = vcombine.high %v281_v28, %v285_v29 }
  0x66   :  { %v3393_v2 = vcombine.high %v249_v56, %v253_v57  ;;  %v3392_v9 = vcombine.low %v249_v56, %v253_v57  ;;  %v293_v37 = vld [vmem:[#allocation2 + $0x760] sm:$0xff]  ;;  %v267_v57 = vld [vmem:[#allocation2 + $0x690] sm:$0xff] }
  0x68   :  { %1695 = vmatpush1.bf16.msra.mxu1 %v3320_v59  ;;  %1859 = vmatpush1.bf16.msra.mxu0 %v3324_v43  ;;  %v3340_v59 = vcombine.low %v195_v44, %v199_v45  ;;  %v3424_v43 = vcombine.low %v281_v28, %v285_v29  ;;  %v297_v44 = vld [vmem:[#allocation2 + $0x780] sm:$0xff]  ;;  %v86_v28 = vld [vmem:[#allocation2 + $0xe8] sm:$0xff] }
  0x69   :  { %1705 = vmatprep.subr.bf16.mxu1 %v3329_v63  ;;  %1869 = vmatprep.subr.bf16.mxu0 %v3333_v46  ;;  %v3384_v63 = vcombine.low %v241_v48, %v245_v49  ;;  %v301_v45 = vld [vmem:[#allocation2 + $0x7a0] sm:$0xff]  ;;  %v3433_v46 = vcombine.high %v289_v36, %v293_v37  ;;  %v259_v48 = vld [vmem:[#allocation2 + $0x650] sm:$0xff]  ;;  %v3397_v49 = vcombine.high %v251_v40, %v255_v41 }
  0x6b   :  { %1697 = vmatmul.mubr.bf16.vlgmr.msra.gmra.mrb[0].mxu1 %v4070_v3  ;;  %1861 = vmatmul.mubr.bf16.vlgmr.msra.gmra.mrb[0].mxu0 %v4070_v3 }
  0x6c   :  { %1706 = vmatpush1.bf16.msra.mxu1 %v3328_v4  ;;  %1737 = vmatprep.mubr.bf16.mxu1 %v4074_v7  ;;  %v3348_v4 = vcombine.low %v203_v52, %v207_v53  ;;  %v3441_v52 = vcombine.high %v297_v44, %v301_v45  ;;  %v3396_v53 = vcombine.low %v251_v40, %v255_v41 }
  0x6d   :  { %1707 = vmatprep.subr.bf16.mxu1 %v3337_v8  ;;  %1870 = vmatpush1.bf16.msra.mxu0 %v3332_v51  ;;  %v3357_v8 = vcombine.high %v211_v60, %v215_v61  ;;  %v3432_v51 = vcombine.low %v289_v36, %v293_v37  ;;  %v94_v36 = vld [vmem:[#allocation2 + $0x128] sm:$0xff] }
  0x6e   :  { %1871 = vmatprep.subr.bf16.mxu0 %v3341_v54  ;;  %1901 = vmatprep.mubr.bf16.mxu0 %v4074_v7  ;;  %v305_v54 = vld [vmem:[#allocation2 + $0x7c0] sm:$0xff] }
  0x70   :  { %1708 = vmatpush1.bf16.msra.mxu1 %v3336_v20  ;;  %v3356_v20 = vcombine.low %v211_v60, %v215_v61 }
  0x71   :  { %1709 = vmatprep.subr.bf16.mxu1 %v3345_v15  ;;  %1872 = vmatpush1.bf16.msra.mxu0 %v3340_v59  ;;  %v3365_v15 = vcombine.high %v219_v5, %v223_v6  ;;  %v3440_v59 = vcombine.low %v297_v44, %v301_v45  ;;  %v102_v44 = vld [vmem:[#allocation2 + $0x168] sm:$0xff] }
  0x72   :  { %1873 = vmatprep.subr.bf16.mxu0 %v3349_v62  ;;  %v58_v62 = vld [vmem:[#allocation2 + $0x8] sm:$0xff] }
  0x74   :  { %1710 = vmatpush1.bf16.msra.mxu1 %v3344_v21  ;;  %v3364_v21 = vcombine.low %v219_v5, %v223_v6 }
  0x75   :  { %1711 = vmatprep.subr.bf16.mxu1 %v3353_v25  ;;  %1874 = vmatpush1.bf16.msra.mxu0 %v3348_v4  ;;  %v3373_v25 = vcombine.high %v227_v23, %v231_v13 }
  0x76   :  { %1875 = vmatprep.subr.bf16.mxu0 %v3357_v8  ;;  %v66_v8 = vld [vmem:[#allocation2 + $0x48] sm:$0xff] }
  0x78   :  { %1712 = vmatpush1.bf16.msra.mxu1 %v3352_v31  ;;  %v3372_v31 = vcombine.low %v227_v23, %v231_v13 }
  0x79   :  { %1713 = vmatprep.subr.bf16.mxu1 %v3361_v34  ;;  %1876 = vmatpush1.bf16.msra.mxu0 %v3356_v20  ;;  %v3381_v34 = vcombine.high %v235_v22, %v239_v24  ;;  %v287_v20 = vld [vmem:[#allocation2 + $0x730] sm:$0xff] }
  0x7a   :  { %1877 = vmatprep.subr.bf16.mxu0 %v3365_v15 }
  0x7c   :  { %1714 = vmatpush1.bf16.msra.mxu1 %v3360_v39  ;;  %v3380_v39 = vcombine.low %v235_v22, %v239_v24 }
  0x7d   :  { %1715 = vmatprep.subr.bf16.mxu1 %v3369_v42  ;;  %1878 = vmatpush1.bf16.msra.mxu0 %v3364_v21  ;;  %v3389_v42 = vcombine.high %v243_v32, %v247_v33  ;;  %v295_v21 = vld [vmem:[#allocation2 + $0x770] sm:$0xff] }
  0x7e   :  { %1879 = vmatprep.subr.bf16.mxu0 %v3373_v25 }
  0x80   :  { %1716 = vmatpush1.bf16.msra.mxu1 %v3368_v47  ;;  %v3388_v47 = vcombine.low %v243_v32, %v247_v33 }
  0x81   :  { %1717 = vmatprep.subr.bf16.mxu1 %v3377_v50  ;;  %1880 = vmatpush1.bf16.msra.mxu0 %v3372_v31  ;;  %v263_v50 = vld [vmem:[#allocation2 + $0x670] sm:$0xff] }
  0x82   :  { %1881 = vmatprep.subr.bf16.mxu0 %v3381_v34  ;;  %v3405_v56 = vcombine.high %v259_v48, %v263_v50  ;;  %v3404_v61 = vcombine.low %v259_v48, %v263_v50  ;;  %v303_v31 = vld [vmem:[#allocation2 + $0x7b0] sm:$0xff]  ;;  %v110_v50 = vld [vmem:[#allocation2 + $0x1a8] sm:$0xff] }
  0x84   :  { %1718 = vmatpush1.bf16.msra.mxu1 %v3376_v55  ;;  %v309_v55 = vld [vmem:[#allocation2 + $0x7e0] sm:$0xff] }
  0x85   :  { %1719 = vmatprep.subr.bf16.mxu1 %v3385_v58  ;;  %1882 = vmatpush1.bf16.msra.mxu0 %v3380_v39  ;;  %v271_v58 = vld [vmem:[#allocation2 + $0x6b0] sm:$0xff]  ;;  %v3449_v60 = vcombine.high %v305_v54, %v309_v55  ;;  %v3448_v4 = vcombine.low %v305_v54, %v309_v55  ;;  %v118_v54 = vld [vmem:[#allocation2 + $0x1e8] sm:$0xff] }
  0x86   :  { %1883 = vmatprep.subr.bf16.mxu0 %v3389_v42  ;;  %v3413_v0 = vcombine.high %v267_v57, %v271_v58  ;;  %v3412_v6 = vcombine.low %v267_v57, %v271_v58  ;;  %v311_v39 = vld [vmem:[#allocation2 + $0x7f0] sm:$0xff]  ;;  %v122_v57 = vld [vmem:[#allocation2 + $0x208] sm:$0xff] }
  0x87   :  { %v126_v58 = vld [vmem:[#allocation2 + $0x228] sm:$0xff] }
  0x88   :  { %1720 = vmatpush1.bf16.msra.mxu1 %v3384_v63  ;;  %v62_v63 = vld [vmem:[#allocation2 + $0x28] sm:$0xff] }
  0x89   :  { %1721 = vmatprep.subr.bf16.mxu1 %v3393_v2  ;;  %1884 = vmatpush1.bf16.msra.mxu0 %v3388_v47  ;;  %v279_v2 = vld [vmem:[#allocation2 + $0x6f0] sm:$0xff]  ;;  %v3203_v5 = vcombine.high %v58_v62, %v62_v63  ;;  %v3202_v23 = vcombine.low %v58_v62, %v62_v63  ;;  %v134_v62 = vld [vmem:[#allocation2 + $0x268] sm:$0xff]  ;;  %v3266_v63 = vcombine.low %v122_v57, %v126_v58 }
  0x8a   :  { %1885 = vmatprep.subr.bf16.mxu0 %v3397_v49  ;;  %v3421_v10 = vcombine.high %v275_v1, %v279_v2  ;;  %v3420_v15 = vcombine.low %v275_v1, %v279_v2  ;;  %v106_v49 = vld [vmem:[#allocation2 + $0x188] sm:$0xff] }
  0x8b   :  { %v3250_v55 = vcombine.low %v106_v49, %v110_v50  ;;  %v138_v1 = vld [vmem:[#allocation2 + $0x288] sm:$0xff] }
  0x8c   :  { %1722 = vmatpush1.bf16.msra.mxu1 %v3392_v9  ;;  %v70_v9 = vld [vmem:[#allocation2 + $0x68] sm:$0xff] }
  0x8d   :  { %1723 = vmatprep.subr.bf16.mxu1 %v3401_v12  ;;  %1886 = vmatpush1.bf16.msra.mxu0 %v3396_v53  ;;  %v283_v12 = vld [vmem:[#allocation2 + $0x710] sm:$0xff]  ;;  %v3211_v13 = vcombine.high %v66_v8, %v70_v9  ;;  %v3210_v22 = vcombine.low %v66_v8, %v70_v9  ;;  %v114_v53 = vld [vmem:[#allocation2 + $0x1c8] sm:$0xff] }
  0x8e   :  { %1887 = vmatprep.subr.bf16.mxu0 %v3405_v56  ;;  %v3429_v18 = vcombine.high %v283_v12, %v287_v20  ;;  %v3428_v25 = vcombine.low %v283_v12, %v287_v20  ;;  %v3259_v56 = vcombine.high %v114_v53, %v118_v54  ;;  %v142_v2 = vld [vmem:[#allocation2 + $0x2a8] sm:$0xff] }
  0x8f   :  { %v150_v8 = vld [vmem:[#allocation2 + $0x2e8] sm:$0xff]  ;;  %v3282_v9 = vcombine.low %v138_v1, %v142_v2 }
  0x90   :  { %1724 = vmatpush1.bf16.msra.mxu1 %v3400_v16  ;;  %v74_v16 = vld [vmem:[#allocation2 + $0x88] sm:$0xff] }
  0x91   :  { %1725 = vmatprep.subr.bf16.mxu1 %v3409_v19  ;;  %1888 = vmatpush1.bf16.msra.mxu0 %v3404_v61  ;;  %v291_v19 = vld [vmem:[#allocation2 + $0x750] sm:$0xff]  ;;  %v3219_v24 = vcombine.high %v74_v16, %v78_v17  ;;  %v3218_v32 = vcombine.low %v74_v16, %v78_v17  ;;  %v130_v61 = vld [vmem:[#allocation2 + $0x248] sm:$0xff] }
  0x92   :  { %1889 = vmatprep.subr.bf16.mxu0 %v3413_v0  ;;  %v3437_v29 = vcombine.high %v291_v19, %v295_v21  ;;  %v3436_v34 = vcombine.low %v291_v19, %v295_v21  ;;  %v3275_v0 = vcombine.high %v130_v61, %v134_v62  ;;  %v154_v12 = vld [vmem:[#allocation2 + $0x308] sm:$0xff] }
  0x93   :  { %v158_v20 = vld [vmem:[#allocation2 + $0x328] sm:$0xff] }
  0x94   :  { %1726 = vmatpush1.bf16.msra.mxu1 %v3408_v26  ;;  %v82_v26 = vld [vmem:[#allocation2 + $0xc8] sm:$0xff]  ;;  %v3298_v19 = vcombine.low %v154_v12, %v158_v20 }
  0x95   :  { %1727 = vmatprep.subr.bf16.mxu1 %v3417_v30  ;;  %1890 = vmatpush1.bf16.msra.mxu0 %v3412_v6  ;;  %v299_v30 = vld [vmem:[#allocation2 + $0x790] sm:$0xff]  ;;  %v3227_v33 = vcombine.high %v82_v26, %v86_v28  ;;  %v3226_v40 = vcombine.low %v82_v26, %v86_v28  ;;  %v146_v6 = vld [vmem:[#allocation2 + $0x2c8] sm:$0xff] }
  0x96   :  { %1891 = vmatprep.subr.bf16.mxu0 %v3421_v10  ;;  %v3445_v37 = vcombine.high %v299_v30, %v303_v31  ;;  %v3444_v42 = vcombine.low %v299_v30, %v303_v31  ;;  %v3291_v10 = vcombine.high %v146_v6, %v150_v8  ;;  %v3681_v16 = vld [vmem:[#allocation5 + $0x4] ss:$8 sps:$4 sm:$0xff]   ;;  %v3685_v30 = vld [vmem:[#allocation5 + $0x20] ss:$8 sps:$4 sm:$0xff]  }
  0x97   :  { %v162_v17 = vld [vmem:[#allocation2 + $0x348] sm:$0xff] }
  0x98   :  { %1728 = vmatpush1.bf16.msra.mxu1 %v3416_v35  ;;  %v90_v35 = vld [vmem:[#allocation2 + $0x108] sm:$0xff] }
  0x99   :  { %1729 = vmatprep.subr.bf16.mxu1 %v3425_v38  ;;  %1892 = vmatpush1.bf16.msra.mxu0 %v3420_v15  ;;  %v307_v38 = vld [vmem:[#allocation2 + $0x7d0] sm:$0xff]  ;;  %v3235_v41 = vcombine.high %v90_v35, %v94_v36  ;;  %v3679_v15 = vld [vmem:[#allocation5] ss:$8 sps:$4 sm:$0xff]   ;;  %v3687_v31 = vld [vmem:[#allocation5 + $0x24] ss:$8 sps:$4 sm:$0xff]  }
  0x9a   :  { %1893 = vmatprep.subr.bf16.mxu0 %v3429_v18  ;;  %v3453_v45 = vcombine.high %v307_v38, %v311_v39  ;;  %v3452_v48 = vcombine.low %v307_v38, %v311_v39  ;;  %v166_v18 = vld [vmem:[#allocation2 + $0x368] sm:$0xff] }
  0x9b   :  { %v3307_v21 = vcombine.high %v162_v17, %v166_v18  ;;  %v174_v26 = vld [vmem:[#allocation2 + $0x3a8] sm:$0xff]  ;;  %v3306_v28 = vcombine.low %v162_v17, %v166_v18 }
  0x9c   :  { %1730 = vmatpush1.bf16.msra.mxu1 %v3424_v43  ;;  %v98_v43 = vld [vmem:[#allocation2 + $0x148] sm:$0xff] }
  0x9d   :  { %1731 = vmatprep.subr.bf16.mxu1 %v3433_v46  ;;  %1894 = vmatpush1.bf16.msra.mxu0 %v3428_v25  ;;  %v3234_v46 = vcombine.low %v90_v35, %v94_v36  ;;  %v3243_v47 = vcombine.high %v98_v43, %v102_v44  ;;  %v170_v25 = vld [vmem:[#allocation2 + $0x388] sm:$0xff]  ;;  %v3688_v36 = vld [vmem:[#allocation5 + $0x30] ss:$8 sps:$4 sm:$0xff]  }
  0x9e   :  { %1895 = vmatprep.subr.bf16.mxu0 %v3437_v29  ;;  %v3315_v29 = vcombine.high %v170_v25, %v174_v26  ;;  %v186_v38 = vld [vmem:[#allocation2 + $0x408] sm:$0xff] }
  0x9f   :  { %v190_v39 = vld [vmem:[#allocation2 + $0x428] sm:$0xff] }
  0xa0   :  { %1732 = vmatpush1.bf16.msra.mxu1 %v3432_v51  ;;  %v3242_v51 = vcombine.low %v98_v43, %v102_v44  ;;  %v3693_v43 = vld [vmem:[#allocation5 + $0x44] ss:$8 sps:$4 sm:$0xff]  }
  0xa1   :  { %1733 = vmatprep.subr.bf16.mxu1 %v3441_v52  ;;  %1896 = vmatpush1.bf16.msra.mxu0 %v3436_v34  ;;  %v3251_v52 = vcombine.high %v106_v49, %v110_v50  ;;  %v3314_v34 = vcombine.low %v170_v25, %v174_v26  ;;  %v194_v44 = vld [vmem:[#allocation2 + $0x448] sm:$0xff]  ;;  %v3696_v49 = vld [vmem:[#allocation5 + $0x54] ss:$8 sps:$4 sm:$0xff]  }
  0xa2   :  { %1897 = vmatprep.subr.bf16.mxu0 %v3445_v37  ;;  %v3690_v37 = vld [vmem:[#allocation5 + $0x34] ss:$8 sps:$4 sm:$0xff]   ;;  %v202_v50 = vld [vmem:[#allocation2 + $0x488] sm:$0xff] }
  0xa3   :  { %v242_v17 = vld [vmem:[#allocation2 + $0x5c8] sm:$0xff] }
  0xa4   :  { %1734 = vmatpush1.bf16.msra.mxu1 %v3440_v59  ;;  %v3258_v59 = vcombine.low %v114_v53, %v118_v54  ;;  %v3697_v54 = vld [vmem:[#allocation5 + $0x60] ss:$8 sps:$4 sm:$0xff]  }
  0xa5   :  { %1735 = vmatprep.subr.bf16.mxu1 %v3449_v60  ;;  %1898 = vmatpush1.bf16.msra.mxu0 %v3444_v42  ;;  %v3267_v60 = vcombine.high %v122_v57, %v126_v58  ;;  %v3691_v42 = vld [vmem:[#allocation5 + $0x40] ss:$8 sps:$4 sm:$0xff]  }
  0xa6   :  { %1899 = vmatprep.subr.bf16.mxu0 %v3453_v45  ;;  %v198_v45 = vld [vmem:[#allocation2 + $0x468] sm:$0xff] }
  0xa7   :  { %v214_v57 = vld [vmem:[#allocation2 + $0x4e8] sm:$0xff] }
  0xa8   :  { %1736 = vmatpush1.bf16.msra.mxu1 %v3448_v4  ;;  %v3274_v4 = vcombine.low %v130_v61, %v134_v62  ;;  %v3702_v61 = vld [vmem:[#allocation5 + $0x74] ss:$8 sps:$4 sm:$0xff]   ;;  %v218_v62 = vld [vmem:[#allocation2 + $0x508] sm:$0xff] }
  0xa9   :  { %1746 = vmatprep.subr.bf16.mxu1 %v3203_v5  ;;  %1900 = vmatpush1.bf16.msra.mxu0 %v3452_v48  ;;  %v3283_v5 = vcombine.high %v138_v1, %v142_v2  ;;  %v3694_v48 = vld [vmem:[#allocation5 + $0x50] ss:$8 sps:$4 sm:$0xff]   ;;  %v3703_v2 = vld [vmem:[#allocation5 + $0x80] ss:$8 sps:$4 sm:$0xff]  }
  0xaa   :  { %2828 = vmatprep.subr.bf16.mxu0 %v3681_v16  ;;  %v3711_v16 = vld [vmem:[#allocation5 + $0xa4] ss:$8 sps:$4 sm:$0xff]  }
  0xab   :  { %1738 = vmatmul.mubr.bf16.vlgmr.msra.gmra.mrb[0].mxu1 %v4082_v11  ;;  %v246_v18 = vld [vmem:[#allocation2 + $0x5e8] sm:$0xff] }
  0xac   :  { %1747 = vmatpush1.bf16.msra.mxu1 %v3202_v23  ;;  %1778 = vmatprep.mubr.bf16.mxu1 %v4064_v27  ;;  %v3290_v23 = vcombine.low %v146_v6, %v150_v8  ;;  %v230_v6 = vld [vmem:[#allocation2 + $0x568] sm:$0xff] }
  0xad   :  { %1748 = vmatprep.subr.bf16.mxu1 %v3211_v13  ;;  %1902 = vmatmul.mubr.bf16.vlgmr.msra.gmra.mrb[0].mxu0 %v4082_v11  ;;  %v3299_v13 = vcombine.high %v154_v12, %v158_v20  ;;  %v3708_v12 = vld [vmem:[#allocation5 + $0x94] ss:$8 sps:$4 sm:$0xff]   ;;  %v234_v20 = vld [vmem:[#allocation2 + $0x588] sm:$0xff] }
  0xae   :  { %2829 = vmatpush1.bf16.msra.mxu0 %v3679_v15  ;;  %v250_v25 = vld [vmem:[#allocation2 + $0x608] sm:$0xff] }
  0xaf   :  { %v254_v26 = vld [vmem:[#allocation2 + $0x628] sm:$0xff] }
  0xb0   :  { %1749 = vmatpush1.bf16.msra.mxu1 %v3210_v22  ;;  %v3682_v22 = vld [vmem:[#allocation5 + $0x10] ss:$8 sps:$4 sm:$0xff]  }
  0xb1   :  { %1750 = vmatprep.subr.bf16.mxu1 %v3219_v24  ;;  %v3684_v24 = vld [vmem:[#allocation5 + $0x14] ss:$8 sps:$4 sm:$0xff]  }
  0xb2   :  { %2830 = vmatprep.subr.bf16.mxu0 %v3684_v24  ;;  %v3714_v24 = vld [vmem:[#allocation5 + $0xb4] ss:$8 sps:$4 sm:$0xff]  }
  0xb3   :  { %2831 = vmatpush1.bf16.msra.mxu0 %v3682_v22  ;;  %v3387_v22 = vcombine.high %v242_v17, %v246_v18 }
  0xb4   :  { %1751 = vmatpush1.bf16.msra.mxu1 %v3218_v32  ;;  %v178_v32 = vld [vmem:[#allocation2 + $0x3c8] sm:$0xff]  ;;  %2832 = vmatprep.subr.bf16.mxu0 %v3687_v31 }
  0xb5   :  { %1752 = vmatprep.subr.bf16.mxu1 %v3227_v33  ;;  %v182_v33 = vld [vmem:[#allocation2 + $0x3e8] sm:$0xff] }
  0xb6   :  { %v3323_v35 = vcombine.high %v178_v32, %v182_v33  ;;  %v3717_v31 = vld [vmem:[#allocation5 + $0xc4] ss:$8 sps:$4 sm:$0xff]  }
  0xb7   :  { %2833 = vmatpush1.bf16.msra.mxu0 %v3685_v30  ;;  %v3395_v30 = vcombine.high %v250_v25, %v254_v26 }
  0xb8   :  { %1753 = vmatpush1.bf16.msra.mxu1 %v3226_v40  ;;  %2834 = vmatprep.subr.bf16.mxu0 %v3690_v37  ;;  %v3322_v40 = vcombine.low %v178_v32, %v182_v33  ;;  %v258_v32 = vld [vmem:[#allocation2 + $0x648] sm:$0xff]  ;;  %v3720_v37 = vld [vmem:[#allocation5 + $0xd4] ss:$8 sps:$4 sm:$0xff]  }
  0xb9   :  { %1754 = vmatprep.subr.bf16.mxu1 %v3235_v41  ;;  %v3331_v41 = vcombine.high %v186_v38, %v190_v39  ;;  %v262_v33 = vld [vmem:[#allocation2 + $0x668] sm:$0xff] }
  0xbb   :  { %2835 = vmatpush1.bf16.msra.mxu0 %v3688_v36  ;;  %v3403_v36 = vcombine.high %v258_v32, %v262_v33 }
  0xbc   :  { %1755 = vmatpush1.bf16.msra.mxu1 %v3234_v46  ;;  %2836 = vmatprep.subr.bf16.mxu0 %v3693_v43  ;;  %v3330_v46 = vcombine.low %v186_v38, %v190_v39  ;;  %v266_v38 = vld [vmem:[#allocation2 + $0x688] sm:$0xff] }
  0xbd   :  { %1756 = vmatprep.subr.bf16.mxu1 %v3243_v47  ;;  %v3339_v47 = vcombine.high %v194_v44, %v198_v45  ;;  %v270_v39 = vld [vmem:[#allocation2 + $0x6a8] sm:$0xff] }
  0xbe   :  { %v3723_v43 = vld [vmem:[#allocation5 + $0xe4] ss:$8 sps:$4 sm:$0xff]  }
  0xbf   :  { %2837 = vmatpush1.bf16.msra.mxu0 %v3691_v42  ;;  %v3411_v42 = vcombine.high %v266_v38, %v270_v39 }
  0xc0   :  { %1757 = vmatpush1.bf16.msra.mxu1 %v3242_v51  ;;  %v206_v51 = vld [vmem:[#allocation2 + $0x4a8] sm:$0xff]  ;;  %2838 = vmatprep.subr.bf16.mxu0 %v3696_v49  ;;  %v3726_v49 = vld [vmem:[#allocation5 + $0xf4] ss:$8 sps:$4 sm:$0xff]  }
  0xc1   :  { %1758 = vmatprep.subr.bf16.mxu1 %v3251_v52  ;;  %v3338_v52 = vcombine.low %v194_v44, %v198_v45  ;;  %v3347_v53 = vcombine.high %v202_v50, %v206_v51  ;;  %v3346_v58 = vcombine.low %v202_v50, %v206_v51  ;;  %v274_v44 = vld [vmem:[#allocation2 + $0x6c8] sm:$0xff] }
  0xc2   :  { %v278_v45 = vld [vmem:[#allocation2 + $0x6e8] sm:$0xff] }
  0xc3   :  { %2839 = vmatpush1.bf16.msra.mxu0 %v3694_v48  ;;  %v3419_v48 = vcombine.high %v274_v44, %v278_v45  ;;  %v282_v50 = vld [vmem:[#allocation2 + $0x708] sm:$0xff] }
  0xc4   :  { %1759 = vmatpush1.bf16.msra.mxu1 %v3250_v55  ;;  %v3699_v55 = vld [vmem:[#allocation5 + $0x64] ss:$8 sps:$4 sm:$0xff]  }
  0xc5   :  { %1760 = vmatprep.subr.bf16.mxu1 %v3259_v56  ;;  %v210_v56 = vld [vmem:[#allocation2 + $0x4c8] sm:$0xff]  ;;  %2840 = vmatprep.subr.bf16.mxu0 %v3699_v55 }
  0xc6   :  { %v286_v51 = vld [vmem:[#allocation2 + $0x728] sm:$0xff] }
  0xc7   :  { %2841 = vmatpush1.bf16.msra.mxu0 %v3697_v54  ;;  %v3427_v54 = vcombine.high %v282_v50, %v286_v51  ;;  %v290_v55 = vld [vmem:[#allocation2 + $0x748] sm:$0xff] }
  0xc8   :  { %1761 = vmatpush1.bf16.msra.mxu1 %v3258_v59  ;;  %v3355_v59 = vcombine.high %v210_v56, %v214_v57  ;;  %2842 = vmatprep.subr.bf16.mxu0 %v3702_v61 }
  0xc9   :  { %1762 = vmatprep.subr.bf16.mxu1 %v3267_v60  ;;  %v3700_v60 = vld [vmem:[#allocation5 + $0x70] ss:$8 sps:$4 sm:$0xff]  }
  0xcb   :  { %2843 = vmatpush1.bf16.msra.mxu0 %v3700_v60  ;;  %v302_v60 = vld [vmem:[#allocation2 + $0x7a8] sm:$0xff] }
  0xcc   :  { %1763 = vmatpush1.bf16.msra.mxu1 %v3266_v63  ;;  %v222_v63 = vld [vmem:[#allocation2 + $0x528] sm:$0xff] }
  0xcd   :  { %1764 = vmatprep.subr.bf16.mxu1 %v3275_v0  ;;  %v3354_v0 = vcombine.low %v210_v56, %v214_v57  ;;  %v3363_v1 = vcombine.high %v218_v62, %v222_v63  ;;  %v3362_v8 = vcombine.low %v218_v62, %v222_v63  ;;  %v294_v56 = vld [vmem:[#allocation2 + $0x768] sm:$0xff]  ;;  %v3426_v57 = vcombine.low %v282_v50, %v286_v51 }
  0xce   :  { %v3434_v61 = vcombine.low %v290_v55, %v294_v56  ;;  %v306_v63 = vld [vmem:[#allocation2 + $0x7c8] sm:$0xff] }
  0xd0   :  { %1765 = vmatpush1.bf16.msra.mxu1 %v3274_v4  ;;  %v3705_v4 = vld [vmem:[#allocation5 + $0x84] ss:$8 sps:$4 sm:$0xff]  }
  0xd1   :  { %1766 = vmatprep.subr.bf16.mxu1 %v3283_v5  ;;  %v226_v5 = vld [vmem:[#allocation2 + $0x548] sm:$0xff]  ;;  %2844 = vmatprep.subr.bf16.mxu0 %v3705_v4  ;;  %v60_v4 = vld [vmem:[#allocation2 + $0x18] sm:$0xff] }
  0xd2   :  { %2845 = vmatpush1.bf16.msra.mxu0 %v3703_v2 }
  0xd3   :  { %2846 = vmatprep.subr.bf16.mxu0 %v3708_v12 }
  0xd4   :  { %1767 = vmatpush1.bf16.msra.mxu1 %v3282_v9  ;;  %v3371_v9 = vcombine.high %v226_v5, %v230_v6 }
  0xd5   :  { %1768 = vmatprep.subr.bf16.mxu1 %v3291_v10  ;;  %v3706_v10 = vld [vmem:[#allocation5 + $0x90] ss:$8 sps:$4 sm:$0xff]  }
  0xd6   :  { %2847 = vmatpush1.bf16.msra.mxu0 %v3706_v10  ;;  %v72_v10 = vld [vmem:[#allocation2 + $0x78] sm:$0xff] }
  0xd7   :  { %2848 = vmatprep.subr.bf16.mxu0 %v3711_v16 }
  0xd8   :  { %1769 = vmatpush1.bf16.msra.mxu1 %v3290_v23  ;;  %v238_v23 = vld [vmem:[#allocation2 + $0x5a8] sm:$0xff] }
  0xd9   :  { %1770 = vmatprep.subr.bf16.mxu1 %v3299_v13  ;;  %v3370_v13 = vcombine.low %v226_v5, %v230_v6  ;;  %v3379_v15 = vcombine.high %v234_v20, %v238_v23  ;;  %v64_v5 = vld [vmem:[#allocation2 + $0x38] sm:$0xff] }
  0xda   :  { %v3206_v12 = vcombine.low %v60_v4, %v64_v5 }
  0xdc   :  { %1771 = vmatpush1.bf16.msra.mxu1 %v3298_v19  ;;  %v3709_v19 = vld [vmem:[#allocation5 + $0xa0] ss:$8 sps:$4 sm:$0xff]  }
  0xdd   :  { %1772 = vmatprep.subr.bf16.mxu1 %v3307_v21  ;;  %v3378_v21 = vcombine.low %v234_v20, %v238_v23  ;;  %2849 = vmatpush1.bf16.msra.mxu0 %v3709_v19  ;;  %v76_v23 = vld [vmem:[#allocation2 + $0x98] sm:$0xff] }
  0xde   :  { %2850 = vmatprep.subr.bf16.mxu0 %v3714_v24  ;;  %v88_v19 = vld [vmem:[#allocation2 + $0xf8] sm:$0xff] }
  0xdf   :  { %v92_v24 = vld [vmem:[#allocation2 + $0x118] sm:$0xff] }
  0xe0   :  { %1773 = vmatpush1.bf16.msra.mxu1 %v3306_v28  ;;  %v3712_v28 = vld [vmem:[#allocation5 + $0xb0] ss:$8 sps:$4 sm:$0xff]  }
  0xe1   :  { %1774 = vmatprep.subr.bf16.mxu1 %v3315_v29  ;;  %v3386_v29 = vcombine.low %v242_v17, %v246_v18  ;;  %2851 = vmatpush1.bf16.msra.mxu0 %v3712_v28  ;;  %v84_v18 = vld [vmem:[#allocation2 + $0xd8] sm:$0xff] }
  0xe2   :  { %2852 = vmatprep.subr.bf16.mxu0 %v3717_v31 }
  0xe4   :  { %1775 = vmatpush1.bf16.msra.mxu1 %v3314_v34  ;;  %v3715_v34 = vld [vmem:[#allocation5 + $0xc0] ss:$8 sps:$4 sm:$0xff]  }
  0xe5   :  { %1776 = vmatprep.subr.bf16.mxu1 %v3323_v35  ;;  %v3394_v35 = vcombine.low %v250_v25, %v254_v26  ;;  %2853 = vmatpush1.bf16.msra.mxu0 %v3715_v34  ;;  %v96_v25 = vld [vmem:[#allocation2 + $0x138] sm:$0xff]  ;;  %v3230_v26 = vcombine.low %v84_v18, %v88_v19 }
  0xe6   :  { %2854 = vmatprep.subr.bf16.mxu0 %v3720_v37  ;;  %v3239_v28 = vcombine.high %v92_v24, %v96_v25  ;;  %v3238_v31 = vcombine.low %v92_v24, %v96_v25  ;;  %v120_v37 = vld [vmem:[#allocation2 + $0x1f8] sm:$0xff] }
  0xe7   :  { %v212_v24 = vld [vmem:[#allocation2 + $0x4d8] sm:$0xff] }
  0xe8   :  { %1777 = vmatpush1.bf16.msra.mxu1 %v3322_v40  ;;  %v3718_v40 = vld [vmem:[#allocation5 + $0xd0] ss:$8 sps:$4 sm:$0xff]  }
  0xe9   :  { %1787 = vmatprep.subr.bf16.mxu1 %v3331_v41  ;;  %v3402_v41 = vcombine.low %v258_v32, %v262_v33  ;;  %2855 = vmatpush1.bf16.msra.mxu0 %v3718_v40  ;;  %v108_v32 = vld [vmem:[#allocation2 + $0x198] sm:$0xff] }
  0xea   :  { %2856 = vmatprep.subr.bf16.mxu0 %v3723_v43  ;;  %v112_v33 = vld [vmem:[#allocation2 + $0x1b8] sm:$0xff] }
  0xeb   :  { %1779 = vmatmul.mubr.bf16.vlgmr.msra.gmra.mrb[4].mxu1 %v4070_v3  ;;  %v124_v40 = vld [vmem:[#allocation2 + $0x218] sm:$0xff] }
  0xec   :  { %1788 = vmatpush1.bf16.msra.mxu1 %v3330_v46  ;;  %1819 = vmatprep.mubr.bf16.mxu1 %v4074_v7  ;;  %v3721_v46 = vld [vmem:[#allocation5 + $0xe0] ss:$8 sps:$4 sm:$0xff]   ;;  %v216_v25 = vld [vmem:[#allocation2 + $0x4f8] sm:$0xff] }
  0xed   :  { %1789 = vmatprep.subr.bf16.mxu1 %v3339_v47  ;;  %v3410_v47 = vcombine.low %v266_v38, %v270_v39  ;;  %2857 = vmatpush1.bf16.msra.mxu0 %v3721_v46  ;;  %v3254_v38 = vcombine.low %v108_v32, %v112_v33 }
  0xee   :  { %2858 = vmatprep.subr.bf16.mxu0 %v3726_v49  ;;  %v144_v49 = vld [vmem:[#allocation2 + $0x2b8] sm:$0xff] }
  0xf0   :  { %1790 = vmatpush1.bf16.msra.mxu1 %v3338_v52  ;;  %v3724_v52 = vld [vmem:[#allocation5 + $0xf0] ss:$8 sps:$4 sm:$0xff]  }
  0xf1   :  { %1791 = vmatprep.subr.bf16.mxu1 %v3347_v53  ;;  %v3418_v53 = vcombine.low %v274_v44, %v278_v45  ;;  %2859 = vmatpush1.bf16.msra.mxu0 %v3724_v52  ;;  %v132_v44 = vld [vmem:[#allocation2 + $0x258] sm:$0xff] }
  0xf2   :  { %v136_v45 = vld [vmem:[#allocation2 + $0x278] sm:$0xff] }
  0xf3   :  { %v3278_v50 = vcombine.low %v132_v44, %v136_v45  ;;  %v148_v52 = vld [vmem:[#allocation2 + $0x2d8] sm:$0xff] }
  0xf4   :  { %1792 = vmatpush1.bf16.msra.mxu1 %v3346_v58  ;;  %v3435_v58 = vcombine.high %v290_v55, %v294_v56  ;;  %v156_v56 = vld [vmem:[#allocation2 + $0x318] sm:$0xff] }
  0xf5   :  { %1793 = vmatprep.subr.bf16.mxu1 %v3355_v59  ;;  %v298_v59 = vld [vmem:[#allocation2 + $0x788] sm:$0xff] }
  0xf6   :  { %v3443_v62 = vcombine.high %v298_v59, %v302_v60 }
  0xf8   :  { %1794 = vmatpush1.bf16.msra.mxu1 %v3354_v0  ;;  %v310_v0 = vld [vmem:[#allocation2 + $0x7e8] sm:$0xff] }
  0xf9   :  { %1795 = vmatprep.subr.bf16.mxu1 %v3363_v1  ;;  %v3442_v1 = vcombine.low %v298_v59, %v302_v60  ;;  %v3451_v2 = vcombine.high %v306_v63, %v310_v0  ;;  %v3450_v6 = vcombine.low %v306_v63, %v310_v0  ;;  %v164_v60 = vld [vmem:[#allocation2 + $0x358] sm:$0xff] }
  0xfa   :  { %v172_v0 = vld [vmem:[#allocation2 + $0x398] sm:$0xff] }
  0xfc   :  { %1796 = vmatpush1.bf16.msra.mxu1 %v3362_v8  ;;  %v3207_v8 = vcombine.high %v60_v4, %v64_v5  ;;  %v180_v5 = vld [vmem:[#allocation2 + $0x3d8] sm:$0xff] }
  0xfd   :  { %1797 = vmatprep.subr.bf16.mxu1 %v3371_v9  ;;  %v68_v9 = vld [vmem:[#allocation2 + $0x58] sm:$0xff] }
  0xfe   :  { %v3215_v20 = vcombine.high %v68_v9, %v72_v10  ;;  %v3214_v16 = vcombine.low %v68_v9, %v72_v10  ;;  %v188_v10 = vld [vmem:[#allocation2 + $0x418] sm:$0xff] }
 0x100   :  { %1798 = vmatpush1.bf16.msra.mxu1 %v3370_v13  ;;  %v80_v13 = vld [vmem:[#allocation2 + $0xb8] sm:$0xff] }
 0x101   :  { %1799 = vmatprep.subr.bf16.mxu1 %v3379_v15  ;;  %v3729_v15 = vld [vmem:[#allocation5 + $0x104] ss:$8 sps:$4 sm:$0xff]   ;;  %v3223_v17 = vcombine.high %v76_v23, %v80_v13 }
 0x102   :  { %2869 = vmatprep.subr.bf16.mxu0 %v3729_v15  ;;  %v200_v15 = vld [vmem:[#allocation2 + $0x478] sm:$0xff] }
 0x104   :  { %1800 = vmatpush1.bf16.msra.mxu1 %v3378_v21  ;;  %v3222_v21 = vcombine.low %v76_v23, %v80_v13  ;;  %v196_v13 = vld [vmem:[#allocation2 + $0x458] sm:$0xff] }
 0x105   :  { %1801 = vmatprep.subr.bf16.mxu1 %v3387_v22  ;;  %v3231_v22 = vcombine.high %v84_v18, %v88_v19  ;;  %v204_v18 = vld [vmem:[#allocation2 + $0x498] sm:$0xff] }
 0x106   :  { %v208_v19 = vld [vmem:[#allocation2 + $0x4b8] sm:$0xff] }
 0x108   :  { %1802 = vmatpush1.bf16.msra.mxu1 %v3386_v29  ;;  %v100_v29 = vld [vmem:[#allocation2 + $0x158] sm:$0xff] }
 0x109   :  { %1803 = vmatprep.subr.bf16.mxu1 %v3395_v30  ;;  %v104_v30 = vld [vmem:[#allocation2 + $0x178] sm:$0xff] }
 0x10a   :  { %v3246_v34 = vcombine.low %v100_v29, %v104_v30 }
 0x10c   :  { %1804 = vmatpush1.bf16.msra.mxu1 %v3394_v35  ;;  %v3255_v35 = vcombine.high %v108_v32, %v112_v33  ;;  %v228_v32 = vld [vmem:[#allocation2 + $0x558] sm:$0xff]  ;;  %v317_v33 = vsub.s32 0, %v4051_v14 }
 0x10d   :  { %1805 = vmatprep.subr.bf16.mxu1 %v3403_v36  ;;  %v116_v36 = vld [vmem:[#allocation2 + $0x1d8] sm:$0xff] }
 0x10e   :  { %v3263_v39 = vcombine.high %v116_v36, %v120_v37 }
 0x110   :  { %1806 = vmatpush1.bf16.msra.mxu1 %v3402_v41  ;;  %v128_v41 = vld [vmem:[#allocation2 + $0x238] sm:$0xff] }
 0x111   :  { %1807 = vmatprep.subr.bf16.mxu1 %v3411_v42  ;;  %v3262_v42 = vcombine.low %v116_v36, %v120_v37  ;;  %v3271_v43 = vcombine.high %v124_v40, %v128_v41  ;;  %v3270_v46 = vcombine.low %v124_v40, %v128_v41  ;;  %v236_v37 = vld [vmem:[#allocation2 + $0x598] sm:$0xff] }
 0x114   :  { %1808 = vmatpush1.bf16.msra.mxu1 %v3410_v47  ;;  %v3279_v47 = vcombine.high %v132_v44, %v136_v45  ;;  %v244_v44 = vld [vmem:[#allocation2 + $0x5d8] sm:$0xff] }
 0x115   :  { %1809 = vmatprep.subr.bf16.mxu1 %v3419_v48  ;;  %v140_v48 = vld [vmem:[#allocation2 + $0x298] sm:$0xff] }
 0x116   :  { %v3287_v51 = vcombine.high %v140_v48, %v144_v49  ;;  %v248_v45 = vld [vmem:[#allocation2 + $0x5f8] sm:$0xff] }
 0x118   :  { %1810 = vmatpush1.bf16.msra.mxu1 %v3418_v53  ;;  %v152_v53 = vld [vmem:[#allocation2 + $0x2f8] sm:$0xff] }
 0x119   :  { %1811 = vmatprep.subr.bf16.mxu1 %v3427_v54  ;;  %v3286_v54 = vcombine.low %v140_v48, %v144_v49  ;;  %v3295_v55 = vcombine.high %v148_v52, %v152_v53 }
 0x11c   :  { %1812 = vmatpush1.bf16.msra.mxu1 %v3426_v57  ;;  %v160_v57 = vld [vmem:[#allocation2 + $0x338] sm:$0xff] }
 0x11d   :  { %1813 = vmatprep.subr.bf16.mxu1 %v3435_v58  ;;  %v3294_v58 = vcombine.low %v148_v52, %v152_v53  ;;  %v3303_v59 = vcombine.high %v156_v56, %v160_v57  ;;  %v3391_v53 = vcombine.high %v244_v44, %v248_v45 }
 0x120   :  { %1814 = vmatpush1.bf16.msra.mxu1 %v3434_v61  ;;  %v168_v61 = vld [vmem:[#allocation2 + $0x378] sm:$0xff] }
 0x121   :  { %1815 = vmatprep.subr.bf16.mxu1 %v3443_v62  ;;  %v3302_v62 = vcombine.low %v156_v56, %v160_v57  ;;  %v3311_v63 = vcombine.high %v164_v60, %v168_v61  ;;  %v256_v56 = vld [vmem:[#allocation2 + $0x638] sm:$0xff] }
 0x124   :  { %1816 = vmatpush1.bf16.msra.mxu1 %v3442_v1  ;;  %v176_v1 = vld [vmem:[#allocation2 + $0x3b8] sm:$0xff] }
 0x125   :  { %1817 = vmatprep.subr.bf16.mxu1 %v3451_v2  ;;  %v3310_v2 = vcombine.low %v164_v60, %v168_v61  ;;  %v3319_v4 = vcombine.high %v172_v0, %v176_v1  ;;  %v260_v61 = vld [vmem:[#allocation2 + $0x658] sm:$0xff] }
 0x128   :  { %1818 = vmatpush1.bf16.msra.mxu1 %v3450_v6  ;;  %v184_v6 = vld [vmem:[#allocation2 + $0x3f8] sm:$0xff] }
 0x129   :  { %1910 = vmatprep.subr.bf16.mxu1 %v3207_v8  ;;  %v3318_v8 = vcombine.low %v172_v0, %v176_v1  ;;  %v3327_v9 = vcombine.high %v180_v5, %v184_v6  ;;  %v268_v1 = vld [vmem:[#allocation2 + $0x698] sm:$0xff] }
 0x12b   :  { %1820 = vmatmul.mubr.bf16.vlgmr.msra.gmra.mrb[4].mxu1 %v4082_v11 }
 0x12c   :  { %1911 = vmatpush1.bf16.msra.mxu1 %v3206_v12  ;;  %1942 = vmatprep.mubr.bf16.mxu1 %v4064_v27  ;;  %v3247_v27 = vcombine.high %v100_v29, %v104_v30  ;;  %v192_v12 = vld [vmem:[#allocation2 + $0x438] sm:$0xff] }
 0x12d   :  { %1912 = vmatprep.subr.bf16.mxu1 %v3215_v20  ;;  %v3326_v20 = vcombine.low %v180_v5, %v184_v6  ;;  %v3335_v23 = vcombine.high %v188_v10, %v192_v12  ;;  %v220_v29 = vld [vmem:[#allocation2 + $0x518] sm:$0xff] }
 0x12e   :  { %v224_v30 = vld [vmem:[#allocation2 + $0x538] sm:$0xff] }
 0x12f   :  { %v276_v6 = vld [vmem:[#allocation2 + $0x6d8] sm:$0xff] }
 0x130   :  { %1913 = vmatpush1.bf16.msra.mxu1 %v3214_v16  ;;  %v3334_v16 = vcombine.low %v188_v10, %v192_v12 }
 0x131   :  { %1914 = vmatprep.subr.bf16.mxu1 %v3223_v17  ;;  %v3343_v17 = vcombine.high %v196_v13, %v200_v15 }
 0x134   :  { %1915 = vmatpush1.bf16.msra.mxu1 %v3222_v21  ;;  %v3342_v21 = vcombine.low %v196_v13, %v200_v15 }
 0x135   :  { %1916 = vmatprep.subr.bf16.mxu1 %v3231_v22  ;;  %v3351_v22 = vcombine.high %v204_v18, %v208_v19 }
 0x138   :  { %1917 = vmatpush1.bf16.msra.mxu1 %v3230_v26  ;;  %v3350_v26 = vcombine.low %v204_v18, %v208_v19 }
 0x139   :  { %1918 = vmatprep.subr.bf16.mxu1 %v3239_v28  ;;  %v3359_v28 = vcombine.high %v212_v24, %v216_v25 }
 0x13c   :  { %1919 = vmatpush1.bf16.msra.mxu1 %v3238_v31  ;;  %v3358_v31 = vcombine.low %v212_v24, %v216_v25  ;;  %v3727_v24 = vld [vmem:[#allocation5 + $0x100] ss:$8 sps:$4 sm:$0xff]  }
 0x13d   :  { %1920 = vmatprep.subr.bf16.mxu1 %v3247_v27  ;;  %v3367_v27 = vcombine.high %v220_v29, %v224_v30 }
 0x140   :  { %1921 = vmatpush1.bf16.msra.mxu1 %v3246_v34  ;;  %v4097_v34 = vld [vmem:[%s4197_s2] sm:$0xff] }
 0x141   :  { %1922 = vmatprep.subr.bf16.mxu1 %v3255_v35  ;;  %v321_v35 = vsub.s32 1, %v4051_v14 }
 0x143   :  { %v322_v40 = vrot.slane %v4097_v34, %v321_v35 }
 0x144   :  { %1923 = vmatpush1.bf16.msra.mxu1 %v3254_v38  ;;  %v240_v38 = vld [vmem:[#allocation2 + $0x5b8] sm:$0xff] }
 0x145   :  { %1924 = vmatprep.subr.bf16.mxu1 %v3263_v39  ;;  %v318_v39 = vrot.slane %v4097_v34, %v317_v33 }
 0x148   :  { %1925 = vmatpush1.bf16.msra.mxu1 %v3262_v42  ;;  %v3383_v42 = vcombine.high %v236_v37, %v240_v38 }
 0x149   :  { %1926 = vmatprep.subr.bf16.mxu1 %v3271_v43 }
 0x14c   :  { %1927 = vmatpush1.bf16.msra.mxu1 %v3270_v46 }
 0x14d   :  { %1928 = vmatprep.subr.bf16.mxu1 %v3279_v47 }
 0x150   :  { %1929 = vmatpush1.bf16.msra.mxu1 %v3278_v50  ;;  %v3382_v50 = vcombine.low %v236_v37, %v240_v38  ;;  %v3735_v37 = vld [vmem:[#allocation5 + $0x124] ss:$8 sps:$4 sm:$0xff]   ;;  %v300_v38 = vld [vmem:[#allocation2 + $0x798] sm:$0xff] }
 0x151   :  { %1930 = vmatprep.subr.bf16.mxu1 %v3287_v51 }
 0x154   :  { %1931 = vmatpush1.bf16.msra.mxu1 %v3286_v54 }
 0x155   :  { %1932 = vmatprep.subr.bf16.mxu1 %v3295_v55  ;;  %v252_v55 = vld [vmem:[#allocation2 + $0x618] sm:$0xff] }
 0x156   :  { %v3399_v60 = vcombine.high %v252_v55, %v256_v56 }
 0x158   :  { %1933 = vmatpush1.bf16.msra.mxu1 %v3294_v58 }
 0x159   :  { %1934 = vmatprep.subr.bf16.mxu1 %v3303_v59  ;;  %v3390_v59 = vcombine.low %v244_v44, %v248_v45  ;;  %v308_v44 = vld [vmem:[#allocation2 + $0x7d8] sm:$0xff] }
 0x15a   :  { %v312_v45 = vld [vmem:[#allocation2 + $0x7f8] sm:$0xff] }
 0x15c   :  { %1935 = vmatpush1.bf16.msra.mxu1 %v3302_v62  ;;  %v264_v62 = vld [vmem:[#allocation2 + $0x678] sm:$0xff] }
 0x15d   :  { %1936 = vmatprep.subr.bf16.mxu1 %v3311_v63  ;;  %v3398_v63 = vcombine.low %v252_v55, %v256_v56  ;;  %v3407_v0 = vcombine.high %v260_v61, %v264_v62  ;;  %v3745_v55 = vld [vmem:[#allocation5 + $0x160] ss:$8 sps:$4 sm:$0xff]   ;;  %v3750_v56 = vld [vmem:[#allocation5 + $0x174] ss:$8 sps:$4 sm:$0xff]  }
 0x160   :  { %1937 = vmatpush1.bf16.msra.mxu1 %v3310_v2  ;;  %v272_v2 = vld [vmem:[#allocation2 + $0x6b8] sm:$0xff] }
 0x161   :  { %1938 = vmatprep.subr.bf16.mxu1 %v3319_v4  ;;  %v3406_v4 = vcombine.low %v260_v61, %v264_v62  ;;  %v3415_v5 = vcombine.high %v268_v1, %v272_v2  ;;  %v3754_v61 = vld [vmem:[#allocation5 + $0x190] ss:$8 sps:$4 sm:$0xff]   ;;  %v3759_v62 = vld [vmem:[#allocation5 + $0x1a4] ss:$8 sps:$4 sm:$0xff]  }
 0x164   :  { %1939 = vmatpush1.bf16.msra.mxu1 %v3318_v8  ;;  %v280_v8 = vld [vmem:[#allocation2 + $0x6f8] sm:$0xff] }
 0x165   :  { %1940 = vmatprep.subr.bf16.mxu1 %v3327_v9  ;;  %v3423_v13 = vcombine.high %v276_v6, %v280_v8 }
 0x168   :  { %1941 = vmatpush1.bf16.msra.mxu1 %v3326_v20  ;;  %v3414_v20 = vcombine.low %v268_v1, %v272_v2  ;;  %v3765_v1 = vld [vmem:[#allocation5 + $0x1c4] ss:$8 sps:$4 sm:$0xff]   ;;  %v3763_v2 = vld [vmem:[#allocation5 + $0x1c0] ss:$8 sps:$4 sm:$0xff]  }
 0x169   :  { %1951 = vmatprep.subr.bf16.mxu1 %v3335_v23 }
 0x16b   :  { %1943 = vmatmul.mubr.bf16.vlgmr.msra.gmra.mrb[8].mxu1 %v4070_v3  ;;  %v232_v3 = vld [vmem:[#allocation2 + $0x578] sm:$0xff] }
 0x16c   :  { %1952 = vmatpush1.bf16.msra.mxu1 %v3334_v16  ;;  %1983 = vmatprep.mubr.bf16.mxu1 %v4074_v7  ;;  %v3366_v7 = vcombine.low %v220_v29, %v224_v30  ;;  %v3375_v36 = vcombine.high %v228_v32, %v232_v3  ;;  %v3374_v41 = vcombine.low %v228_v32, %v232_v3  ;;  %v284_v16 = vld [vmem:[#allocation2 + $0x718] sm:$0xff] }
 0x16d   :  { %1953 = vmatprep.subr.bf16.mxu1 %v3343_v17  ;;  %v288_v17 = vld [vmem:[#allocation2 + $0x738] sm:$0xff] }
 0x16e   :  { %v3732_v29 = vld [vmem:[#allocation5 + $0x114] ss:$8 sps:$4 sm:$0xff]   ;;  %v3430_v3 = vcombine.low %v284_v16, %v288_v17 }
 0x170   :  { %1954 = vmatpush1.bf16.msra.mxu1 %v3342_v21 }
 0x171   :  { %1955 = vmatprep.subr.bf16.mxu1 %v3351_v22  ;;  %v3422_v22 = vcombine.low %v276_v6, %v280_v8  ;;  %v3771_v6 = vld [vmem:[#allocation5 + $0x1e4] ss:$8 sps:$4 sm:$0xff]   ;;  %v3769_v8 = vld [vmem:[#allocation5 + $0x1e0] ss:$8 sps:$4 sm:$0xff]  }
 0x174   :  { %1956 = vmatpush1.bf16.msra.mxu1 %v3350_v26 }
 0x175   :  { %1957 = vmatprep.subr.bf16.mxu1 %v3359_v28  ;;  %v3431_v28 = vcombine.high %v284_v16, %v288_v17  ;;  %v329_v16 = vsub.s32 3, %v4051_v14 }
 0x178   :  { %1958 = vmatpush1.bf16.msra.mxu1 %v3358_v31  ;;  %v292_v31 = vld [vmem:[#allocation2 + $0x758] sm:$0xff] }
 0x179   :  { %1959 = vmatprep.subr.bf16.mxu1 %v3367_v27  ;;  %v296_v27 = vld [vmem:[#allocation2 + $0x778] sm:$0xff] }
 0x17c   :  { %1960 = vmatpush1.bf16.msra.mxu1 %v3366_v7  ;;  %v3730_v7 = vld [vmem:[#allocation5 + $0x110] ss:$8 sps:$4 sm:$0xff]  }
 0x17d   :  { %1961 = vmatprep.subr.bf16.mxu1 %v3375_v36  ;;  %v3439_v36 = vcombine.high %v292_v31, %v296_v27 }
 0x17e   :  { %v1739_v43 = vpop.f32.mrb[0].mxu1 }
 0x17f   :  { %v3633_v46 = vadd.f32 %v1739_v43, %v318_v39  ;;  %v1741_v47 = vpop.f32.mrb[1].mxu1  ;;  %v304_v39 = vld [vmem:[#allocation2 + $0x7b8] sm:$0xff] }
 0x180   :  { %v3634_v48 = vadd.f32 %v1741_v47, %v322_v40  ;;  %v1743_v49 = vpop.f32.mrb[2].mxu1  ;;  %1962 = vmatpush1.bf16.msra.mxu1 %v3374_v41  ;;  %v4106_v19 = vpop.f32.mrb[0].mxu0  ;;  %v3438_v40 = vcombine.low %v292_v31, %v296_v27  ;;  %v3733_v41 = vld [vmem:[#allocation5 + $0x120] ss:$8 sps:$4 sm:$0xff]   ;;  %v3738_v43 = vld [vmem:[#allocation5 + $0x134] ss:$8 sps:$4 sm:$0xff]  }
 0x181   :  { %v2000_v51 = vmin.f32 %v3633_v46, 0.0  ;;  %v1744_v52 = vpop.f32.mrb[3].mxu1  ;;  %1963 = vmatprep.subr.bf16.mxu1 %v3383_v42  ;;  %vm1992_vm0 = vcmp.gt.f32.partialorder %v3633_v46, 0.0  ;;  %v4108_v25 = vpop.f32.mrb[1].mxu0  ;;  %v3447_v42 = vcombine.high %v300_v38, %v304_v39  ;;  %v3736_v47 = vld [vmem:[#allocation5 + $0x130] ss:$8 sps:$4 sm:$0xff]  }
 0x182   :  { %v2001_v54 = vmin.f32 %v3634_v48, 0.0  ;;  %vm1993_vm1 = vcmp.gt.f32.partialorder %v3634_v48, 0.0  ;;  %v1907_v30 = vpop.f32.mrb[2].mxu0  ;;  %v3741_v49 = vld [vmem:[#allocation5 + $0x144] ss:$8 sps:$4 sm:$0xff]  }
 0x183   :  { %v2008_v57 = vmul.f32 1.442695, %v2000_v51  ;;  %v1908_v32 = vpop.f32.mrb[3].mxu0  ;;  %v3739_v51 = vld [vmem:[#allocation5 + $0x140] ss:$8 sps:$4 sm:$0xff]  }
 0x184   :  { %v2010_v58 = vmul.f32 1.442695, %v2001_v54  ;;  %1964 = vmatpush1.bf16.msra.mxu1 %v3382_v50  ;;  %v3454_v50 = vcombine.low %v308_v44, %v312_v45  ;;  %v3744_v52 = vld [vmem:[#allocation5 + $0x154] ss:$8 sps:$4 sm:$0xff]   ;;  %v3747_v54 = vld [vmem:[#allocation5 + $0x164] ss:$8 sps:$4 sm:$0xff]  }
 0x185   :  { %3887 = vpow2.f32 %v2008_v57  ;;  %1965 = vmatprep.subr.bf16.mxu1 %v3391_v53  ;;  %v3742_v53 = vld [vmem:[#allocation5 + $0x150] ss:$8 sps:$4 sm:$0xff]  }
 0x186   :  { %3889 = vpow2.f32 %v2010_v58  ;;  %v3748_v57 = vld [vmem:[#allocation5 + $0x170] ss:$8 sps:$4 sm:$0xff]   ;;  %v3753_v58 = vld [vmem:[#allocation5 + $0x184] ss:$8 sps:$4 sm:$0xff]  }
 0x188   :  { %1966 = vmatpush1.bf16.msra.mxu1 %v3390_v59  ;;  %v3751_v59 = vld [vmem:[#allocation5 + $0x180] ss:$8 sps:$4 sm:$0xff]  }
 0x189   :  { %1967 = vmatprep.subr.bf16.mxu1 %v3399_v60  ;;  %v3756_v60 = vld [vmem:[#allocation5 + $0x194] ss:$8 sps:$4 sm:$0xff]  }
 0x18c   :  { %1968 = vmatpush1.bf16.msra.mxu1 %v3398_v63  ;;  %v3757_v63 = vld [vmem:[#allocation5 + $0x1a0] ss:$8 sps:$4 sm:$0xff]  }
 0x18d   :  { %1969 = vmatprep.subr.bf16.mxu1 %v3407_v0  ;;  %v3760_v0 = vld [vmem:[#allocation5 + $0x1b0] ss:$8 sps:$4 sm:$0xff]  }
 0x18f   :  { %v3888_v9 = vpop.eup %3887 }
 0x190   :  { %v3890_v10 = vpop.eup %3889  ;;  %v3456_v12 = vadd.f32 -1.0, %v3888_v9  ;;  %1970 = vmatpush1.bf16.msra.mxu1 %v3406_v4  ;;  %v3768_v4 = vld [vmem:[#allocation5 + $0x1d4] ss:$8 sps:$4 sm:$0xff]  }
 0x191   :  { %1971 = vmatprep.subr.bf16.mxu1 %v3415_v5  ;;  %v3457_v23 = vadd.f32 -1.0, %v3890_v10  ;;  %v3766_v5 = vld [vmem:[#allocation5 + $0x1d0] ss:$8 sps:$4 sm:$0xff]   ;;  %v3774_v9 = vld [vmem:[#allocation5 + $0x1f4] ss:$8 sps:$4 sm:$0xff]  }
 0x192   :  { %v2032_v15 = vsel %vm1992_vm0, %v3633_v46, %v3456_v12  ;;  %v3446_v46 = vcombine.low %v300_v38, %v304_v39  ;;  %v3772_v10 = vld [vmem:[#allocation5 + $0x1f0] ss:$8 sps:$4 sm:$0xff]   ;;  %v3777_v12 = vld [vmem:[#allocation5 + $0x204] ss:$8 sps:$4 sm:$0xff]  }
 0x193   :  { %v2033_v18 = vsel %vm1993_vm1, %v3634_v48, %v3457_v23  ;;  %v2040_v26 = vpack.c.bf16 %v2032_v15, %v2032_v15  ;;  %v3455_v48 = vcombine.high %v308_v44, %v312_v45  ;;  %v325_v15 = vsub.s32 2, %v4051_v14  ;;  %v3775_v45 = vld [vmem:[#allocation5 + $0x200] ss:$8 sps:$4 sm:$0xff]  }
 0x194   :  { %1972 = vmatpush1.bf16.msra.mxu1 %v3414_v20  ;;  %v2041_v21 = vpack.c.bf16 %v2033_v18, %v2033_v18  ;;  %v337_v20 = vsub.s32 5, %v4051_v14 }
 0x195   :  { %1973 = vmatprep.subr.bf16.mxu1 %v3423_v13  ;;  %v326_v18 = vrot.slane %v4097_v34, %v325_v15  ;;  %v3808_v15 = vld [vmem:[#allocation5 + $0x2b0] ss:$8 sps:$4 sm:$0xff]  }
 0x196   :  { %2860 = vmatprep.mubr.bf16.mxu0 %v2041_v21  ;;  %v338_v23 = vrot.slane %v4097_v34, %v337_v20  ;;  %v330_v21 = vrot.slane %v4097_v34, %v329_v16  ;;  %v3805_v20 = vld [vmem:[#allocation5 + $0x2a0] ss:$8 sps:$4 sm:$0xff]   ;;  %v3813_v16 = vld [vmem:[#allocation5 + $0x2c4] ss:$8 sps:$4 sm:$0xff]  }
 0x197   :  { %2861 = vmatmul.mubr.bf16.vlgmr.msra.gmra.mrb[4].mxu0 %v2040_v26 }
 0x198   :  { %1974 = vmatpush1.bf16.msra.mxu1 %v3422_v22  ;;  %2870 = vmatpush1.bf16.msra.mxu0 %v3727_v24  ;;  %v3638_v13 = vadd.f32 %v4108_v25, %v338_v23 }
 0x199   :  { %1975 = vmatprep.subr.bf16.mxu1 %v3431_v28  ;;  %2871 = vmatprep.subr.bf16.mxu0 %v3732_v29 }
 0x19a   :  { %v2005_v17 = vmin.f32 %v3638_v13, 0.0  ;;  %vm1997_vm2 = vcmp.gt.f32.partialorder %v3638_v13, 0.0 }
 0x19c   :  { %1976 = vmatpush1.bf16.msra.mxu1 %v3430_v3  ;;  %2872 = vmatpush1.bf16.msra.mxu0 %v3730_v7  ;;  %v2018_v22 = vmul.f32 1.442695, %v2005_v17  ;;  %v3811_v17 = vld [vmem:[#allocation5 + $0x2c0] ss:$8 sps:$4 sm:$0xff]  }
 0x19d   :  { %1977 = vmatprep.subr.bf16.mxu1 %v3439_v36  ;;  %2873 = vmatprep.subr.bf16.mxu0 %v3735_v37 }
 0x19e   :  { %3891 = vpow2.f32 %v2018_v22 }
 0x1a0   :  { %1978 = vmatpush1.bf16.msra.mxu1 %v3438_v40  ;;  %2874 = vmatpush1.bf16.msra.mxu0 %v3733_v41 }
 0x1a1   :  { %1979 = vmatprep.subr.bf16.mxu1 %v3447_v42  ;;  %2875 = vmatprep.subr.bf16.mxu0 %v3738_v43 }
 0x1a4   :  { %1980 = vmatpush1.bf16.msra.mxu1 %v3446_v46  ;;  %2876 = vmatpush1.bf16.msra.mxu0 %v3736_v47  ;;  %v3780_v47 = vld [vmem:[#allocation5 + $0x214] ss:$8 sps:$4 sm:$0xff]  }
 0x1a5   :  { %1981 = vmatprep.subr.bf16.mxu1 %v3455_v48  ;;  %2877 = vmatprep.subr.bf16.mxu0 %v3741_v49  ;;  %v3871_v49 = vld [vmem:[%s4200_s5 + $0x40] sm:$0xff]  }
 0x1a8   :  { %1982 = vmatpush1.bf16.msra.mxu1 %v3454_v50  ;;  %2878 = vmatpush1.bf16.msra.mxu0 %v3739_v51  ;;  %v3892_v7 = vpop.eup %3891  ;;  %v3872_v50 = vld [vmem:[%s4200_s5] sm:$0xff]   ;;  %v3873_v51 = vld [vmem:[%s4200_s5 + $0x48] sm:$0xff]  }
 0x1a9   :  { %2879 = vmatprep.subr.bf16.mxu0 %v3744_v52  ;;  %v3461_v37 = vadd.f32 -1.0, %v3892_v7  ;;  %v3778_v52 = vld [vmem:[#allocation5 + $0x210] ss:$8 sps:$4 sm:$0xff]   ;;  %3611 = vmatprep.subr.bf16.mxu1 %v3871_v49  ;;  %v3831_v7 = vld [vmem:[#allocation5 + $0x324] ss:$8 sps:$4 sm:$0xff]  }
 0x1aa   :  { %v3852_v49 = vld [vmem:[#allocation5 + $0x394] ss:$8 sps:$4 sm:$0xff]  }
 0x1ab   :  { %1984 = vmatmul.mubr.bf16.vlgmr.msra.gmra.mrb[8].mxu1 %v4082_v11  ;;  %v3762_v11 = vld [vmem:[#allocation5 + $0x1b4] ss:$8 sps:$4 sm:$0xff]   ;;  %v2037_v43 = vsel %vm1997_vm2, %v3638_v13, %v3461_v37 }
 0x1ac   :  { %2880 = vmatpush1.bf16.msra.mxu0 %v3742_v53  ;;  %v2045_v48 = vpack.c.bf16 %v2037_v43, %v2037_v43  ;;  %v3783_v53 = vld [vmem:[#allocation5 + $0x224] ss:$8 sps:$4 sm:$0xff]   ;;  %3612 = vmatpush3.bf16.msra.mxu1 %v3872_v50  ;;  %v3810_v13 = vld [vmem:[#allocation5 + $0x2b4] ss:$8 sps:$4 sm:$0xff]   ;;  %v341_v50 = vsub.s32 6, %v4051_v14 }
 0x1ad   :  { %2881 = vmatprep.subr.bf16.mxu0 %v3747_v54  ;;  %v3874_v54 = vld [vmem:[%s4200_s5 + $0x8] sm:$0xff]   ;;  %3613 = vmatprep.subr.bf16.mxu1 %v3873_v51  ;;  %v3834_v37 = vld [vmem:[#allocation5 + $0x334] ss:$8 sps:$4 sm:$0xff]   ;;  %v3850_v51 = vld [vmem:[#allocation5 + $0x390] ss:$8 sps:$4 sm:$0xff]  }
 0x1ae   :  { %v3843_v43 = vld [vmem:[#allocation5 + $0x364] ss:$8 sps:$4 sm:$0xff]  }
 0x1b0   :  { %2882 = vmatpush1.bf16.msra.mxu0 %v3745_v55  ;;  %v3781_v55 = vld [vmem:[#allocation5 + $0x220] ss:$8 sps:$4 sm:$0xff]   ;;  %3614 = vmatpush3.bf16.msra.mxu1 %v3874_v54  ;;  %v342_v54 = vrot.slane %v4097_v34, %v341_v50 }
 0x1b1   :  { %2883 = vmatprep.subr.bf16.mxu0 %v3750_v56  ;;  %v3786_v56 = vld [vmem:[#allocation5 + $0x234] ss:$8 sps:$4 sm:$0xff]  }
 0x1b4   :  { %2884 = vmatpush1.bf16.msra.mxu0 %v3748_v57  ;;  %v3784_v57 = vld [vmem:[#allocation5 + $0x230] ss:$8 sps:$4 sm:$0xff]  }
 0x1b5   :  { %2885 = vmatprep.subr.bf16.mxu0 %v3753_v58  ;;  %v3789_v58 = vld [vmem:[#allocation5 + $0x244] ss:$8 sps:$4 sm:$0xff]  }
 0x1b8   :  { %2886 = vmatpush1.bf16.msra.mxu0 %v3751_v59  ;;  %v3787_v59 = vld [vmem:[#allocation5 + $0x240] ss:$8 sps:$4 sm:$0xff]  }
 0x1b9   :  { %2887 = vmatprep.subr.bf16.mxu0 %v3756_v60  ;;  %v3792_v60 = vld [vmem:[#allocation5 + $0x254] ss:$8 sps:$4 sm:$0xff]  }
 0x1bc   :  { %2888 = vmatpush1.bf16.msra.mxu0 %v3754_v61  ;;  %v3790_v61 = vld [vmem:[#allocation5 + $0x250] ss:$8 sps:$4 sm:$0xff]  }
 0x1bd   :  { %2889 = vmatprep.subr.bf16.mxu0 %v3759_v62  ;;  %v3795_v62 = vld [vmem:[#allocation5 + $0x264] ss:$8 sps:$4 sm:$0xff]  }
 0x1c0   :  { %2890 = vmatpush1.bf16.msra.mxu0 %v3757_v63  ;;  %v3793_v63 = vld [vmem:[#allocation5 + $0x260] ss:$8 sps:$4 sm:$0xff]  }
 0x1c1   :  { %2891 = vmatprep.subr.bf16.mxu0 %v3762_v11  ;;  %v333_v11 = vsub.s32 4, %v4051_v14 }
 0x1c4   :  { %2892 = vmatpush1.bf16.msra.mxu0 %v3760_v0  ;;  %v3798_v0 = vld [vmem:[#allocation5 + $0x274] ss:$8 sps:$4 sm:$0xff]  }
 0x1c5   :  { %2893 = vmatprep.subr.bf16.mxu0 %v3765_v1  ;;  %v3796_v1 = vld [vmem:[#allocation5 + $0x270] ss:$8 sps:$4 sm:$0xff]  }
 0x1c8   :  { %2894 = vmatpush1.bf16.msra.mxu0 %v3763_v2  ;;  %v334_v2 = vrot.slane %v4097_v34, %v333_v11 }
 0x1c9   :  { %2895 = vmatprep.subr.bf16.mxu0 %v3768_v4  ;;  %v3801_v4 = vld [vmem:[#allocation5 + $0x284] ss:$8 sps:$4 sm:$0xff]  }
 0x1cc   :  { %2896 = vmatpush1.bf16.msra.mxu0 %v3766_v5  ;;  %v3799_v5 = vld [vmem:[#allocation5 + $0x280] ss:$8 sps:$4 sm:$0xff]  }
 0x1cd   :  { %2897 = vmatprep.subr.bf16.mxu0 %v3771_v6  ;;  %v3637_v6 = vadd.f32 %v4106_v19, %v334_v2  ;;  %v3816_v19 = vld [vmem:[#allocation5 + $0x2d4] ss:$8 sps:$4 sm:$0xff]  }
 0x1cf   :  { %vm1996_vm5 = vcmp.gt.f32.partialorder %v3637_v6, 0.0 }
 0x1d0   :  { %2898 = vmatpush1.bf16.msra.mxu0 %v3769_v8  ;;  %v3804_v8 = vld [vmem:[#allocation5 + $0x294] ss:$8 sps:$4 sm:$0xff]  }
 0x1d1   :  { %2899 = vmatprep.subr.bf16.mxu0 %v3774_v9  ;;  %v3802_v9 = vld [vmem:[#allocation5 + $0x290] ss:$8 sps:$4 sm:$0xff]  }
 0x1d4   :  { %2900 = vmatpush1.bf16.msra.mxu0 %v3772_v10  ;;  %v2004_v10 = vmin.f32 %v3637_v6, 0.0 }
 0x1d5   :  { %2910 = vmatprep.subr.bf16.mxu0 %v3777_v12  ;;  %v3807_v12 = vld [vmem:[#allocation5 + $0x2a4] ss:$8 sps:$4 sm:$0xff]  }
 0x1d6   :  { %v2016_v23 = vmul.f32 1.442695, %v2004_v10  ;;  %v3865_v10 = vld [vmem:[#allocation5 + $0x3e0] ss:$8 sps:$4 sm:$0xff]  }
 0x1fe   :  { %v1821_v24 = vpop.f32.mrb[4].mxu1 }
 0x1ff   :  { %v3635_v26 = vadd.f32 %v1821_v24, %v326_v18  ;;  %v1823_v28 = vpop.f32.mrb[5].mxu1  ;;  %v3814_v18 = vld [vmem:[#allocation5 + $0x2d0] ss:$8 sps:$4 sm:$0xff]   ;;  %v3817_v24 = vld [vmem:[#allocation5 + $0x2e0] ss:$8 sps:$4 sm:$0xff]  }
 0x200   :  { %v3636_v29 = vadd.f32 %v1823_v28, %v330_v21  ;;  %v1825_v30 = vpop.f32.mrb[6].mxu1  ;;  %v3819_v21 = vld [vmem:[#allocation5 + $0x2e4] ss:$8 sps:$4 sm:$0xff]  }
 0x201   :  { %v2002_v31 = vmin.f32 %v3635_v26, 0.0  ;;  %v1826_v27 = vpop.f32.mrb[7].mxu1  ;;  %vm1994_vm3 = vcmp.gt.f32.partialorder %v3635_v26, 0.0  ;;  %v3825_v30 = vld [vmem:[#allocation5 + $0x304] ss:$8 sps:$4 sm:$0xff]  }
 0x202   :  { %v2003_v32 = vmin.f32 %v3636_v29, 0.0  ;;  %vm1995_vm4 = vcmp.gt.f32.partialorder %v3636_v29, 0.0  ;;  %v3823_v27 = vld [vmem:[#allocation5 + $0x300] ss:$8 sps:$4 sm:$0xff]  }
 0x203   :  { %v2012_v25 = vmul.f32 1.442695, %v2002_v31 }
 0x204   :  { %v2014_v3 = vmul.f32 1.442695, %v2003_v32 }
 0x205   :  { %3893 = vpow2.f32 %v2012_v25  ;;  %v3828_v25 = vld [vmem:[#allocation5 + $0x314] ss:$8 sps:$4 sm:$0xff]  }
 0x206   :  { %3895 = vpow2.f32 %v2014_v3  ;;  %v3826_v3 = vld [vmem:[#allocation5 + $0x310] ss:$8 sps:$4 sm:$0xff]  }
 0x207   :  { %3897 = vpow2.f32 %v2016_v23 }
 0x20f   :  { %v3894_v36 = vpop.eup %3893 }
 0x210   :  { %v3896_v38 = vpop.eup %3895  ;;  %v3458_v39 = vadd.f32 -1.0, %v3894_v36  ;;  %v3829_v36 = vld [vmem:[#allocation5 + $0x320] ss:$8 sps:$4 sm:$0xff]  }
 0x211   :  { %v3459_v40 = vadd.f32 -1.0, %v3896_v38  ;;  %v3898_v22 = vpop.eup %3897  ;;  %v3832_v38 = vld [vmem:[#allocation5 + $0x330] ss:$8 sps:$4 sm:$0xff]  }
 0x212   :  { %v2034_v41 = vsel %vm1994_vm3, %v3635_v26, %v3458_v39  ;;  %v3822_v26 = vld [vmem:[#allocation5 + $0x2f4] ss:$8 sps:$4 sm:$0xff]   ;;  %v3460_v28 = vadd.f32 -1.0, %v3898_v22  ;;  %v3837_v39 = vld [vmem:[#allocation5 + $0x344] ss:$8 sps:$4 sm:$0xff]  }
 0x213   :  { %v2035_v42 = vsel %vm1995_vm4, %v3636_v29, %v3459_v40  ;;  %v2042_v46 = vpack.c.bf16 %v2034_v41, %v2034_v41  ;;  %v3820_v29 = vld [vmem:[#allocation5 + $0x2f0] ss:$8 sps:$4 sm:$0xff]   ;;  %v3835_v40 = vld [vmem:[#allocation5 + $0x340] ss:$8 sps:$4 sm:$0xff]   ;;  %v3840_v41 = vld [vmem:[#allocation5 + $0x354] ss:$8 sps:$4 sm:$0xff]  }
 0x214   :  { %v2043_v44 = vpack.c.bf16 %v2035_v42, %v2035_v42  ;;  %v2036_v31 = vsel %vm1996_vm5, %v3637_v6, %v3460_v28  ;;  %v3838_v42 = vld [vmem:[#allocation5 + $0x350] ss:$8 sps:$4 sm:$0xff]   ;;  %v3859_v6 = vld [vmem:[#allocation5 + $0x3c0] ss:$8 sps:$4 sm:$0xff]  }
 0x215   :  { %v2044_v32 = vpack.c.bf16 %v2036_v31, %v2036_v31  ;;  %v3875_v22 = vld [vmem:[%s4200_s5 + $0x50] sm:$0xff]   ;;  %v3878_v28 = vld [vmem:[%s4200_s5 + $0x18] sm:$0xff]   ;;  %v3881_v31 = vld [vmem:[%s4200_s5 + $0x68] sm:$0xff]  }
 0x216   :  { %2901 = vmatprep.mubr.bf16.mxu0 %v2043_v44  ;;  %v3841_v44 = vld [vmem:[#allocation5 + $0x360] ss:$8 sps:$4 sm:$0xff]   ;;  %3615 = vmatprep.subr.bf16.mxu1 %v3875_v22 }
 0x217   :  { %2902 = vmatmul.mubr.bf16.vlgmr.msra.gmra.mrb[4].mxu0 %v2042_v46  ;;  %v3844_v46 = vld [vmem:[#allocation5 + $0x370] ss:$8 sps:$4 sm:$0xff]  }
 0x218   :  { %2911 = vmatpush1.bf16.msra.mxu0 %v3775_v45  ;;  %2942 = vmatprep.mubr.bf16.mxu0 %v2045_v48  ;;  %v3846_v45 = vld [vmem:[#allocation5 + $0x374] ss:$8 sps:$4 sm:$0xff]   ;;  %v3847_v48 = vld [vmem:[#allocation5 + $0x380] ss:$8 sps:$4 sm:$0xff]  }
 0x219   :  { %2912 = vmatprep.subr.bf16.mxu0 %v3780_v47  ;;  %v3849_v47 = vld [vmem:[#allocation5 + $0x384] ss:$8 sps:$4 sm:$0xff]  }
 0x21c   :  { %2913 = vmatpush1.bf16.msra.mxu0 %v3778_v52  ;;  %v345_v52 = vsub.s32 7, %v4051_v14 }
 0x21d   :  { %2914 = vmatprep.subr.bf16.mxu0 %v3783_v53  ;;  %v3855_v53 = vld [vmem:[#allocation5 + $0x3a4] ss:$8 sps:$4 sm:$0xff]  }
 0x220   :  { %2915 = vmatpush1.bf16.msra.mxu0 %v3781_v55  ;;  %v346_v55 = vrot.slane %v4097_v34, %v345_v52  ;;  %v3864_v34 = vld [vmem:[#allocation5 + $0x3d4] ss:$8 sps:$4 sm:$0xff]  }
 0x221   :  { %2916 = vmatprep.subr.bf16.mxu0 %v3786_v56  ;;  %v3853_v56 = vld [vmem:[#allocation5 + $0x3a0] ss:$8 sps:$4 sm:$0xff]  }
 0x224   :  { %2917 = vmatpush1.bf16.msra.mxu0 %v3784_v57  ;;  %v3858_v57 = vld [vmem:[#allocation5 + $0x3b4] ss:$8 sps:$4 sm:$0xff]  }
 0x225   :  { %2918 = vmatprep.subr.bf16.mxu0 %v3789_v58 }
 0x228   :  { %2919 = vmatpush1.bf16.msra.mxu0 %v3787_v59 }
 0x229   :  { %2920 = vmatprep.subr.bf16.mxu0 %v3792_v60 }
 0x22c   :  { %2921 = vmatpush1.bf16.msra.mxu0 %v3790_v61 }
 0x22d   :  { %2922 = vmatprep.subr.bf16.mxu0 %v3795_v62 }
 0x230   :  { %2923 = vmatpush1.bf16.msra.mxu0 %v3793_v63  ;;  %v3856_v63 = vld [vmem:[#allocation5 + $0x3b0] ss:$8 sps:$4 sm:$0xff]  }
 0x231   :  { %2924 = vmatprep.subr.bf16.mxu0 %v3798_v0 }
 0x234   :  { %2925 = vmatpush1.bf16.msra.mxu0 %v3796_v1  ;;  %v3861_v1 = vld [vmem:[#allocation5 + $0x3c4] ss:$8 sps:$4 sm:$0xff]  }
 0x235   :  { %2926 = vmatprep.subr.bf16.mxu0 %v3801_v4 }
 0x238   :  { %2927 = vmatpush1.bf16.msra.mxu0 %v3799_v5 }
 0x239   :  { %2928 = vmatprep.subr.bf16.mxu0 %v3804_v8  ;;  %v3862_v8 = vld [vmem:[#allocation5 + $0x3d0] ss:$8 sps:$4 sm:$0xff]  }
 0x23c   :  { %2929 = vmatpush1.bf16.msra.mxu0 %v3802_v9  ;;  %v3867_v9 = vld [vmem:[#allocation5 + $0x3e4] ss:$8 sps:$4 sm:$0xff]  }
 0x23d   :  { %2930 = vmatprep.subr.bf16.mxu0 %v3807_v12  ;;  %v3870_v12 = vld [vmem:[#allocation5 + $0x3f4] ss:$8 sps:$4 sm:$0xff]  }
 0x240   :  { %2931 = vmatpush1.bf16.msra.mxu0 %v3805_v20 }
 0x241   :  { %2932 = vmatprep.subr.bf16.mxu0 %v3810_v13 }
 0x244   :  { %2933 = vmatpush1.bf16.msra.mxu0 %v3808_v15  ;;  %v3868_v15 = vld [vmem:[#allocation5 + $0x3f0] ss:$8 sps:$4 sm:$0xff]  }
 0x245   :  { %2934 = vmatprep.subr.bf16.mxu0 %v3813_v16 }
 0x248   :  { %2935 = vmatpush1.bf16.msra.mxu0 %v3811_v17 }
 0x249   :  { %2936 = vmatprep.subr.bf16.mxu0 %v3816_v19 }
 0x24c   :  { %2937 = vmatpush1.bf16.msra.mxu0 %v3814_v18 }
 0x24d   :  { %2938 = vmatprep.subr.bf16.mxu0 %v3819_v21 }
 0x250   :  { %2939 = vmatpush1.bf16.msra.mxu0 %v3817_v24  ;;  %v3876_v24 = vld [vmem:[%s4200_s5 + $0x10] sm:$0xff]  }
 0x251   :  { %2940 = vmatprep.subr.bf16.mxu0 %v3822_v26  ;;  %3616 = vmatpush3.bf16.msra.mxu1 %v3876_v24  ;;  %v3877_v26 = vld [vmem:[%s4200_s5 + $0x58] sm:$0xff]  }
 0x252   :  { %3617 = vmatprep.subr.bf16.mxu1 %v3877_v26 }
 0x254   :  { %2941 = vmatpush1.bf16.msra.mxu0 %v3820_v29  ;;  %v3879_v29 = vld [vmem:[%s4200_s5 + $0x60] sm:$0xff]  }
 0x255   :  { %2951 = vmatprep.subr.bf16.mxu0 %v3825_v30  ;;  %3618 = vmatpush3.bf16.msra.mxu1 %v3878_v28  ;;  %v3880_v30 = vld [vmem:[%s4200_s5 + $0x20] sm:$0xff]  }
 0x256   :  { %3619 = vmatprep.subr.bf16.mxu1 %v3879_v29 }
 0x257   :  { %2943 = vmatmul.mubr.bf16.vlgmr.msra.gmra.mrb[4].mxu0 %v2044_v32  ;;  %v3883_v32 = vld [vmem:[%s4200_s5 + $0x70] sm:$0xff]  }
 0x258   :  { %2952 = vmatpush1.bf16.msra.mxu0 %v3823_v27  ;;  %v3882_v27 = vld [vmem:[%s4200_s5 + $0x28] sm:$0xff]  }
 0x259   :  { %2953 = vmatprep.subr.bf16.mxu0 %v3828_v25  ;;  %3620 = vmatpush3.bf16.msra.mxu1 %v3880_v30  ;;  %v3884_v25 = vld [vmem:[%s4200_s5 + $0x30] sm:$0xff]  }
 0x25a   :  { %3621 = vmatprep.subr.bf16.mxu1 %v3881_v31 }
 0x25c   :  { %2954 = vmatpush1.bf16.msra.mxu0 %v3826_v3  ;;  %v3885_v3 = vld [vmem:[%s4200_s5 + $0x78] sm:$0xff]  }
 0x25d   :  { %2955 = vmatprep.subr.bf16.mxu0 %v3831_v7  ;;  %3622 = vmatpush3.bf16.msra.mxu1 %v3882_v27  ;;  %v3886_v7 = vld [vmem:[%s4200_s5 + $0x38] sm:$0xff]  }
 0x25e   :  { %3623 = vmatprep.subr.bf16.mxu1 %v3883_v32 }
 0x260   :  { %2956 = vmatpush1.bf16.msra.mxu0 %v3829_v36  ;;  %v2176_v36 = vld [vmem:[%s4199_s4] sm:$0x3] }
 0x261   :  { %2957 = vmatprep.subr.bf16.mxu0 %v3834_v37  ;;  %3624 = vmatpush3.bf16.msra.mxu1 %v3884_v25  ;;  %v2181_v37 = vrot.slane %v2176_v36, %v317_v33 }
 0x262   :  { %3625 = vmatprep.subr.bf16.mxu1 %v3885_v3 }
 0x264   :  { %2958 = vmatpush1.bf16.msra.mxu0 %v3832_v38  ;;  %v2185_v38 = vrot.slane %v2176_v36, %v321_v35 }
 0x265   :  { %2959 = vmatprep.subr.bf16.mxu0 %v3837_v39  ;;  %3626 = vmatpush3.bf16.msra.mxu1 %v3886_v7 }
 0x268   :  { %2960 = vmatpush1.bf16.msra.mxu0 %v3835_v40 }
 0x269   :  { %2961 = vmatprep.subr.bf16.mxu0 %v3840_v41 }
 0x26c   :  { %2962 = vmatpush1.bf16.msra.mxu0 %v3838_v42 }
 0x26d   :  { %2963 = vmatprep.subr.bf16.mxu0 %v3843_v43 }
 0x270   :  { %2964 = vmatpush1.bf16.msra.mxu0 %v3841_v44 }
 0x271   :  { %2965 = vmatprep.subr.bf16.mxu0 %v3846_v45 }
 0x274   :  { %2966 = vmatpush1.bf16.msra.mxu0 %v3844_v46 }
 0x275   :  { %2967 = vmatprep.subr.bf16.mxu0 %v3849_v47 }
 0x278   :  { %2968 = vmatpush1.bf16.msra.mxu0 %v3847_v48 }
 0x279   :  { %2969 = vmatprep.subr.bf16.mxu0 %v3852_v49 }
 0x27c   :  { %2970 = vmatpush1.bf16.msra.mxu0 %v3850_v51 }
 0x27d   :  { %2971 = vmatprep.subr.bf16.mxu0 %v3855_v53 }
 0x27e   :  { %v1985_v58 = vpop.f32.mrb[8].mxu1 }
 0x27f   :  { %v3639_v59 = vadd.f32 %v1985_v58, %v342_v54  ;;  %v1987_v60 = vpop.f32.mrb[9].mxu1 }
 0x280   :  { %v3640_v61 = vadd.f32 %v1987_v60, %v346_v55  ;;  %v1989_v62 = vpop.f32.mrb[10].mxu1  ;;  %2972 = vmatpush1.bf16.msra.mxu0 %v3853_v56  ;;  %v3594_v55 = vld [vmem:[%s4201_s6] ss:$0 sm:$0xff] }
 0x281   :  { %v2006_v11 = vmin.f32 %v3639_v59, 0.0  ;;  %v1990_v0 = vpop.f32.mrb[11].mxu1  ;;  %2973 = vmatprep.subr.bf16.mxu0 %v3858_v57  ;;  %vm1998_vm6 = vcmp.gt.f32.partialorder %v3639_v59, 0.0 }
 0x282   :  { %v2007_v2 = vmin.f32 %v3640_v61, 0.0  ;;  %vm1999_vm7 = vcmp.gt.f32.partialorder %v3640_v61, 0.0 }
 0x283   :  { %v2020_v4 = vmul.f32 1.442695, %v2006_v11 }
 0x284   :  { %v2022_v5 = vmul.f32 1.442695, %v2007_v2  ;;  %2974 = vmatpush1.bf16.msra.mxu0 %v3856_v63 }
 0x285   :  { %3899 = vpow2.f32 %v2020_v4  ;;  %2975 = vmatprep.subr.bf16.mxu0 %v3861_v1 }
 0x286   :  { %3901 = vpow2.f32 %v2022_v5 }
 0x288   :  { %2976 = vmatpush1.bf16.msra.mxu0 %v3859_v6 }
 0x289   :  { %2977 = vmatprep.subr.bf16.mxu0 %v3864_v34 }
 0x28c   :  { %2978 = vmatpush1.bf16.msra.mxu0 %v3862_v8 }
 0x28d   :  { %2979 = vmatprep.subr.bf16.mxu0 %v3867_v9 }
 0x28f   :  { %v3900_v20 = vpop.eup %3899 }
 0x290   :  { %v3902_v23 = vpop.eup %3901  ;;  %v3462_v13 = vadd.f32 -1.0, %v3900_v20  ;;  %2980 = vmatpush1.bf16.msra.mxu0 %v3865_v10 }
 0x291   :  { %2981 = vmatprep.subr.bf16.mxu0 %v3870_v12  ;;  %v3463_v16 = vadd.f32 -1.0, %v3902_v23 }
 0x292   :  { %v2038_v17 = vsel %vm1998_vm6, %v3639_v59, %v3462_v13 }
 0x293   :  { %v2039_v19 = vsel %vm1999_vm7, %v3640_v61, %v3463_v16  ;;  %v2046_v21 = vpack.c.bf16 %v2038_v17, %v2038_v17 }
 0x294   :  { %2982 = vmatpush1.bf16.msra.mxu0 %v3868_v15  ;;  %v2047_v18 = vpack.c.bf16 %v2039_v19, %v2039_v19 }
 0x296   :  { %2983 = vmatprep.mubr.bf16.mxu0 %v2047_v18 }
 0x297   :  { %2984 = vmatmul.mubr.bf16.vlgmr.msra.gmra.mrb[4].mxu0 %v2046_v21 }
 0x36a   :  { %v2985_v39 = vpop.f32.mrb[4].mxu0 }
 0x36b   :  { %v3641_v40 = vadd.f32 %v2985_v39, %v2181_v37  ;;  %v2987_v41 = vpop.f32.mrb[5].mxu0 }
 0x36c   :  { %v3642_v42 = vadd.f32 %v2987_v41, %v2185_v38  ;;  %v2989_v43 = vpop.f32.mrb[6].mxu0 }
 0x36d   :  { %v2994_v44 = vmin.f32 %v3641_v40, 0.0  ;;  %v2990_v45 = vpop.f32.mrb[7].mxu0  ;;  %vm2992_vm8 = vcmp.gt.f32.partialorder %v3641_v40, 0.0 }
 0x36e   :  { %v2995_v46 = vmin.f32 %v3642_v42, 0.0  ;;  %vm2993_vm9 = vcmp.gt.f32.partialorder %v3642_v42, 0.0 }
 0x36f   :  { %v2996_v47 = vmul.f32 1.442695, %v2994_v44 }
 0x370   :  { %v2998_v48 = vmul.f32 1.442695, %v2995_v46 }
 0x371   :  { %3903 = vpow2.f32 %v2996_v47 }
 0x372   :  { %3905 = vpow2.f32 %v2998_v48 }
 0x37b   :  { %v3904_v49 = vpop.eup %3903 }
 0x37c   :  { %v3906_v50 = vpop.eup %3905  ;;  %v3592_v51 = vadd.f32 -1.0, %v3904_v49 }
 0x37d   :  { %v3593_v33 = vadd.f32 -1.0, %v3906_v50 }
 0x37e   :  { %v3002_v52 = vsel %vm2992_vm8, %v3641_v40, %v3592_v51 }
 0x37f   :  { %v3003_v14 = vsel %vm2993_vm9, %v3642_v42, %v3593_v33  ;;  %v3004_v53 = vpack.c.bf16 %v3002_v52, %v3002_v52 }
 0x380   :  { %v3005_v35 = vpack.c.bf16 %v3003_v14, %v3003_v14 }
 0x382   :  { %3173 = vmatprep.mubr.bf16.mxu1 %v3005_v35 }
 0x383   :  { %3174 = vmatmul.mubr.bf16.vlgmr.msra.gmra.mrb[12].mxu1 %v3004_v53 }
 0x456   :  { %v3627_v54 = vpop.f32.mrb[12].mxu1 }
 0x457   :  { %v3628_v56 = vpop.f32.mrb[13].mxu1 }
 0x458   :  { %v3629_v57 = vadd.f32 %v3628_v56, %v3627_v54  ;;  %v3630_v58 = vpop.f32.mrb[14].mxu1 }
 0x459   :  { %v3631_v59 = vpop.f32.mrb[15].mxu1 }
 0x45a   :  { %v3176_v60 = vadd.f32 %v3629_v57, %v3594_v55 }
 0x45c   :  { %3182 = vst.msk [vmem:[#allocation7] sm:$0x3] %vm3181_vm10, %v3176_v60 }
 0x45d   :  { %3962 = shalt.err (!%p3959_p6)
}
 0x45e   :  { %s3963_s6 = scalar_lea.hbm %s4202_s7, 32 }
 0x45f   :  { %p3964_p7 = scmp.ne.s32.totalorder %s4202_s7, %s3963_s6  ;;  %p3967_p8 = scmp.lt.u32.totalorder %s3963_s6, %s4202_s7 }
 0x461   :  { %p3969_p9 = pnand %p3967_p8, %p3964_p7 }
 0x463   :  { %3972 = shalt.err (!%p3969_p9)
}
 0x464   :  { %3192 = dma.vmem_to_hbm [thread:$0]  %s3190_s14, 32, %s4202_s7, [#allocation4]  }
 0x465   :  { %3977 = dma.done.wait [#allocation4], 32  }
 0x466   :  { %3978 = vsyncadd [#allocation4], 4294967264 }
 0x467   :  { %3196 = vsyncpa [#allocation3], 1 }
 0x468   :  { %3197 = vsyncpa [#allocation6], 1 }
 0x469   :  { %3198 = vsyncpa [#allocation4], 1 }

</bundles_post_ra>
